<compile_context>
chip_gen: v6e
topology: v6e:2x2x1
jax: 0.10.0
libtpu: 0.0.40
codegen_flags: <defaults>
</compile_context>

<pallas_src>
import functools

import jax
import jax.numpy as jnp
from jax.experimental import pallas as pl
from jax.experimental.pallas import tpu as pltpu

# KANLinear hyper-parameters (efficient-KAN defaults)
GRID_SIZE = 5
SPLINE_ORDER = 3
N_COEFF = GRID_SIZE + SPLINE_ORDER            # 8 B-spline coefficients / input feature
N_KNOTS = GRID_SIZE + 2 * SPLINE_ORDER + 1    # 12 uniform knots / input feature
GRID_RANGE = (-1.0, 1.0)
_H = (GRID_RANGE[1] - GRID_RANGE[0]) / GRID_SIZE
# Uniform knots, identical for every feature -> compile-time Python scalars.
_KNOTS = tuple(GRID_RANGE[0] + (j - SPLINE_ORDER) * _H for j in range(N_KNOTS))

LANE = 128          # lane tile: all Fin / Fout padded to a multiple of this
BF16_SUBLANE = 16   # bf16 sublane tile: batch tile is a multiple of this


def _round_up(v, m):
    return ((v + m - 1) // m) * m


def _silu_and_bases(x):
    """SiLU base activation + the N_COEFF cubic B-spline bases of x (f32 each).

    Shared by kernel and reference so the math is bit-identical.
    Cox-de Boor on a uniform grid: the 1/(k*h) reciprocal is hoisted into
    xs = x * inv once per level, knots fold into compile-time constants, and
    d = xs - c_j is reused for both factors (right factor = (k+1)/k - d).
    """
    t = _KNOTS
    # Degree-0 bases. Half-open interval matches efficient-KAN: x at/after the
    # last knot gives a zero spline branch (only the SiLU branch contributes).
    bases = [((x >= t[j]) & (x < t[j + 1])).astype(jnp.float32)
             for j in range(N_KNOTS - 1)]
    for k in range(1, SPLINE_ORDER + 1):
        inv = 1.0 / (k * _H)
        ratio = (k + 1.0) / k                 # == (t[j+k+1] - t[j]) * inv
        xs = x * inv
        nxt = []
        for j in range(N_KNOTS - 1 - k):
            d = xs - (t[j] * inv)
            nxt.append(d * bases[j] + (ratio - d) * bases[j + 1])
        bases = nxt
    silu = x * jax.nn.sigmoid(x)              # EUP sigmoid + VPU mul
    return [silu] + bases                     # 1 + N_COEFF arrays, x.shape each


def _fused_kan_kernel(fin_pads, x_ref, *refs):
    """All KANLinear layers fused; intermediates never leave vregs/VMEM.

    refs = (w_1, ..., w_L, o_ref, lhs_scratch)
      w_i        : (9*fin_pads[i], fout_pad_i) bf16 stacked weight
      lhs_scratch: (tile_B, 9*max(fin_pads)) bf16 matmul-LHS staging buffer
    """
    o_ref = refs[-2]
    lhs = refs[-1]
    w_refs = refs[:-2]

    x = x_ref[...].astype(jnp.float32)
    for w_ref, fin_p in zip(w_refs, fin_pads):
        parts = _silu_and_bases(x)            # 9 f32 arrays (tile_B, fin_p)
        # Build the bf16 matmul LHS in-place in VMEM scratch (lane-aligned,
        # static 128-multiple slices).
        for j, p in enumerate(parts):
            lhs[:, j * fin_p:(j + 1) * fin_p] = p.astype(jnp.bfloat16)
        # Single wide-K MXU matmul per layer, f32 accumulation inside the MXU.
        x = jnp.dot(lhs[:, :(1 + N_COEFF) * fin_p], w_ref[...],
                    preferred_element_type=jnp.float32)
    o_ref[...] = x.astype(o_ref.dtype)


def fused_kan_forward(x, weights, fin_pads, n_out, *, tile_b=None):
    """x: (B, fin_pads[0]) f32; weights: stacked (9*fin_p, fout_p) bf16 mats."""
    b = x.shape[0]
    if tile_b is None:
        # 256-row tiles at large batch (good MXU occupancy / pipelining);
        # shrink to the bf16 sublane tile for tiny demo batches.
        tile_b = min(256, _round_up(b, BF16_SUBLANE))
    tile_b = _round_up(tile_b, BF16_SUBLANE)
    bpad = _round_up(b, tile_b)
    if bpad != b:
        x = jnp.pad(x, ((0, bpad - b), (0, 0)))

    fin0 = fin_pads[0]
    fin_max = max(fin_pads)
    fout_last = weights[-1].shape[1]
    grid = (bpad // tile_b,)

    in_specs = [pl.BlockSpec((tile_b, fin0), lambda i: (i, 0))]
    for w in weights:
        # Full-array block, grid-invariant index_map: DMA'd once, stays
        # VMEM-resident across batch tiles (no per-iteration re-fetch).
        in_specs.append(pl.BlockSpec(w.shape, lambda i: (0, 0)))
    out_spec = pl.BlockSpec((tile_b, fout_last), lambda i: (i, 0))

    kernel = functools.partial(_fused_kan_kernel, tuple(fin_pads))
    out = pl.pallas_call(
        kernel,
        out_shape=jax.ShapeDtypeStruct((bpad, fout_last), jnp.float32),
        grid=grid,
        in_specs=in_specs,
        out_specs=out_spec,
        scratch_shapes=[
            pltpu.VMEM((tile_b, (1 + N_COEFF) * fin_max), jnp.bfloat16)],
        compiler_params=pltpu.CompilerParams(
            # batch axis is embarrassingly parallel -> 2-TC sharding on v7x
            dimension_semantics=("parallel",),
            # above the default scoped limit so resident bf16 weights at
            # production size (D=768, ~37 MiB) are accepted; fits v7x's 64 MiB.
            vmem_limit_bytes=48 * 1024 * 1024,
        ),
    )(x, *weights)
    return out[:b, :n_out]


def make_kan_params(key, fin, fout, fin_pad, fout_pad):
    """Synthetic KANLinear params pre-stacked into one (9*fin_pad, fout_pad) bf16 matrix.

    Row layout (blocks of fin_pad rows):
      block 0   rows [0, fin)        : base_weight^T                      (SiLU branch)
      block j+1 rows [0, fin)        : (spline_weight * spline_scaler)[:,:,j]^T
    Padded rows / columns are zero, so padded activation lanes contribute nothing.
    """
    k1, k2, k3 = jax.random.split(key, 3)
    base_weight = jax.random.normal(k1, (fout, fin), jnp.float32) * (1.0 / jnp.sqrt(fin))
    spline_weight = jax.random.normal(k2, (fout, fin, N_COEFF), jnp.float32) * 0.1
    spline_scaler = jax.random.normal(k3, (fout, fin), jnp.float32) * (1.0 / jnp.sqrt(fin))
    scaled = spline_weight * spline_scaler[:, :, None]        # (fout, fin, C)

    w = jnp.zeros(((1 + N_COEFF) * fin_pad, fout_pad), jnp.float32)
    w = w.at[:fin, :fout].set(base_weight.T)
    for j in range(N_COEFF):
        w = w.at[(j + 1) * fin_pad:(j + 1) * fin_pad + fin, :fout].set(scaled[:, :, j].T)
    return w.astype(jnp.bfloat16)


def model_forward(last_hidden_state, weights, fin_pads, n_out=5):
    """Post-encoder forward of Model: concat(first, last token) -> 4 x KANLinear."""
    x = jnp.concatenate(
        [last_hidden_state[:, 0, :], last_hidden_state[:, -1, :]], axis=1)
    if x.shape[1] < fin_pads[0]:
        x = jnp.pad(x, ((0, 0), (0, fin_pads[0] - x.shape[1])))
    return fused_kan_forward(x, weights, fin_pads, n_out)


def _kan_layer_ref(x, w_stack, fin_pad):
    """Pure-JAX reference for one KANLinear using the same stacked bf16 weights."""
    parts = _silu_and_bases(x)
    lhs = jnp.concatenate(parts, axis=-1).astype(jnp.bfloat16)  # (B, 9*fin_pad)
    return jnp.dot(lhs, w_stack, preferred_element_type=jnp.float32)


if __name__ == "__main__":
    # Small synthetic shapes consistent with the module's forward:
    # batch=2, seq=8, embedding_size=64 (distilroberta uses 768; shrunk for demo).
    B, S, D = 2, 8, 64
    key = jax.random.PRNGKey(0)
    k_in, k_p = jax.random.split(key)

    # Simulated encoder output (see TODO at top of file).
    last_hidden_state = jax.random.normal(k_in, (B, S, D), jnp.float32)

    layer_dims = [(2 * D, D), (D, D), (D, D // 2), (D // 2, 5)]
    fin_pads = [_round_up(fin, LANE) for fin, _ in layer_dims]
    fout_pads = [_round_up(fout, LANE) for _, fout in layer_dims]
    keys = jax.random.split(k_p, len(layer_dims))
    weights = [
        make_kan_params(kk, fin, fout, fp, op)
        for kk, (fin, fout), fp, op in zip(keys, layer_dims, fin_pads, fout_pads)
    ]

    out = jax.block_until_ready(model_forward(last_hidden_state, weights, fin_pads, n_out=5))
    assert out.shape == (B, 5), out.shape

    # Correctness check against a pure-JAX reference (same stacked bf16 weights).
    x_ref = jnp.concatenate(
        [last_hidden_state[:, 0, :], last_hidden_state[:, -1, :]], axis=1)
    x_ref = jnp.pad(x_ref, ((0, 0), (0, fin_pads[0] - x_ref.shape[1])))
    for w, fp in zip(weights, fin_pads):
        x_ref = _kan_layer_ref(x_ref, w, fp)
    x_ref = x_ref[:, :5]
    assert jnp.allclose(out, x_ref, atol=2e-3, rtol=2e-3), \
        float(jnp.max(jnp.abs(out - x_ref)))

    print("KERNEL_OK")
</pallas_src>

<mosaic_0001>
module attributes {stable_mosaic.version = 11 : i64} {
  func.func @_fused_kan_kernel(%arg0: i32, %arg1: memref<16x128xf32, #tpu.memory_space<vmem>>, %arg2: memref<1152x128xbf16, #tpu.memory_space<vmem>>, %arg3: memref<1152x128xbf16, #tpu.memory_space<vmem>>, %arg4: memref<1152x128xbf16, #tpu.memory_space<vmem>>, %arg5: memref<1152x128xbf16, #tpu.memory_space<vmem>>, %arg6: memref<16x128xf32, #tpu.memory_space<vmem>>, %arg7: memref<16x1152xbf16, #tpu.memory_space<vmem>>) attributes {dimension_semantics = [#tpu.dimension_semantics<parallel>], iteration_bounds = array<i64: 1>, scalar_prefetch = 0 : i64, scratch_operands = 1 : i64, tpu.core_type = #tpu.core_type<tc>, window_params = [{transform_indices = @transform_0, window_bounds = array<i64: 16, 128>}, {pipeline_mode = #tpu.pipeline_mode<synchronous>, transform_indices = @transform_1, window_bounds = array<i64: 1152, 128>}, {pipeline_mode = #tpu.pipeline_mode<synchronous>, transform_indices = @transform_2, window_bounds = array<i64: 1152, 128>}, {pipeline_mode = #tpu.pipeline_mode<synchronous>, transform_indices = @transform_3, window_bounds = array<i64: 1152, 128>}, {pipeline_mode = #tpu.pipeline_mode<synchronous>, transform_indices = @transform_4, window_bounds = array<i64: 1152, 128>}, {transform_indices = @transform_5, window_bounds = array<i64: 16, 128>}]} {
    %c0 = arith.constant 0 : index
    %c0_0 = arith.constant 0 : index
    %0 = vector.load %arg1[%c0, %c0_0] : memref<16x128xf32, #tpu.memory_space<vmem>>, vector<16x128xf32>
    %cst = arith.constant -2.200000e+00 : f32
    %1 = vector.broadcast %cst : f32 to vector<16x128xf32>
    %2 = arith.cmpf oge, %0, %1 : vector<16x128xf32>
    %cst_1 = arith.constant -1.800000e+00 : f32
    %3 = vector.broadcast %cst_1 : f32 to vector<16x128xf32>
    %4 = arith.cmpf olt, %0, %3 : vector<16x128xf32>
    %5 = arith.andi %2, %4 : vector<16x128xi1>
    %6 = arith.extui %5 : vector<16x128xi1> to vector<16x128xi32>
    %7 = arith.sitofp %6 : vector<16x128xi32> to vector<16x128xf32>
    %cst_2 = arith.constant -1.800000e+00 : f32
    %8 = vector.broadcast %cst_2 : f32 to vector<16x128xf32>
    %9 = arith.cmpf oge, %0, %8 : vector<16x128xf32>
    %cst_3 = arith.constant -1.400000e+00 : f32
    %10 = vector.broadcast %cst_3 : f32 to vector<16x128xf32>
    %11 = arith.cmpf olt, %0, %10 : vector<16x128xf32>
    %12 = arith.andi %9, %11 : vector<16x128xi1>
    %13 = arith.extui %12 : vector<16x128xi1> to vector<16x128xi32>
    %14 = arith.sitofp %13 : vector<16x128xi32> to vector<16x128xf32>
    %cst_4 = arith.constant -1.400000e+00 : f32
    %15 = vector.broadcast %cst_4 : f32 to vector<16x128xf32>
    %16 = arith.cmpf oge, %0, %15 : vector<16x128xf32>
    %cst_5 = arith.constant -1.000000e+00 : f32
    %17 = vector.broadcast %cst_5 : f32 to vector<16x128xf32>
    %18 = arith.cmpf olt, %0, %17 : vector<16x128xf32>
    %19 = arith.andi %16, %18 : vector<16x128xi1>
    %20 = arith.extui %19 : vector<16x128xi1> to vector<16x128xi32>
    %21 = arith.sitofp %20 : vector<16x128xi32> to vector<16x128xf32>
    %cst_6 = arith.constant -1.000000e+00 : f32
    %22 = vector.broadcast %cst_6 : f32 to vector<16x128xf32>
    %23 = arith.cmpf oge, %0, %22 : vector<16x128xf32>
    %cst_7 = arith.constant -6.000000e-01 : f32
    %24 = vector.broadcast %cst_7 : f32 to vector<16x128xf32>
    %25 = arith.cmpf olt, %0, %24 : vector<16x128xf32>
    %26 = arith.andi %23, %25 : vector<16x128xi1>
    %27 = arith.extui %26 : vector<16x128xi1> to vector<16x128xi32>
    %28 = arith.sitofp %27 : vector<16x128xi32> to vector<16x128xf32>
    %cst_8 = arith.constant -6.000000e-01 : f32
    %29 = vector.broadcast %cst_8 : f32 to vector<16x128xf32>
    %30 = arith.cmpf oge, %0, %29 : vector<16x128xf32>
    %cst_9 = arith.constant -2.000000e-01 : f32
    %31 = vector.broadcast %cst_9 : f32 to vector<16x128xf32>
    %32 = arith.cmpf olt, %0, %31 : vector<16x128xf32>
    %33 = arith.andi %30, %32 : vector<16x128xi1>
    %34 = arith.extui %33 : vector<16x128xi1> to vector<16x128xi32>
    %35 = arith.sitofp %34 : vector<16x128xi32> to vector<16x128xf32>
    %cst_10 = arith.constant -2.000000e-01 : f32
    %36 = vector.broadcast %cst_10 : f32 to vector<16x128xf32>
    %37 = arith.cmpf oge, %0, %36 : vector<16x128xf32>
    %cst_11 = arith.constant 2.000000e-01 : f32
    %38 = vector.broadcast %cst_11 : f32 to vector<16x128xf32>
    %39 = arith.cmpf olt, %0, %38 : vector<16x128xf32>
    %40 = arith.andi %37, %39 : vector<16x128xi1>
    %41 = arith.extui %40 : vector<16x128xi1> to vector<16x128xi32>
    %42 = arith.sitofp %41 : vector<16x128xi32> to vector<16x128xf32>
    %cst_12 = arith.constant 2.000000e-01 : f32
    %43 = vector.broadcast %cst_12 : f32 to vector<16x128xf32>
    %44 = arith.cmpf oge, %0, %43 : vector<16x128xf32>
    %cst_13 = arith.constant 6.000000e-01 : f32
    %45 = vector.broadcast %cst_13 : f32 to vector<16x128xf32>
    %46 = arith.cmpf olt, %0, %45 : vector<16x128xf32>
    %47 = arith.andi %44, %46 : vector<16x128xi1>
    %48 = arith.extui %47 : vector<16x128xi1> to vector<16x128xi32>
    %49 = arith.sitofp %48 : vector<16x128xi32> to vector<16x128xf32>
    %cst_14 = arith.constant 6.000000e-01 : f32
    %50 = vector.broadcast %cst_14 : f32 to vector<16x128xf32>
    %51 = arith.cmpf oge, %0, %50 : vector<16x128xf32>
    %cst_15 = arith.constant 1.000000e+00 : f32
    %52 = vector.broadcast %cst_15 : f32 to vector<16x128xf32>
    %53 = arith.cmpf olt, %0, %52 : vector<16x128xf32>
    %54 = arith.andi %51, %53 : vector<16x128xi1>
    %55 = arith.extui %54 : vector<16x128xi1> to vector<16x128xi32>
    %56 = arith.sitofp %55 : vector<16x128xi32> to vector<16x128xf32>
    %cst_16 = arith.constant 1.000000e+00 : f32
    %57 = vector.broadcast %cst_16 : f32 to vector<16x128xf32>
    %58 = arith.cmpf oge, %0, %57 : vector<16x128xf32>
    %cst_17 = arith.constant 1.400000e+00 : f32
    %59 = vector.broadcast %cst_17 : f32 to vector<16x128xf32>
    %60 = arith.cmpf olt, %0, %59 : vector<16x128xf32>
    %61 = arith.andi %58, %60 : vector<16x128xi1>
    %62 = arith.extui %61 : vector<16x128xi1> to vector<16x128xi32>
    %63 = arith.sitofp %62 : vector<16x128xi32> to vector<16x128xf32>
    %cst_18 = arith.constant 1.400000e+00 : f32
    %64 = vector.broadcast %cst_18 : f32 to vector<16x128xf32>
    %65 = arith.cmpf oge, %0, %64 : vector<16x128xf32>
    %cst_19 = arith.constant 1.800000e+00 : f32
    %66 = vector.broadcast %cst_19 : f32 to vector<16x128xf32>
    %67 = arith.cmpf olt, %0, %66 : vector<16x128xf32>
    %68 = arith.andi %65, %67 : vector<16x128xi1>
    %69 = arith.extui %68 : vector<16x128xi1> to vector<16x128xi32>
    %70 = arith.sitofp %69 : vector<16x128xi32> to vector<16x128xf32>
    %cst_20 = arith.constant 1.800000e+00 : f32
    %71 = vector.broadcast %cst_20 : f32 to vector<16x128xf32>
    %72 = arith.cmpf oge, %0, %71 : vector<16x128xf32>
    %cst_21 = arith.constant 2.200000e+00 : f32
    %73 = vector.broadcast %cst_21 : f32 to vector<16x128xf32>
    %74 = arith.cmpf olt, %0, %73 : vector<16x128xf32>
    %75 = arith.andi %72, %74 : vector<16x128xi1>
    %76 = arith.extui %75 : vector<16x128xi1> to vector<16x128xi32>
    %77 = arith.sitofp %76 : vector<16x128xi32> to vector<16x128xf32>
    %cst_22 = arith.constant 2.500000e+00 : f32
    %78 = vector.broadcast %cst_22 : f32 to vector<16x128xf32>
    %79 = arith.mulf %0, %78 : vector<16x128xf32>
    %cst_23 = arith.constant -5.500000e+00 : f32
    %80 = vector.broadcast %cst_23 : f32 to vector<16x128xf32>
    %81 = arith.subf %79, %80 : vector<16x128xf32>
    %82 = arith.mulf %81, %7 : vector<16x128xf32>
    %cst_24 = arith.constant 2.000000e+00 : f32
    %83 = vector.broadcast %cst_24 : f32 to vector<16x128xf32>
    %84 = arith.subf %83, %81 : vector<16x128xf32>
    %85 = arith.mulf %84, %14 : vector<16x128xf32>
    %86 = arith.addf %82, %85 : vector<16x128xf32>
    %cst_25 = arith.constant -4.500000e+00 : f32
    %87 = vector.broadcast %cst_25 : f32 to vector<16x128xf32>
    %88 = arith.subf %79, %87 : vector<16x128xf32>
    %89 = arith.mulf %88, %14 : vector<16x128xf32>
    %cst_26 = arith.constant 2.000000e+00 : f32
    %90 = vector.broadcast %cst_26 : f32 to vector<16x128xf32>
    %91 = arith.subf %90, %88 : vector<16x128xf32>
    %92 = arith.mulf %91, %21 : vector<16x128xf32>
    %93 = arith.addf %89, %92 : vector<16x128xf32>
    %cst_27 = arith.constant -3.500000e+00 : f32
    %94 = vector.broadcast %cst_27 : f32 to vector<16x128xf32>
    %95 = arith.subf %79, %94 : vector<16x128xf32>
    %96 = arith.mulf %95, %21 : vector<16x128xf32>
    %cst_28 = arith.constant 2.000000e+00 : f32
    %97 = vector.broadcast %cst_28 : f32 to vector<16x128xf32>
    %98 = arith.subf %97, %95 : vector<16x128xf32>
    %99 = arith.mulf %98, %28 : vector<16x128xf32>
    %100 = arith.addf %96, %99 : vector<16x128xf32>
    %cst_29 = arith.constant -2.500000e+00 : f32
    %101 = vector.broadcast %cst_29 : f32 to vector<16x128xf32>
    %102 = arith.subf %79, %101 : vector<16x128xf32>
    %103 = arith.mulf %102, %28 : vector<16x128xf32>
    %cst_30 = arith.constant 2.000000e+00 : f32
    %104 = vector.broadcast %cst_30 : f32 to vector<16x128xf32>
    %105 = arith.subf %104, %102 : vector<16x128xf32>
    %106 = arith.mulf %105, %35 : vector<16x128xf32>
    %107 = arith.addf %103, %106 : vector<16x128xf32>
    %cst_31 = arith.constant -1.500000e+00 : f32
    %108 = vector.broadcast %cst_31 : f32 to vector<16x128xf32>
    %109 = arith.subf %79, %108 : vector<16x128xf32>
    %110 = arith.mulf %109, %35 : vector<16x128xf32>
    %cst_32 = arith.constant 2.000000e+00 : f32
    %111 = vector.broadcast %cst_32 : f32 to vector<16x128xf32>
    %112 = arith.subf %111, %109 : vector<16x128xf32>
    %113 = arith.mulf %112, %42 : vector<16x128xf32>
    %114 = arith.addf %110, %113 : vector<16x128xf32>
    %cst_33 = arith.constant -5.000000e-01 : f32
    %115 = vector.broadcast %cst_33 : f32 to vector<16x128xf32>
    %116 = arith.subf %79, %115 : vector<16x128xf32>
    %117 = arith.mulf %116, %42 : vector<16x128xf32>
    %cst_34 = arith.constant 2.000000e+00 : f32
    %118 = vector.broadcast %cst_34 : f32 to vector<16x128xf32>
    %119 = arith.subf %118, %116 : vector<16x128xf32>
    %120 = arith.mulf %119, %49 : vector<16x128xf32>
    %121 = arith.addf %117, %120 : vector<16x128xf32>
    %cst_35 = arith.constant 5.000000e-01 : f32
    %122 = vector.broadcast %cst_35 : f32 to vector<16x128xf32>
    %123 = arith.subf %79, %122 : vector<16x128xf32>
    %124 = arith.mulf %123, %49 : vector<16x128xf32>
    %cst_36 = arith.constant 2.000000e+00 : f32
    %125 = vector.broadcast %cst_36 : f32 to vector<16x128xf32>
    %126 = arith.subf %125, %123 : vector<16x128xf32>
    %127 = arith.mulf %126, %56 : vector<16x128xf32>
    %128 = arith.addf %124, %127 : vector<16x128xf32>
    %cst_37 = arith.constant 1.500000e+00 : f32
    %129 = vector.broadcast %cst_37 : f32 to vector<16x128xf32>
    %130 = arith.subf %79, %129 : vector<16x128xf32>
    %131 = arith.mulf %130, %56 : vector<16x128xf32>
    %cst_38 = arith.constant 2.000000e+00 : f32
    %132 = vector.broadcast %cst_38 : f32 to vector<16x128xf32>
    %133 = arith.subf %132, %130 : vector<16x128xf32>
    %134 = arith.mulf %133, %63 : vector<16x128xf32>
    %135 = arith.addf %131, %134 : vector<16x128xf32>
    %cst_39 = arith.constant 2.500000e+00 : f32
    %136 = vector.broadcast %cst_39 : f32 to vector<16x128xf32>
    %137 = arith.subf %79, %136 : vector<16x128xf32>
    %138 = arith.mulf %137, %63 : vector<16x128xf32>
    %cst_40 = arith.constant 2.000000e+00 : f32
    %139 = vector.broadcast %cst_40 : f32 to vector<16x128xf32>
    %140 = arith.subf %139, %137 : vector<16x128xf32>
    %141 = arith.mulf %140, %70 : vector<16x128xf32>
    %142 = arith.addf %138, %141 : vector<16x128xf32>
    %cst_41 = arith.constant 3.500000e+00 : f32
    %143 = vector.broadcast %cst_41 : f32 to vector<16x128xf32>
    %144 = arith.subf %79, %143 : vector<16x128xf32>
    %145 = arith.mulf %144, %70 : vector<16x128xf32>
    %cst_42 = arith.constant 2.000000e+00 : f32
    %146 = vector.broadcast %cst_42 : f32 to vector<16x128xf32>
    %147 = arith.subf %146, %144 : vector<16x128xf32>
    %148 = arith.mulf %147, %77 : vector<16x128xf32>
    %149 = arith.addf %145, %148 : vector<16x128xf32>
    %cst_43 = arith.constant 1.250000e+00 : f32
    %150 = vector.broadcast %cst_43 : f32 to vector<16x128xf32>
    %151 = arith.mulf %0, %150 : vector<16x128xf32>
    %cst_44 = arith.constant -2.750000e+00 : f32
    %152 = vector.broadcast %cst_44 : f32 to vector<16x128xf32>
    %153 = arith.subf %151, %152 : vector<16x128xf32>
    %154 = arith.mulf %153, %86 : vector<16x128xf32>
    %cst_45 = arith.constant 1.500000e+00 : f32
    %155 = vector.broadcast %cst_45 : f32 to vector<16x128xf32>
    %156 = arith.subf %155, %153 : vector<16x128xf32>
    %157 = arith.mulf %156, %93 : vector<16x128xf32>
    %158 = arith.addf %154, %157 : vector<16x128xf32>
    %cst_46 = arith.constant -2.250000e+00 : f32
    %159 = vector.broadcast %cst_46 : f32 to vector<16x128xf32>
    %160 = arith.subf %151, %159 : vector<16x128xf32>
    %161 = arith.mulf %160, %93 : vector<16x128xf32>
    %cst_47 = arith.constant 1.500000e+00 : f32
    %162 = vector.broadcast %cst_47 : f32 to vector<16x128xf32>
    %163 = arith.subf %162, %160 : vector<16x128xf32>
    %164 = arith.mulf %163, %100 : vector<16x128xf32>
    %165 = arith.addf %161, %164 : vector<16x128xf32>
    %cst_48 = arith.constant -1.750000e+00 : f32
    %166 = vector.broadcast %cst_48 : f32 to vector<16x128xf32>
    %167 = arith.subf %151, %166 : vector<16x128xf32>
    %168 = arith.mulf %167, %100 : vector<16x128xf32>
    %cst_49 = arith.constant 1.500000e+00 : f32
    %169 = vector.broadcast %cst_49 : f32 to vector<16x128xf32>
    %170 = arith.subf %169, %167 : vector<16x128xf32>
    %171 = arith.mulf %170, %107 : vector<16x128xf32>
    %172 = arith.addf %168, %171 : vector<16x128xf32>
    %cst_50 = arith.constant -1.250000e+00 : f32
    %173 = vector.broadcast %cst_50 : f32 to vector<16x128xf32>
    %174 = arith.subf %151, %173 : vector<16x128xf32>
    %175 = arith.mulf %174, %107 : vector<16x128xf32>
    %cst_51 = arith.constant 1.500000e+00 : f32
    %176 = vector.broadcast %cst_51 : f32 to vector<16x128xf32>
    %177 = arith.subf %176, %174 : vector<16x128xf32>
    %178 = arith.mulf %177, %114 : vector<16x128xf32>
    %179 = arith.addf %175, %178 : vector<16x128xf32>
    %cst_52 = arith.constant -7.500000e-01 : f32
    %180 = vector.broadcast %cst_52 : f32 to vector<16x128xf32>
    %181 = arith.subf %151, %180 : vector<16x128xf32>
    %182 = arith.mulf %181, %114 : vector<16x128xf32>
    %cst_53 = arith.constant 1.500000e+00 : f32
    %183 = vector.broadcast %cst_53 : f32 to vector<16x128xf32>
    %184 = arith.subf %183, %181 : vector<16x128xf32>
    %185 = arith.mulf %184, %121 : vector<16x128xf32>
    %186 = arith.addf %182, %185 : vector<16x128xf32>
    %cst_54 = arith.constant -2.500000e-01 : f32
    %187 = vector.broadcast %cst_54 : f32 to vector<16x128xf32>
    %188 = arith.subf %151, %187 : vector<16x128xf32>
    %189 = arith.mulf %188, %121 : vector<16x128xf32>
    %cst_55 = arith.constant 1.500000e+00 : f32
    %190 = vector.broadcast %cst_55 : f32 to vector<16x128xf32>
    %191 = arith.subf %190, %188 : vector<16x128xf32>
    %192 = arith.mulf %191, %128 : vector<16x128xf32>
    %193 = arith.addf %189, %192 : vector<16x128xf32>
    %cst_56 = arith.constant 2.500000e-01 : f32
    %194 = vector.broadcast %cst_56 : f32 to vector<16x128xf32>
    %195 = arith.subf %151, %194 : vector<16x128xf32>
    %196 = arith.mulf %195, %128 : vector<16x128xf32>
    %cst_57 = arith.constant 1.500000e+00 : f32
    %197 = vector.broadcast %cst_57 : f32 to vector<16x128xf32>
    %198 = arith.subf %197, %195 : vector<16x128xf32>
    %199 = arith.mulf %198, %135 : vector<16x128xf32>
    %200 = arith.addf %196, %199 : vector<16x128xf32>
    %cst_58 = arith.constant 7.500000e-01 : f32
    %201 = vector.broadcast %cst_58 : f32 to vector<16x128xf32>
    %202 = arith.subf %151, %201 : vector<16x128xf32>
    %203 = arith.mulf %202, %135 : vector<16x128xf32>
    %cst_59 = arith.constant 1.500000e+00 : f32
    %204 = vector.broadcast %cst_59 : f32 to vector<16x128xf32>
    %205 = arith.subf %204, %202 : vector<16x128xf32>
    %206 = arith.mulf %205, %142 : vector<16x128xf32>
    %207 = arith.addf %203, %206 : vector<16x128xf32>
    %cst_60 = arith.constant 1.250000e+00 : f32
    %208 = vector.broadcast %cst_60 : f32 to vector<16x128xf32>
    %209 = arith.subf %151, %208 : vector<16x128xf32>
    %210 = arith.mulf %209, %142 : vector<16x128xf32>
    %cst_61 = arith.constant 1.500000e+00 : f32
    %211 = vector.broadcast %cst_61 : f32 to vector<16x128xf32>
    %212 = arith.subf %211, %209 : vector<16x128xf32>
    %213 = arith.mulf %212, %149 : vector<16x128xf32>
    %214 = arith.addf %210, %213 : vector<16x128xf32>
    %cst_62 = arith.constant 0.833333313 : f32
    %215 = vector.broadcast %cst_62 : f32 to vector<16x128xf32>
    %216 = arith.mulf %0, %215 : vector<16x128xf32>
    %cst_63 = arith.constant -1.83333337 : f32
    %217 = vector.broadcast %cst_63 : f32 to vector<16x128xf32>
    %218 = arith.subf %216, %217 : vector<16x128xf32>
    %219 = arith.mulf %218, %158 : vector<16x128xf32>
    %cst_64 = arith.constant 1.33333337 : f32
    %220 = vector.broadcast %cst_64 : f32 to vector<16x128xf32>
    %221 = arith.subf %220, %218 : vector<16x128xf32>
    %222 = arith.mulf %221, %165 : vector<16x128xf32>
    %223 = arith.addf %219, %222 : vector<16x128xf32>
    %cst_65 = arith.constant -1.500000e+00 : f32
    %224 = vector.broadcast %cst_65 : f32 to vector<16x128xf32>
    %225 = arith.subf %216, %224 : vector<16x128xf32>
    %226 = arith.mulf %225, %165 : vector<16x128xf32>
    %cst_66 = arith.constant 1.33333337 : f32
    %227 = vector.broadcast %cst_66 : f32 to vector<16x128xf32>
    %228 = arith.subf %227, %225 : vector<16x128xf32>
    %229 = arith.mulf %228, %172 : vector<16x128xf32>
    %230 = arith.addf %226, %229 : vector<16x128xf32>
    %cst_67 = arith.constant -1.16666663 : f32
    %231 = vector.broadcast %cst_67 : f32 to vector<16x128xf32>
    %232 = arith.subf %216, %231 : vector<16x128xf32>
    %233 = arith.mulf %232, %172 : vector<16x128xf32>
    %cst_68 = arith.constant 1.33333337 : f32
    %234 = vector.broadcast %cst_68 : f32 to vector<16x128xf32>
    %235 = arith.subf %234, %232 : vector<16x128xf32>
    %236 = arith.mulf %235, %179 : vector<16x128xf32>
    %237 = arith.addf %233, %236 : vector<16x128xf32>
    %cst_69 = arith.constant -0.833333313 : f32
    %238 = vector.broadcast %cst_69 : f32 to vector<16x128xf32>
    %239 = arith.subf %216, %238 : vector<16x128xf32>
    %240 = arith.mulf %239, %179 : vector<16x128xf32>
    %cst_70 = arith.constant 1.33333337 : f32
    %241 = vector.broadcast %cst_70 : f32 to vector<16x128xf32>
    %242 = arith.subf %241, %239 : vector<16x128xf32>
    %243 = arith.mulf %242, %186 : vector<16x128xf32>
    %244 = arith.addf %240, %243 : vector<16x128xf32>
    %cst_71 = arith.constant -5.000000e-01 : f32
    %245 = vector.broadcast %cst_71 : f32 to vector<16x128xf32>
    %246 = arith.subf %216, %245 : vector<16x128xf32>
    %247 = arith.mulf %246, %186 : vector<16x128xf32>
    %cst_72 = arith.constant 1.33333337 : f32
    %248 = vector.broadcast %cst_72 : f32 to vector<16x128xf32>
    %249 = arith.subf %248, %246 : vector<16x128xf32>
    %250 = arith.mulf %249, %193 : vector<16x128xf32>
    %251 = arith.addf %247, %250 : vector<16x128xf32>
    %cst_73 = arith.constant -0.166666672 : f32
    %252 = vector.broadcast %cst_73 : f32 to vector<16x128xf32>
    %253 = arith.subf %216, %252 : vector<16x128xf32>
    %254 = arith.mulf %253, %193 : vector<16x128xf32>
    %cst_74 = arith.constant 1.33333337 : f32
    %255 = vector.broadcast %cst_74 : f32 to vector<16x128xf32>
    %256 = arith.subf %255, %253 : vector<16x128xf32>
    %257 = arith.mulf %256, %200 : vector<16x128xf32>
    %258 = arith.addf %254, %257 : vector<16x128xf32>
    %cst_75 = arith.constant 0.166666672 : f32
    %259 = vector.broadcast %cst_75 : f32 to vector<16x128xf32>
    %260 = arith.subf %216, %259 : vector<16x128xf32>
    %261 = arith.mulf %260, %200 : vector<16x128xf32>
    %cst_76 = arith.constant 1.33333337 : f32
    %262 = vector.broadcast %cst_76 : f32 to vector<16x128xf32>
    %263 = arith.subf %262, %260 : vector<16x128xf32>
    %264 = arith.mulf %263, %207 : vector<16x128xf32>
    %265 = arith.addf %261, %264 : vector<16x128xf32>
    %cst_77 = arith.constant 5.000000e-01 : f32
    %266 = vector.broadcast %cst_77 : f32 to vector<16x128xf32>
    %267 = arith.subf %216, %266 : vector<16x128xf32>
    %268 = arith.mulf %267, %207 : vector<16x128xf32>
    %cst_78 = arith.constant 1.33333337 : f32
    %269 = vector.broadcast %cst_78 : f32 to vector<16x128xf32>
    %270 = arith.subf %269, %267 : vector<16x128xf32>
    %271 = arith.mulf %270, %214 : vector<16x128xf32>
    %272 = arith.addf %268, %271 : vector<16x128xf32>
    %273 = arith.negf %0 : vector<16x128xf32>
    %274 = math.exp %273 : vector<16x128xf32>
    %cst_79 = arith.constant 1.000000e+00 : f32
    %275 = vector.broadcast %cst_79 : f32 to vector<16x128xf32>
    %276 = arith.addf %275, %274 : vector<16x128xf32>
    %277 = arith.divf %275, %276 : vector<16x128xf32>
    %278 = arith.mulf %0, %277 : vector<16x128xf32>
    %279 = arith.truncf %278 : vector<16x128xf32> to vector<16x128xbf16>
    %c0_80 = arith.constant 0 : index
    %c0_81 = arith.constant 0 : index
    %280 = vector.load %arg7[%c0_80, %c0_81] : memref<16x1152xbf16, #tpu.memory_space<vmem>>, vector<16x128xbf16>
    tpu.vector_store %arg7[%c0_80, %c0_81], %279 {strides = array<i32>} : memref<16x1152xbf16, #tpu.memory_space<vmem>>, vector<16x128xbf16>,
    %281 = arith.truncf %223 : vector<16x128xf32> to vector<16x128xbf16>
    %c0_82 = arith.constant 0 : index
    %c128 = arith.constant 128 : index
    %282 = vector.load %arg7[%c0_82, %c128] : memref<16x1152xbf16, #tpu.memory_space<vmem>>, vector<16x128xbf16>
    tpu.vector_store %arg7[%c0_82, %c128], %281 {strides = array<i32>} : memref<16x1152xbf16, #tpu.memory_space<vmem>>, vector<16x128xbf16>,
    %283 = arith.truncf %230 : vector<16x128xf32> to vector<16x128xbf16>
    %c0_83 = arith.constant 0 : index
    %c256 = arith.constant 256 : index
    %284 = vector.load %arg7[%c0_83, %c256] : memref<16x1152xbf16, #tpu.memory_space<vmem>>, vector<16x128xbf16>
    tpu.vector_store %arg7[%c0_83, %c256], %283 {strides = array<i32>} : memref<16x1152xbf16, #tpu.memory_space<vmem>>, vector<16x128xbf16>,
    %285 = arith.truncf %237 : vector<16x128xf32> to vector<16x128xbf16>
    %c0_84 = arith.constant 0 : index
    %c384 = arith.constant 384 : index
    %286 = vector.load %arg7[%c0_84, %c384] : memref<16x1152xbf16, #tpu.memory_space<vmem>>, vector<16x128xbf16>
    tpu.vector_store %arg7[%c0_84, %c384], %285 {strides = array<i32>} : memref<16x1152xbf16, #tpu.memory_space<vmem>>, vector<16x128xbf16>,
    %287 = arith.truncf %244 : vector<16x128xf32> to vector<16x128xbf16>
    %c0_85 = arith.constant 0 : index
    %c512 = arith.constant 512 : index
    %288 = vector.load %arg7[%c0_85, %c512] : memref<16x1152xbf16, #tpu.memory_space<vmem>>, vector<16x128xbf16>
    tpu.vector_store %arg7[%c0_85, %c512], %287 {strides = array<i32>} : memref<16x1152xbf16, #tpu.memory_space<vmem>>, vector<16x128xbf16>,
    %289 = arith.truncf %251 : vector<16x128xf32> to vector<16x128xbf16>
    %c0_86 = arith.constant 0 : index
    %c640 = arith.constant 640 : index
    %290 = vector.load %arg7[%c0_86, %c640] : memref<16x1152xbf16, #tpu.memory_space<vmem>>, vector<16x128xbf16>
    tpu.vector_store %arg7[%c0_86, %c640], %289 {strides = array<i32>} : memref<16x1152xbf16, #tpu.memory_space<vmem>>, vector<16x128xbf16>,
    %291 = arith.truncf %258 : vector<16x128xf32> to vector<16x128xbf16>
    %c0_87 = arith.constant 0 : index
    %c768 = arith.constant 768 : index
    %292 = vector.load %arg7[%c0_87, %c768] : memref<16x1152xbf16, #tpu.memory_space<vmem>>, vector<16x128xbf16>
    tpu.vector_store %arg7[%c0_87, %c768], %291 {strides = array<i32>} : memref<16x1152xbf16, #tpu.memory_space<vmem>>, vector<16x128xbf16>,
    %293 = arith.truncf %265 : vector<16x128xf32> to vector<16x128xbf16>
    %c0_88 = arith.constant 0 : index
    %c896 = arith.constant 896 : index
    %294 = vector.load %arg7[%c0_88, %c896] : memref<16x1152xbf16, #tpu.memory_space<vmem>>, vector<16x128xbf16>
    tpu.vector_store %arg7[%c0_88, %c896], %293 {strides = array<i32>} : memref<16x1152xbf16, #tpu.memory_space<vmem>>, vector<16x128xbf16>,
    %295 = arith.truncf %272 : vector<16x128xf32> to vector<16x128xbf16>
    %c0_89 = arith.constant 0 : index
    %c1024 = arith.constant 1024 : index
    %296 = vector.load %arg7[%c0_89, %c1024] : memref<16x1152xbf16, #tpu.memory_space<vmem>>, vector<16x128xbf16>
    tpu.vector_store %arg7[%c0_89, %c1024], %295 {strides = array<i32>} : memref<16x1152xbf16, #tpu.memory_space<vmem>>, vector<16x128xbf16>,
    %c0_90 = arith.constant 0 : index
    %c0_91 = arith.constant 0 : index
    %297 = vector.load %arg7[%c0_90, %c0_91] : memref<16x1152xbf16, #tpu.memory_space<vmem>>, vector<16x1152xbf16>
    %c0_92 = arith.constant 0 : index
    %c0_93 = arith.constant 0 : index
    %298 = vector.load %arg2[%c0_92, %c0_93] : memref<1152x128xbf16, #tpu.memory_space<vmem>>, vector<1152x128xbf16>
    %cst_94 = arith.constant dense<0.000000e+00> : vector<16x128xf32>
    %299 = tpu.matmul %297, %298, %cst_94 {dimension_numbers = #tpu.dot_dimension_numbers<[1], [0], [0], [1], [0, 0, 1, 1], [], []>} : vector<16x1152xbf16>, vector<1152x128xbf16>, vector<16x128xf32> -> vector<16x128xf32>
    %cst_95 = arith.constant -2.200000e+00 : f32
    %300 = vector.broadcast %cst_95 : f32 to vector<16x128xf32>
    %301 = arith.cmpf oge, %299, %300 : vector<16x128xf32>
    %cst_96 = arith.constant -1.800000e+00 : f32
    %302 = vector.broadcast %cst_96 : f32 to vector<16x128xf32>
    %303 = arith.cmpf olt, %299, %302 : vector<16x128xf32>
    %304 = arith.andi %301, %303 : vector<16x128xi1>
    %305 = arith.extui %304 : vector<16x128xi1> to vector<16x128xi32>
    %306 = arith.sitofp %305 : vector<16x128xi32> to vector<16x128xf32>
    %cst_97 = arith.constant -1.800000e+00 : f32
    %307 = vector.broadcast %cst_97 : f32 to vector<16x128xf32>
    %308 = arith.cmpf oge, %299, %307 : vector<16x128xf32>
    %cst_98 = arith.constant -1.400000e+00 : f32
    %309 = vector.broadcast %cst_98 : f32 to vector<16x128xf32>
    %310 = arith.cmpf olt, %299, %309 : vector<16x128xf32>
    %311 = arith.andi %308, %310 : vector<16x128xi1>
    %312 = arith.extui %311 : vector<16x128xi1> to vector<16x128xi32>
    %313 = arith.sitofp %312 : vector<16x128xi32> to vector<16x128xf32>
    %cst_99 = arith.constant -1.400000e+00 : f32
    %314 = vector.broadcast %cst_99 : f32 to vector<16x128xf32>
    %315 = arith.cmpf oge, %299, %314 : vector<16x128xf32>
    %cst_100 = arith.constant -1.000000e+00 : f32
    %316 = vector.broadcast %cst_100 : f32 to vector<16x128xf32>
    %317 = arith.cmpf olt, %299, %316 : vector<16x128xf32>
    %318 = arith.andi %315, %317 : vector<16x128xi1>
    %319 = arith.extui %318 : vector<16x128xi1> to vector<16x128xi32>
    %320 = arith.sitofp %319 : vector<16x128xi32> to vector<16x128xf32>
    %cst_101 = arith.constant -1.000000e+00 : f32
    %321 = vector.broadcast %cst_101 : f32 to vector<16x128xf32>
    %322 = arith.cmpf oge, %299, %321 : vector<16x128xf32>
    %cst_102 = arith.constant -6.000000e-01 : f32
    %323 = vector.broadcast %cst_102 : f32 to vector<16x128xf32>
    %324 = arith.cmpf olt, %299, %323 : vector<16x128xf32>
    %325 = arith.andi %322, %324 : vector<16x128xi1>
    %326 = arith.extui %325 : vector<16x128xi1> to vector<16x128xi32>
    %327 = arith.sitofp %326 : vector<16x128xi32> to vector<16x128xf32>
    %cst_103 = arith.constant -6.000000e-01 : f32
    %328 = vector.broadcast %cst_103 : f32 to vector<16x128xf32>
    %329 = arith.cmpf oge, %299, %328 : vector<16x128xf32>
    %cst_104 = arith.constant -2.000000e-01 : f32
    %330 = vector.broadcast %cst_104 : f32 to vector<16x128xf32>
    %331 = arith.cmpf olt, %299, %330 : vector<16x128xf32>
    %332 = arith.andi %329, %331 : vector<16x128xi1>
    %333 = arith.extui %332 : vector<16x128xi1> to vector<16x128xi32>
    %334 = arith.sitofp %333 : vector<16x128xi32> to vector<16x128xf32>
    %cst_105 = arith.constant -2.000000e-01 : f32
    %335 = vector.broadcast %cst_105 : f32 to vector<16x128xf32>
    %336 = arith.cmpf oge, %299, %335 : vector<16x128xf32>
    %cst_106 = arith.constant 2.000000e-01 : f32
    %337 = vector.broadcast %cst_106 : f32 to vector<16x128xf32>
    %338 = arith.cmpf olt, %299, %337 : vector<16x128xf32>
    %339 = arith.andi %336, %338 : vector<16x128xi1>
    %340 = arith.extui %339 : vector<16x128xi1> to vector<16x128xi32>
    %341 = arith.sitofp %340 : vector<16x128xi32> to vector<16x128xf32>
    %cst_107 = arith.constant 2.000000e-01 : f32
    %342 = vector.broadcast %cst_107 : f32 to vector<16x128xf32>
    %343 = arith.cmpf oge, %299, %342 : vector<16x128xf32>
    %cst_108 = arith.constant 6.000000e-01 : f32
    %344 = vector.broadcast %cst_108 : f32 to vector<16x128xf32>
    %345 = arith.cmpf olt, %299, %344 : vector<16x128xf32>
    %346 = arith.andi %343, %345 : vector<16x128xi1>
    %347 = arith.extui %346 : vector<16x128xi1> to vector<16x128xi32>
    %348 = arith.sitofp %347 : vector<16x128xi32> to vector<16x128xf32>
    %cst_109 = arith.constant 6.000000e-01 : f32
    %349 = vector.broadcast %cst_109 : f32 to vector<16x128xf32>
    %350 = arith.cmpf oge, %299, %349 : vector<16x128xf32>
    %cst_110 = arith.constant 1.000000e+00 : f32
    %351 = vector.broadcast %cst_110 : f32 to vector<16x128xf32>
    %352 = arith.cmpf olt, %299, %351 : vector<16x128xf32>
    %353 = arith.andi %350, %352 : vector<16x128xi1>
    %354 = arith.extui %353 : vector<16x128xi1> to vector<16x128xi32>
    %355 = arith.sitofp %354 : vector<16x128xi32> to vector<16x128xf32>
    %cst_111 = arith.constant 1.000000e+00 : f32
    %356 = vector.broadcast %cst_111 : f32 to vector<16x128xf32>
    %357 = arith.cmpf oge, %299, %356 : vector<16x128xf32>
    %cst_112 = arith.constant 1.400000e+00 : f32
    %358 = vector.broadcast %cst_112 : f32 to vector<16x128xf32>
    %359 = arith.cmpf olt, %299, %358 : vector<16x128xf32>
    %360 = arith.andi %357, %359 : vector<16x128xi1>
    %361 = arith.extui %360 : vector<16x128xi1> to vector<16x128xi32>
    %362 = arith.sitofp %361 : vector<16x128xi32> to vector<16x128xf32>
    %cst_113 = arith.constant 1.400000e+00 : f32
    %363 = vector.broadcast %cst_113 : f32 to vector<16x128xf32>
    %364 = arith.cmpf oge, %299, %363 : vector<16x128xf32>
    %cst_114 = arith.constant 1.800000e+00 : f32
    %365 = vector.broadcast %cst_114 : f32 to vector<16x128xf32>
    %366 = arith.cmpf olt, %299, %365 : vector<16x128xf32>
    %367 = arith.andi %364, %366 : vector<16x128xi1>
    %368 = arith.extui %367 : vector<16x128xi1> to vector<16x128xi32>
    %369 = arith.sitofp %368 : vector<16x128xi32> to vector<16x128xf32>
    %cst_115 = arith.constant 1.800000e+00 : f32
    %370 = vector.broadcast %cst_115 : f32 to vector<16x128xf32>
    %371 = arith.cmpf oge, %299, %370 : vector<16x128xf32>
    %cst_116 = arith.constant 2.200000e+00 : f32
    %372 = vector.broadcast %cst_116 : f32 to vector<16x128xf32>
    %373 = arith.cmpf olt, %299, %372 : vector<16x128xf32>
    %374 = arith.andi %371, %373 : vector<16x128xi1>
    %375 = arith.extui %374 : vector<16x128xi1> to vector<16x128xi32>
    %376 = arith.sitofp %375 : vector<16x128xi32> to vector<16x128xf32>
    %cst_117 = arith.constant 2.500000e+00 : f32
    %377 = vector.broadcast %cst_117 : f32 to vector<16x128xf32>
    %378 = arith.mulf %299, %377 : vector<16x128xf32>
    %cst_118 = arith.constant -5.500000e+00 : f32
    %379 = vector.broadcast %cst_118 : f32 to vector<16x128xf32>
    %380 = arith.subf %378, %379 : vector<16x128xf32>
    %381 = arith.mulf %380, %306 : vector<16x128xf32>
    %cst_119 = arith.constant 2.000000e+00 : f32
    %382 = vector.broadcast %cst_119 : f32 to vector<16x128xf32>
    %383 = arith.subf %382, %380 : vector<16x128xf32>
    %384 = arith.mulf %383, %313 : vector<16x128xf32>
    %385 = arith.addf %381, %384 : vector<16x128xf32>
    %cst_120 = arith.constant -4.500000e+00 : f32
    %386 = vector.broadcast %cst_120 : f32 to vector<16x128xf32>
    %387 = arith.subf %378, %386 : vector<16x128xf32>
    %388 = arith.mulf %387, %313 : vector<16x128xf32>
    %cst_121 = arith.constant 2.000000e+00 : f32
    %389 = vector.broadcast %cst_121 : f32 to vector<16x128xf32>
    %390 = arith.subf %389, %387 : vector<16x128xf32>
    %391 = arith.mulf %390, %320 : vector<16x128xf32>
    %392 = arith.addf %388, %391 : vector<16x128xf32>
    %cst_122 = arith.constant -3.500000e+00 : f32
    %393 = vector.broadcast %cst_122 : f32 to vector<16x128xf32>
    %394 = arith.subf %378, %393 : vector<16x128xf32>
    %395 = arith.mulf %394, %320 : vector<16x128xf32>
    %cst_123 = arith.constant 2.000000e+00 : f32
    %396 = vector.broadcast %cst_123 : f32 to vector<16x128xf32>
    %397 = arith.subf %396, %394 : vector<16x128xf32>
    %398 = arith.mulf %397, %327 : vector<16x128xf32>
    %399 = arith.addf %395, %398 : vector<16x128xf32>
    %cst_124 = arith.constant -2.500000e+00 : f32
    %400 = vector.broadcast %cst_124 : f32 to vector<16x128xf32>
    %401 = arith.subf %378, %400 : vector<16x128xf32>
    %402 = arith.mulf %401, %327 : vector<16x128xf32>
    %cst_125 = arith.constant 2.000000e+00 : f32
    %403 = vector.broadcast %cst_125 : f32 to vector<16x128xf32>
    %404 = arith.subf %403, %401 : vector<16x128xf32>
    %405 = arith.mulf %404, %334 : vector<16x128xf32>
    %406 = arith.addf %402, %405 : vector<16x128xf32>
    %cst_126 = arith.constant -1.500000e+00 : f32
    %407 = vector.broadcast %cst_126 : f32 to vector<16x128xf32>
    %408 = arith.subf %378, %407 : vector<16x128xf32>
    %409 = arith.mulf %408, %334 : vector<16x128xf32>
    %cst_127 = arith.constant 2.000000e+00 : f32
    %410 = vector.broadcast %cst_127 : f32 to vector<16x128xf32>
    %411 = arith.subf %410, %408 : vector<16x128xf32>
    %412 = arith.mulf %411, %341 : vector<16x128xf32>
    %413 = arith.addf %409, %412 : vector<16x128xf32>
    %cst_128 = arith.constant -5.000000e-01 : f32
    %414 = vector.broadcast %cst_128 : f32 to vector<16x128xf32>
    %415 = arith.subf %378, %414 : vector<16x128xf32>
    %416 = arith.mulf %415, %341 : vector<16x128xf32>
    %cst_129 = arith.constant 2.000000e+00 : f32
    %417 = vector.broadcast %cst_129 : f32 to vector<16x128xf32>
    %418 = arith.subf %417, %415 : vector<16x128xf32>
    %419 = arith.mulf %418, %348 : vector<16x128xf32>
    %420 = arith.addf %416, %419 : vector<16x128xf32>
    %cst_130 = arith.constant 5.000000e-01 : f32
    %421 = vector.broadcast %cst_130 : f32 to vector<16x128xf32>
    %422 = arith.subf %378, %421 : vector<16x128xf32>
    %423 = arith.mulf %422, %348 : vector<16x128xf32>
    %cst_131 = arith.constant 2.000000e+00 : f32
    %424 = vector.broadcast %cst_131 : f32 to vector<16x128xf32>
    %425 = arith.subf %424, %422 : vector<16x128xf32>
    %426 = arith.mulf %425, %355 : vector<16x128xf32>
    %427 = arith.addf %423, %426 : vector<16x128xf32>
    %cst_132 = arith.constant 1.500000e+00 : f32
    %428 = vector.broadcast %cst_132 : f32 to vector<16x128xf32>
    %429 = arith.subf %378, %428 : vector<16x128xf32>
    %430 = arith.mulf %429, %355 : vector<16x128xf32>
    %cst_133 = arith.constant 2.000000e+00 : f32
    %431 = vector.broadcast %cst_133 : f32 to vector<16x128xf32>
    %432 = arith.subf %431, %429 : vector<16x128xf32>
    %433 = arith.mulf %432, %362 : vector<16x128xf32>
    %434 = arith.addf %430, %433 : vector<16x128xf32>
    %cst_134 = arith.constant 2.500000e+00 : f32
    %435 = vector.broadcast %cst_134 : f32 to vector<16x128xf32>
    %436 = arith.subf %378, %435 : vector<16x128xf32>
    %437 = arith.mulf %436, %362 : vector<16x128xf32>
    %cst_135 = arith.constant 2.000000e+00 : f32
    %438 = vector.broadcast %cst_135 : f32 to vector<16x128xf32>
    %439 = arith.subf %438, %436 : vector<16x128xf32>
    %440 = arith.mulf %439, %369 : vector<16x128xf32>
    %441 = arith.addf %437, %440 : vector<16x128xf32>
    %cst_136 = arith.constant 3.500000e+00 : f32
    %442 = vector.broadcast %cst_136 : f32 to vector<16x128xf32>
    %443 = arith.subf %378, %442 : vector<16x128xf32>
    %444 = arith.mulf %443, %369 : vector<16x128xf32>
    %cst_137 = arith.constant 2.000000e+00 : f32
    %445 = vector.broadcast %cst_137 : f32 to vector<16x128xf32>
    %446 = arith.subf %445, %443 : vector<16x128xf32>
    %447 = arith.mulf %446, %376 : vector<16x128xf32>
    %448 = arith.addf %444, %447 : vector<16x128xf32>
    %cst_138 = arith.constant 1.250000e+00 : f32
    %449 = vector.broadcast %cst_138 : f32 to vector<16x128xf32>
    %450 = arith.mulf %299, %449 : vector<16x128xf32>
    %cst_139 = arith.constant -2.750000e+00 : f32
    %451 = vector.broadcast %cst_139 : f32 to vector<16x128xf32>
    %452 = arith.subf %450, %451 : vector<16x128xf32>
    %453 = arith.mulf %452, %385 : vector<16x128xf32>
    %cst_140 = arith.constant 1.500000e+00 : f32
    %454 = vector.broadcast %cst_140 : f32 to vector<16x128xf32>
    %455 = arith.subf %454, %452 : vector<16x128xf32>
    %456 = arith.mulf %455, %392 : vector<16x128xf32>
    %457 = arith.addf %453, %456 : vector<16x128xf32>
    %cst_141 = arith.constant -2.250000e+00 : f32
    %458 = vector.broadcast %cst_141 : f32 to vector<16x128xf32>
    %459 = arith.subf %450, %458 : vector<16x128xf32>
    %460 = arith.mulf %459, %392 : vector<16x128xf32>
    %cst_142 = arith.constant 1.500000e+00 : f32
    %461 = vector.broadcast %cst_142 : f32 to vector<16x128xf32>
    %462 = arith.subf %461, %459 : vector<16x128xf32>
    %463 = arith.mulf %462, %399 : vector<16x128xf32>
    %464 = arith.addf %460, %463 : vector<16x128xf32>
    %cst_143 = arith.constant -1.750000e+00 : f32
    %465 = vector.broadcast %cst_143 : f32 to vector<16x128xf32>
    %466 = arith.subf %450, %465 : vector<16x128xf32>
    %467 = arith.mulf %466, %399 : vector<16x128xf32>
    %cst_144 = arith.constant 1.500000e+00 : f32
    %468 = vector.broadcast %cst_144 : f32 to vector<16x128xf32>
    %469 = arith.subf %468, %466 : vector<16x128xf32>
    %470 = arith.mulf %469, %406 : vector<16x128xf32>
    %471 = arith.addf %467, %470 : vector<16x128xf32>
    %cst_145 = arith.constant -1.250000e+00 : f32
    %472 = vector.broadcast %cst_145 : f32 to vector<16x128xf32>
    %473 = arith.subf %450, %472 : vector<16x128xf32>
    %474 = arith.mulf %473, %406 : vector<16x128xf32>
    %cst_146 = arith.constant 1.500000e+00 : f32
    %475 = vector.broadcast %cst_146 : f32 to vector<16x128xf32>
    %476 = arith.subf %475, %473 : vector<16x128xf32>
    %477 = arith.mulf %476, %413 : vector<16x128xf32>
    %478 = arith.addf %474, %477 : vector<16x128xf32>
    %cst_147 = arith.constant -7.500000e-01 : f32
    %479 = vector.broadcast %cst_147 : f32 to vector<16x128xf32>
    %480 = arith.subf %450, %479 : vector<16x128xf32>
    %481 = arith.mulf %480, %413 : vector<16x128xf32>
    %cst_148 = arith.constant 1.500000e+00 : f32
    %482 = vector.broadcast %cst_148 : f32 to vector<16x128xf32>
    %483 = arith.subf %482, %480 : vector<16x128xf32>
    %484 = arith.mulf %483, %420 : vector<16x128xf32>
    %485 = arith.addf %481, %484 : vector<16x128xf32>
    %cst_149 = arith.constant -2.500000e-01 : f32
    %486 = vector.broadcast %cst_149 : f32 to vector<16x128xf32>
    %487 = arith.subf %450, %486 : vector<16x128xf32>
    %488 = arith.mulf %487, %420 : vector<16x128xf32>
    %cst_150 = arith.constant 1.500000e+00 : f32
    %489 = vector.broadcast %cst_150 : f32 to vector<16x128xf32>
    %490 = arith.subf %489, %487 : vector<16x128xf32>
    %491 = arith.mulf %490, %427 : vector<16x128xf32>
    %492 = arith.addf %488, %491 : vector<16x128xf32>
    %cst_151 = arith.constant 2.500000e-01 : f32
    %493 = vector.broadcast %cst_151 : f32 to vector<16x128xf32>
    %494 = arith.subf %450, %493 : vector<16x128xf32>
    %495 = arith.mulf %494, %427 : vector<16x128xf32>
    %cst_152 = arith.constant 1.500000e+00 : f32
    %496 = vector.broadcast %cst_152 : f32 to vector<16x128xf32>
    %497 = arith.subf %496, %494 : vector<16x128xf32>
    %498 = arith.mulf %497, %434 : vector<16x128xf32>
    %499 = arith.addf %495, %498 : vector<16x128xf32>
    %cst_153 = arith.constant 7.500000e-01 : f32
    %500 = vector.broadcast %cst_153 : f32 to vector<16x128xf32>
    %501 = arith.subf %450, %500 : vector<16x128xf32>
    %502 = arith.mulf %501, %434 : vector<16x128xf32>
    %cst_154 = arith.constant 1.500000e+00 : f32
    %503 = vector.broadcast %cst_154 : f32 to vector<16x128xf32>
    %504 = arith.subf %503, %501 : vector<16x128xf32>
    %505 = arith.mulf %504, %441 : vector<16x128xf32>
    %506 = arith.addf %502, %505 : vector<16x128xf32>
    %cst_155 = arith.constant 1.250000e+00 : f32
    %507 = vector.broadcast %cst_155 : f32 to vector<16x128xf32>
    %508 = arith.subf %450, %507 : vector<16x128xf32>
    %509 = arith.mulf %508, %441 : vector<16x128xf32>
    %cst_156 = arith.constant 1.500000e+00 : f32
    %510 = vector.broadcast %cst_156 : f32 to vector<16x128xf32>
    %511 = arith.subf %510, %508 : vector<16x128xf32>
    %512 = arith.mulf %511, %448 : vector<16x128xf32>
    %513 = arith.addf %509, %512 : vector<16x128xf32>
    %cst_157 = arith.constant 0.833333313 : f32
    %514 = vector.broadcast %cst_157 : f32 to vector<16x128xf32>
    %515 = arith.mulf %299, %514 : vector<16x128xf32>
    %cst_158 = arith.constant -1.83333337 : f32
    %516 = vector.broadcast %cst_158 : f32 to vector<16x128xf32>
    %517 = arith.subf %515, %516 : vector<16x128xf32>
    %518 = arith.mulf %517, %457 : vector<16x128xf32>
    %cst_159 = arith.constant 1.33333337 : f32
    %519 = vector.broadcast %cst_159 : f32 to vector<16x128xf32>
    %520 = arith.subf %519, %517 : vector<16x128xf32>
    %521 = arith.mulf %520, %464 : vector<16x128xf32>
    %522 = arith.addf %518, %521 : vector<16x128xf32>
    %cst_160 = arith.constant -1.500000e+00 : f32
    %523 = vector.broadcast %cst_160 : f32 to vector<16x128xf32>
    %524 = arith.subf %515, %523 : vector<16x128xf32>
    %525 = arith.mulf %524, %464 : vector<16x128xf32>
    %cst_161 = arith.constant 1.33333337 : f32
    %526 = vector.broadcast %cst_161 : f32 to vector<16x128xf32>
    %527 = arith.subf %526, %524 : vector<16x128xf32>
    %528 = arith.mulf %527, %471 : vector<16x128xf32>
    %529 = arith.addf %525, %528 : vector<16x128xf32>
    %cst_162 = arith.constant -1.16666663 : f32
    %530 = vector.broadcast %cst_162 : f32 to vector<16x128xf32>
    %531 = arith.subf %515, %530 : vector<16x128xf32>
    %532 = arith.mulf %531, %471 : vector<16x128xf32>
    %cst_163 = arith.constant 1.33333337 : f32
    %533 = vector.broadcast %cst_163 : f32 to vector<16x128xf32>
    %534 = arith.subf %533, %531 : vector<16x128xf32>
    %535 = arith.mulf %534, %478 : vector<16x128xf32>
    %536 = arith.addf %532, %535 : vector<16x128xf32>
    %cst_164 = arith.constant -0.833333313 : f32
    %537 = vector.broadcast %cst_164 : f32 to vector<16x128xf32>
    %538 = arith.subf %515, %537 : vector<16x128xf32>
    %539 = arith.mulf %538, %478 : vector<16x128xf32>
    %cst_165 = arith.constant 1.33333337 : f32
    %540 = vector.broadcast %cst_165 : f32 to vector<16x128xf32>
    %541 = arith.subf %540, %538 : vector<16x128xf32>
    %542 = arith.mulf %541, %485 : vector<16x128xf32>
    %543 = arith.addf %539, %542 : vector<16x128xf32>
    %cst_166 = arith.constant -5.000000e-01 : f32
    %544 = vector.broadcast %cst_166 : f32 to vector<16x128xf32>
    %545 = arith.subf %515, %544 : vector<16x128xf32>
    %546 = arith.mulf %545, %485 : vector<16x128xf32>
    %cst_167 = arith.constant 1.33333337 : f32
    %547 = vector.broadcast %cst_167 : f32 to vector<16x128xf32>
    %548 = arith.subf %547, %545 : vector<16x128xf32>
    %549 = arith.mulf %548, %492 : vector<16x128xf32>
    %550 = arith.addf %546, %549 : vector<16x128xf32>
    %cst_168 = arith.constant -0.166666672 : f32
    %551 = vector.broadcast %cst_168 : f32 to vector<16x128xf32>
    %552 = arith.subf %515, %551 : vector<16x128xf32>
    %553 = arith.mulf %552, %492 : vector<16x128xf32>
    %cst_169 = arith.constant 1.33333337 : f32
    %554 = vector.broadcast %cst_169 : f32 to vector<16x128xf32>
    %555 = arith.subf %554, %552 : vector<16x128xf32>
    %556 = arith.mulf %555, %499 : vector<16x128xf32>
    %557 = arith.addf %553, %556 : vector<16x128xf32>
    %cst_170 = arith.constant 0.166666672 : f32
    %558 = vector.broadcast %cst_170 : f32 to vector<16x128xf32>
    %559 = arith.subf %515, %558 : vector<16x128xf32>
    %560 = arith.mulf %559, %499 : vector<16x128xf32>
    %cst_171 = arith.constant 1.33333337 : f32
    %561 = vector.broadcast %cst_171 : f32 to vector<16x128xf32>
    %562 = arith.subf %561, %559 : vector<16x128xf32>
    %563 = arith.mulf %562, %506 : vector<16x128xf32>
    %564 = arith.addf %560, %563 : vector<16x128xf32>
    %cst_172 = arith.constant 5.000000e-01 : f32
    %565 = vector.broadcast %cst_172 : f32 to vector<16x128xf32>
    %566 = arith.subf %515, %565 : vector<16x128xf32>
    %567 = arith.mulf %566, %506 : vector<16x128xf32>
    %cst_173 = arith.constant 1.33333337 : f32
    %568 = vector.broadcast %cst_173 : f32 to vector<16x128xf32>
    %569 = arith.subf %568, %566 : vector<16x128xf32>
    %570 = arith.mulf %569, %513 : vector<16x128xf32>
    %571 = arith.addf %567, %570 : vector<16x128xf32>
    %572 = arith.negf %299 : vector<16x128xf32>
    %573 = math.exp %572 : vector<16x128xf32>
    %cst_174 = arith.constant 1.000000e+00 : f32
    %574 = vector.broadcast %cst_174 : f32 to vector<16x128xf32>
    %575 = arith.addf %574, %573 : vector<16x128xf32>
    %576 = arith.divf %574, %575 : vector<16x128xf32>
    %577 = arith.mulf %299, %576 : vector<16x128xf32>
    %578 = arith.truncf %577 : vector<16x128xf32> to vector<16x128xbf16>
    %c0_175 = arith.constant 0 : index
    %c0_176 = arith.constant 0 : index
    %579 = vector.load %arg7[%c0_175, %c0_176] : memref<16x1152xbf16, #tpu.memory_space<vmem>>, vector<16x128xbf16>
    tpu.vector_store %arg7[%c0_175, %c0_176], %578 {strides = array<i32>} : memref<16x1152xbf16, #tpu.memory_space<vmem>>, vector<16x128xbf16>,
    %580 = arith.truncf %522 : vector<16x128xf32> to vector<16x128xbf16>
    %c0_177 = arith.constant 0 : index
    %c128_178 = arith.constant 128 : index
    %581 = vector.load %arg7[%c0_177, %c128_178] : memref<16x1152xbf16, #tpu.memory_space<vmem>>, vector<16x128xbf16>
    tpu.vector_store %arg7[%c0_177, %c128_178], %580 {strides = array<i32>} : memref<16x1152xbf16, #tpu.memory_space<vmem>>, vector<16x128xbf16>,
    %582 = arith.truncf %529 : vector<16x128xf32> to vector<16x128xbf16>
    %c0_179 = arith.constant 0 : index
    %c256_180 = arith.constant 256 : index
    %583 = vector.load %arg7[%c0_179, %c256_180] : memref<16x1152xbf16, #tpu.memory_space<vmem>>, vector<16x128xbf16>
    tpu.vector_store %arg7[%c0_179, %c256_180], %582 {strides = array<i32>} : memref<16x1152xbf16, #tpu.memory_space<vmem>>, vector<16x128xbf16>,
    %584 = arith.truncf %536 : vector<16x128xf32> to vector<16x128xbf16>
    %c0_181 = arith.constant 0 : index
    %c384_182 = arith.constant 384 : index
    %585 = vector.load %arg7[%c0_181, %c384_182] : memref<16x1152xbf16, #tpu.memory_space<vmem>>, vector<16x128xbf16>
    tpu.vector_store %arg7[%c0_181, %c384_182], %584 {strides = array<i32>} : memref<16x1152xbf16, #tpu.memory_space<vmem>>, vector<16x128xbf16>,
    %586 = arith.truncf %543 : vector<16x128xf32> to vector<16x128xbf16>
    %c0_183 = arith.constant 0 : index
    %c512_184 = arith.constant 512 : index
    %587 = vector.load %arg7[%c0_183, %c512_184] : memref<16x1152xbf16, #tpu.memory_space<vmem>>, vector<16x128xbf16>
    tpu.vector_store %arg7[%c0_183, %c512_184], %586 {strides = array<i32>} : memref<16x1152xbf16, #tpu.memory_space<vmem>>, vector<16x128xbf16>,
    %588 = arith.truncf %550 : vector<16x128xf32> to vector<16x128xbf16>
    %c0_185 = arith.constant 0 : index
    %c640_186 = arith.constant 640 : index
    %589 = vector.load %arg7[%c0_185, %c640_186] : memref<16x1152xbf16, #tpu.memory_space<vmem>>, vector<16x128xbf16>
    tpu.vector_store %arg7[%c0_185, %c640_186], %588 {strides = array<i32>} : memref<16x1152xbf16, #tpu.memory_space<vmem>>, vector<16x128xbf16>,
    %590 = arith.truncf %557 : vector<16x128xf32> to vector<16x128xbf16>
    %c0_187 = arith.constant 0 : index
    %c768_188 = arith.constant 768 : index
    %591 = vector.load %arg7[%c0_187, %c768_188] : memref<16x1152xbf16, #tpu.memory_space<vmem>>, vector<16x128xbf16>
    tpu.vector_store %arg7[%c0_187, %c768_188], %590 {strides = array<i32>} : memref<16x1152xbf16, #tpu.memory_space<vmem>>, vector<16x128xbf16>,
    %592 = arith.truncf %564 : vector<16x128xf32> to vector<16x128xbf16>
    %c0_189 = arith.constant 0 : index
    %c896_190 = arith.constant 896 : index
    %593 = vector.load %arg7[%c0_189, %c896_190] : memref<16x1152xbf16, #tpu.memory_space<vmem>>, vector<16x128xbf16>
    tpu.vector_store %arg7[%c0_189, %c896_190], %592 {strides = array<i32>} : memref<16x1152xbf16, #tpu.memory_space<vmem>>, vector<16x128xbf16>,
    %594 = arith.truncf %571 : vector<16x128xf32> to vector<16x128xbf16>
    %c0_191 = arith.constant 0 : index
    %c1024_192 = arith.constant 1024 : index
    %595 = vector.load %arg7[%c0_191, %c1024_192] : memref<16x1152xbf16, #tpu.memory_space<vmem>>, vector<16x128xbf16>
    tpu.vector_store %arg7[%c0_191, %c1024_192], %594 {strides = array<i32>} : memref<16x1152xbf16, #tpu.memory_space<vmem>>, vector<16x128xbf16>,
    %c0_193 = arith.constant 0 : index
    %c0_194 = arith.constant 0 : index
    %596 = vector.load %arg7[%c0_193, %c0_194] : memref<16x1152xbf16, #tpu.memory_space<vmem>>, vector<16x1152xbf16>
    %c0_195 = arith.constant 0 : index
    %c0_196 = arith.constant 0 : index
    %597 = vector.load %arg3[%c0_195, %c0_196] : memref<1152x128xbf16, #tpu.memory_space<vmem>>, vector<1152x128xbf16>
    %cst_197 = arith.constant dense<0.000000e+00> : vector<16x128xf32>
    %598 = tpu.matmul %596, %597, %cst_197 {dimension_numbers = #tpu.dot_dimension_numbers<[1], [0], [0], [1], [0, 0, 1, 1], [], []>} : vector<16x1152xbf16>, vector<1152x128xbf16>, vector<16x128xf32> -> vector<16x128xf32>
    %cst_198 = arith.constant -2.200000e+00 : f32
    %599 = vector.broadcast %cst_198 : f32 to vector<16x128xf32>
    %600 = arith.cmpf oge, %598, %599 : vector<16x128xf32>
    %cst_199 = arith.constant -1.800000e+00 : f32
    %601 = vector.broadcast %cst_199 : f32 to vector<16x128xf32>
    %602 = arith.cmpf olt, %598, %601 : vector<16x128xf32>
    %603 = arith.andi %600, %602 : vector<16x128xi1>
    %604 = arith.extui %603 : vector<16x128xi1> to vector<16x128xi32>
    %605 = arith.sitofp %604 : vector<16x128xi32> to vector<16x128xf32>
    %cst_200 = arith.constant -1.800000e+00 : f32
    %606 = vector.broadcast %cst_200 : f32 to vector<16x128xf32>
    %607 = arith.cmpf oge, %598, %606 : vector<16x128xf32>
    %cst_201 = arith.constant -1.400000e+00 : f32
    %608 = vector.broadcast %cst_201 : f32 to vector<16x128xf32>
    %609 = arith.cmpf olt, %598, %608 : vector<16x128xf32>
    %610 = arith.andi %607, %609 : vector<16x128xi1>
    %611 = arith.extui %610 : vector<16x128xi1> to vector<16x128xi32>
    %612 = arith.sitofp %611 : vector<16x128xi32> to vector<16x128xf32>
    %cst_202 = arith.constant -1.400000e+00 : f32
    %613 = vector.broadcast %cst_202 : f32 to vector<16x128xf32>
    %614 = arith.cmpf oge, %598, %613 : vector<16x128xf32>
    %cst_203 = arith.constant -1.000000e+00 : f32
    %615 = vector.broadcast %cst_203 : f32 to vector<16x128xf32>
    %616 = arith.cmpf olt, %598, %615 : vector<16x128xf32>
    %617 = arith.andi %614, %616 : vector<16x128xi1>
    %618 = arith.extui %617 : vector<16x128xi1> to vector<16x128xi32>
    %619 = arith.sitofp %618 : vector<16x128xi32> to vector<16x128xf32>
    %cst_204 = arith.constant -1.000000e+00 : f32
    %620 = vector.broadcast %cst_204 : f32 to vector<16x128xf32>
    %621 = arith.cmpf oge, %598, %620 : vector<16x128xf32>
    %cst_205 = arith.constant -6.000000e-01 : f32
    %622 = vector.broadcast %cst_205 : f32 to vector<16x128xf32>
    %623 = arith.cmpf olt, %598, %622 : vector<16x128xf32>
    %624 = arith.andi %621, %623 : vector<16x128xi1>
    %625 = arith.extui %624 : vector<16x128xi1> to vector<16x128xi32>
    %626 = arith.sitofp %625 : vector<16x128xi32> to vector<16x128xf32>
    %cst_206 = arith.constant -6.000000e-01 : f32
    %627 = vector.broadcast %cst_206 : f32 to vector<16x128xf32>
    %628 = arith.cmpf oge, %598, %627 : vector<16x128xf32>
    %cst_207 = arith.constant -2.000000e-01 : f32
    %629 = vector.broadcast %cst_207 : f32 to vector<16x128xf32>
    %630 = arith.cmpf olt, %598, %629 : vector<16x128xf32>
    %631 = arith.andi %628, %630 : vector<16x128xi1>
    %632 = arith.extui %631 : vector<16x128xi1> to vector<16x128xi32>
    %633 = arith.sitofp %632 : vector<16x128xi32> to vector<16x128xf32>
    %cst_208 = arith.constant -2.000000e-01 : f32
    %634 = vector.broadcast %cst_208 : f32 to vector<16x128xf32>
    %635 = arith.cmpf oge, %598, %634 : vector<16x128xf32>
    %cst_209 = arith.constant 2.000000e-01 : f32
    %636 = vector.broadcast %cst_209 : f32 to vector<16x128xf32>
    %637 = arith.cmpf olt, %598, %636 : vector<16x128xf32>
    %638 = arith.andi %635, %637 : vector<16x128xi1>
    %639 = arith.extui %638 : vector<16x128xi1> to vector<16x128xi32>
    %640 = arith.sitofp %639 : vector<16x128xi32> to vector<16x128xf32>
    %cst_210 = arith.constant 2.000000e-01 : f32
    %641 = vector.broadcast %cst_210 : f32 to vector<16x128xf32>
    %642 = arith.cmpf oge, %598, %641 : vector<16x128xf32>
    %cst_211 = arith.constant 6.000000e-01 : f32
    %643 = vector.broadcast %cst_211 : f32 to vector<16x128xf32>
    %644 = arith.cmpf olt, %598, %643 : vector<16x128xf32>
    %645 = arith.andi %642, %644 : vector<16x128xi1>
    %646 = arith.extui %645 : vector<16x128xi1> to vector<16x128xi32>
    %647 = arith.sitofp %646 : vector<16x128xi32> to vector<16x128xf32>
    %cst_212 = arith.constant 6.000000e-01 : f32
    %648 = vector.broadcast %cst_212 : f32 to vector<16x128xf32>
    %649 = arith.cmpf oge, %598, %648 : vector<16x128xf32>
    %cst_213 = arith.constant 1.000000e+00 : f32
    %650 = vector.broadcast %cst_213 : f32 to vector<16x128xf32>
    %651 = arith.cmpf olt, %598, %650 : vector<16x128xf32>
    %652 = arith.andi %649, %651 : vector<16x128xi1>
    %653 = arith.extui %652 : vector<16x128xi1> to vector<16x128xi32>
    %654 = arith.sitofp %653 : vector<16x128xi32> to vector<16x128xf32>
    %cst_214 = arith.constant 1.000000e+00 : f32
    %655 = vector.broadcast %cst_214 : f32 to vector<16x128xf32>
    %656 = arith.cmpf oge, %598, %655 : vector<16x128xf32>
    %cst_215 = arith.constant 1.400000e+00 : f32
    %657 = vector.broadcast %cst_215 : f32 to vector<16x128xf32>
    %658 = arith.cmpf olt, %598, %657 : vector<16x128xf32>
    %659 = arith.andi %656, %658 : vector<16x128xi1>
    %660 = arith.extui %659 : vector<16x128xi1> to vector<16x128xi32>
    %661 = arith.sitofp %660 : vector<16x128xi32> to vector<16x128xf32>
    %cst_216 = arith.constant 1.400000e+00 : f32
    %662 = vector.broadcast %cst_216 : f32 to vector<16x128xf32>
    %663 = arith.cmpf oge, %598, %662 : vector<16x128xf32>
    %cst_217 = arith.constant 1.800000e+00 : f32
    %664 = vector.broadcast %cst_217 : f32 to vector<16x128xf32>
    %665 = arith.cmpf olt, %598, %664 : vector<16x128xf32>
    %666 = arith.andi %663, %665 : vector<16x128xi1>
    %667 = arith.extui %666 : vector<16x128xi1> to vector<16x128xi32>
    %668 = arith.sitofp %667 : vector<16x128xi32> to vector<16x128xf32>
    %cst_218 = arith.constant 1.800000e+00 : f32
    %669 = vector.broadcast %cst_218 : f32 to vector<16x128xf32>
    %670 = arith.cmpf oge, %598, %669 : vector<16x128xf32>
    %cst_219 = arith.constant 2.200000e+00 : f32
    %671 = vector.broadcast %cst_219 : f32 to vector<16x128xf32>
    %672 = arith.cmpf olt, %598, %671 : vector<16x128xf32>
    %673 = arith.andi %670, %672 : vector<16x128xi1>
    %674 = arith.extui %673 : vector<16x128xi1> to vector<16x128xi32>
    %675 = arith.sitofp %674 : vector<16x128xi32> to vector<16x128xf32>
    %cst_220 = arith.constant 2.500000e+00 : f32
    %676 = vector.broadcast %cst_220 : f32 to vector<16x128xf32>
    %677 = arith.mulf %598, %676 : vector<16x128xf32>
    %cst_221 = arith.constant -5.500000e+00 : f32
    %678 = vector.broadcast %cst_221 : f32 to vector<16x128xf32>
    %679 = arith.subf %677, %678 : vector<16x128xf32>
    %680 = arith.mulf %679, %605 : vector<16x128xf32>
    %cst_222 = arith.constant 2.000000e+00 : f32
    %681 = vector.broadcast %cst_222 : f32 to vector<16x128xf32>
    %682 = arith.subf %681, %679 : vector<16x128xf32>
    %683 = arith.mulf %682, %612 : vector<16x128xf32>
    %684 = arith.addf %680, %683 : vector<16x128xf32>
    %cst_223 = arith.constant -4.500000e+00 : f32
    %685 = vector.broadcast %cst_223 : f32 to vector<16x128xf32>
    %686 = arith.subf %677, %685 : vector<16x128xf32>
    %687 = arith.mulf %686, %612 : vector<16x128xf32>
    %cst_224 = arith.constant 2.000000e+00 : f32
    %688 = vector.broadcast %cst_224 : f32 to vector<16x128xf32>
    %689 = arith.subf %688, %686 : vector<16x128xf32>
    %690 = arith.mulf %689, %619 : vector<16x128xf32>
    %691 = arith.addf %687, %690 : vector<16x128xf32>
    %cst_225 = arith.constant -3.500000e+00 : f32
    %692 = vector.broadcast %cst_225 : f32 to vector<16x128xf32>
    %693 = arith.subf %677, %692 : vector<16x128xf32>
    %694 = arith.mulf %693, %619 : vector<16x128xf32>
    %cst_226 = arith.constant 2.000000e+00 : f32
    %695 = vector.broadcast %cst_226 : f32 to vector<16x128xf32>
    %696 = arith.subf %695, %693 : vector<16x128xf32>
    %697 = arith.mulf %696, %626 : vector<16x128xf32>
    %698 = arith.addf %694, %697 : vector<16x128xf32>
    %cst_227 = arith.constant -2.500000e+00 : f32
    %699 = vector.broadcast %cst_227 : f32 to vector<16x128xf32>
    %700 = arith.subf %677, %699 : vector<16x128xf32>
    %701 = arith.mulf %700, %626 : vector<16x128xf32>
    %cst_228 = arith.constant 2.000000e+00 : f32
    %702 = vector.broadcast %cst_228 : f32 to vector<16x128xf32>
    %703 = arith.subf %702, %700 : vector<16x128xf32>
    %704 = arith.mulf %703, %633 : vector<16x128xf32>
    %705 = arith.addf %701, %704 : vector<16x128xf32>
    %cst_229 = arith.constant -1.500000e+00 : f32
    %706 = vector.broadcast %cst_229 : f32 to vector<16x128xf32>
    %707 = arith.subf %677, %706 : vector<16x128xf32>
    %708 = arith.mulf %707, %633 : vector<16x128xf32>
    %cst_230 = arith.constant 2.000000e+00 : f32
    %709 = vector.broadcast %cst_230 : f32 to vector<16x128xf32>
    %710 = arith.subf %709, %707 : vector<16x128xf32>
    %711 = arith.mulf %710, %640 : vector<16x128xf32>
    %712 = arith.addf %708, %711 : vector<16x128xf32>
    %cst_231 = arith.constant -5.000000e-01 : f32
    %713 = vector.broadcast %cst_231 : f32 to vector<16x128xf32>
    %714 = arith.subf %677, %713 : vector<16x128xf32>
    %715 = arith.mulf %714, %640 : vector<16x128xf32>
    %cst_232 = arith.constant 2.000000e+00 : f32
    %716 = vector.broadcast %cst_232 : f32 to vector<16x128xf32>
    %717 = arith.subf %716, %714 : vector<16x128xf32>
    %718 = arith.mulf %717, %647 : vector<16x128xf32>
    %719 = arith.addf %715, %718 : vector<16x128xf32>
    %cst_233 = arith.constant 5.000000e-01 : f32
    %720 = vector.broadcast %cst_233 : f32 to vector<16x128xf32>
    %721 = arith.subf %677, %720 : vector<16x128xf32>
    %722 = arith.mulf %721, %647 : vector<16x128xf32>
    %cst_234 = arith.constant 2.000000e+00 : f32
    %723 = vector.broadcast %cst_234 : f32 to vector<16x128xf32>
    %724 = arith.subf %723, %721 : vector<16x128xf32>
    %725 = arith.mulf %724, %654 : vector<16x128xf32>
    %726 = arith.addf %722, %725 : vector<16x128xf32>
    %cst_235 = arith.constant 1.500000e+00 : f32
    %727 = vector.broadcast %cst_235 : f32 to vector<16x128xf32>
    %728 = arith.subf %677, %727 : vector<16x128xf32>
    %729 = arith.mulf %728, %654 : vector<16x128xf32>
    %cst_236 = arith.constant 2.000000e+00 : f32
    %730 = vector.broadcast %cst_236 : f32 to vector<16x128xf32>
    %731 = arith.subf %730, %728 : vector<16x128xf32>
    %732 = arith.mulf %731, %661 : vector<16x128xf32>
    %733 = arith.addf %729, %732 : vector<16x128xf32>
    %cst_237 = arith.constant 2.500000e+00 : f32
    %734 = vector.broadcast %cst_237 : f32 to vector<16x128xf32>
    %735 = arith.subf %677, %734 : vector<16x128xf32>
    %736 = arith.mulf %735, %661 : vector<16x128xf32>
    %cst_238 = arith.constant 2.000000e+00 : f32
    %737 = vector.broadcast %cst_238 : f32 to vector<16x128xf32>
    %738 = arith.subf %737, %735 : vector<16x128xf32>
    %739 = arith.mulf %738, %668 : vector<16x128xf32>
    %740 = arith.addf %736, %739 : vector<16x128xf32>
    %cst_239 = arith.constant 3.500000e+00 : f32
    %741 = vector.broadcast %cst_239 : f32 to vector<16x128xf32>
    %742 = arith.subf %677, %741 : vector<16x128xf32>
    %743 = arith.mulf %742, %668 : vector<16x128xf32>
    %cst_240 = arith.constant 2.000000e+00 : f32
    %744 = vector.broadcast %cst_240 : f32 to vector<16x128xf32>
    %745 = arith.subf %744, %742 : vector<16x128xf32>
    %746 = arith.mulf %745, %675 : vector<16x128xf32>
    %747 = arith.addf %743, %746 : vector<16x128xf32>
    %cst_241 = arith.constant 1.250000e+00 : f32
    %748 = vector.broadcast %cst_241 : f32 to vector<16x128xf32>
    %749 = arith.mulf %598, %748 : vector<16x128xf32>
    %cst_242 = arith.constant -2.750000e+00 : f32
    %750 = vector.broadcast %cst_242 : f32 to vector<16x128xf32>
    %751 = arith.subf %749, %750 : vector<16x128xf32>
    %752 = arith.mulf %751, %684 : vector<16x128xf32>
    %cst_243 = arith.constant 1.500000e+00 : f32
    %753 = vector.broadcast %cst_243 : f32 to vector<16x128xf32>
    %754 = arith.subf %753, %751 : vector<16x128xf32>
    %755 = arith.mulf %754, %691 : vector<16x128xf32>
    %756 = arith.addf %752, %755 : vector<16x128xf32>
    %cst_244 = arith.constant -2.250000e+00 : f32
    %757 = vector.broadcast %cst_244 : f32 to vector<16x128xf32>
    %758 = arith.subf %749, %757 : vector<16x128xf32>
    %759 = arith.mulf %758, %691 : vector<16x128xf32>
    %cst_245 = arith.constant 1.500000e+00 : f32
    %760 = vector.broadcast %cst_245 : f32 to vector<16x128xf32>
    %761 = arith.subf %760, %758 : vector<16x128xf32>
    %762 = arith.mulf %761, %698 : vector<16x128xf32>
    %763 = arith.addf %759, %762 : vector<16x128xf32>
    %cst_246 = arith.constant -1.750000e+00 : f32
    %764 = vector.broadcast %cst_246 : f32 to vector<16x128xf32>
    %765 = arith.subf %749, %764 : vector<16x128xf32>
    %766 = arith.mulf %765, %698 : vector<16x128xf32>
    %cst_247 = arith.constant 1.500000e+00 : f32
    %767 = vector.broadcast %cst_247 : f32 to vector<16x128xf32>
    %768 = arith.subf %767, %765 : vector<16x128xf32>
    %769 = arith.mulf %768, %705 : vector<16x128xf32>
    %770 = arith.addf %766, %769 : vector<16x128xf32>
    %cst_248 = arith.constant -1.250000e+00 : f32
    %771 = vector.broadcast %cst_248 : f32 to vector<16x128xf32>
    %772 = arith.subf %749, %771 : vector<16x128xf32>
    %773 = arith.mulf %772, %705 : vector<16x128xf32>
    %cst_249 = arith.constant 1.500000e+00 : f32
    %774 = vector.broadcast %cst_249 : f32 to vector<16x128xf32>
    %775 = arith.subf %774, %772 : vector<16x128xf32>
    %776 = arith.mulf %775, %712 : vector<16x128xf32>
    %777 = arith.addf %773, %776 : vector<16x128xf32>
    %cst_250 = arith.constant -7.500000e-01 : f32
    %778 = vector.broadcast %cst_250 : f32 to vector<16x128xf32>
    %779 = arith.subf %749, %778 : vector<16x128xf32>
    %780 = arith.mulf %779, %712 : vector<16x128xf32>
    %cst_251 = arith.constant 1.500000e+00 : f32
    %781 = vector.broadcast %cst_251 : f32 to vector<16x128xf32>
    %782 = arith.subf %781, %779 : vector<16x128xf32>
    %783 = arith.mulf %782, %719 : vector<16x128xf32>
    %784 = arith.addf %780, %783 : vector<16x128xf32>
    %cst_252 = arith.constant -2.500000e-01 : f32
    %785 = vector.broadcast %cst_252 : f32 to vector<16x128xf32>
    %786 = arith.subf %749, %785 : vector<16x128xf32>
    %787 = arith.mulf %786, %719 : vector<16x128xf32>
    %cst_253 = arith.constant 1.500000e+00 : f32
    %788 = vector.broadcast %cst_253 : f32 to vector<16x128xf32>
    %789 = arith.subf %788, %786 : vector<16x128xf32>
    %790 = arith.mulf %789, %726 : vector<16x128xf32>
    %791 = arith.addf %787, %790 : vector<16x128xf32>
    %cst_254 = arith.constant 2.500000e-01 : f32
    %792 = vector.broadcast %cst_254 : f32 to vector<16x128xf32>
    %793 = arith.subf %749, %792 : vector<16x128xf32>
    %794 = arith.mulf %793, %726 : vector<16x128xf32>
    %cst_255 = arith.constant 1.500000e+00 : f32
    %795 = vector.broadcast %cst_255 : f32 to vector<16x128xf32>
    %796 = arith.subf %795, %793 : vector<16x128xf32>
    %797 = arith.mulf %796, %733 : vector<16x128xf32>
    %798 = arith.addf %794, %797 : vector<16x128xf32>
    %cst_256 = arith.constant 7.500000e-01 : f32
    %799 = vector.broadcast %cst_256 : f32 to vector<16x128xf32>
    %800 = arith.subf %749, %799 : vector<16x128xf32>
    %801 = arith.mulf %800, %733 : vector<16x128xf32>
    %cst_257 = arith.constant 1.500000e+00 : f32
    %802 = vector.broadcast %cst_257 : f32 to vector<16x128xf32>
    %803 = arith.subf %802, %800 : vector<16x128xf32>
    %804 = arith.mulf %803, %740 : vector<16x128xf32>
    %805 = arith.addf %801, %804 : vector<16x128xf32>
    %cst_258 = arith.constant 1.250000e+00 : f32
    %806 = vector.broadcast %cst_258 : f32 to vector<16x128xf32>
    %807 = arith.subf %749, %806 : vector<16x128xf32>
    %808 = arith.mulf %807, %740 : vector<16x128xf32>
    %cst_259 = arith.constant 1.500000e+00 : f32
    %809 = vector.broadcast %cst_259 : f32 to vector<16x128xf32>
    %810 = arith.subf %809, %807 : vector<16x128xf32>
    %811 = arith.mulf %810, %747 : vector<16x128xf32>
    %812 = arith.addf %808, %811 : vector<16x128xf32>
    %cst_260 = arith.constant 0.833333313 : f32
    %813 = vector.broadcast %cst_260 : f32 to vector<16x128xf32>
    %814 = arith.mulf %598, %813 : vector<16x128xf32>
    %cst_261 = arith.constant -1.83333337 : f32
    %815 = vector.broadcast %cst_261 : f32 to vector<16x128xf32>
    %816 = arith.subf %814, %815 : vector<16x128xf32>
    %817 = arith.mulf %816, %756 : vector<16x128xf32>
    %cst_262 = arith.constant 1.33333337 : f32
    %818 = vector.broadcast %cst_262 : f32 to vector<16x128xf32>
    %819 = arith.subf %818, %816 : vector<16x128xf32>
    %820 = arith.mulf %819, %763 : vector<16x128xf32>
    %821 = arith.addf %817, %820 : vector<16x128xf32>
    %cst_263 = arith.constant -1.500000e+00 : f32
    %822 = vector.broadcast %cst_263 : f32 to vector<16x128xf32>
    %823 = arith.subf %814, %822 : vector<16x128xf32>
    %824 = arith.mulf %823, %763 : vector<16x128xf32>
    %cst_264 = arith.constant 1.33333337 : f32
    %825 = vector.broadcast %cst_264 : f32 to vector<16x128xf32>
    %826 = arith.subf %825, %823 : vector<16x128xf32>
    %827 = arith.mulf %826, %770 : vector<16x128xf32>
    %828 = arith.addf %824, %827 : vector<16x128xf32>
    %cst_265 = arith.constant -1.16666663 : f32
    %829 = vector.broadcast %cst_265 : f32 to vector<16x128xf32>
    %830 = arith.subf %814, %829 : vector<16x128xf32>
    %831 = arith.mulf %830, %770 : vector<16x128xf32>
    %cst_266 = arith.constant 1.33333337 : f32
    %832 = vector.broadcast %cst_266 : f32 to vector<16x128xf32>
    %833 = arith.subf %832, %830 : vector<16x128xf32>
    %834 = arith.mulf %833, %777 : vector<16x128xf32>
    %835 = arith.addf %831, %834 : vector<16x128xf32>
    %cst_267 = arith.constant -0.833333313 : f32
    %836 = vector.broadcast %cst_267 : f32 to vector<16x128xf32>
    %837 = arith.subf %814, %836 : vector<16x128xf32>
    %838 = arith.mulf %837, %777 : vector<16x128xf32>
    %cst_268 = arith.constant 1.33333337 : f32
    %839 = vector.broadcast %cst_268 : f32 to vector<16x128xf32>
    %840 = arith.subf %839, %837 : vector<16x128xf32>
    %841 = arith.mulf %840, %784 : vector<16x128xf32>
    %842 = arith.addf %838, %841 : vector<16x128xf32>
    %cst_269 = arith.constant -5.000000e-01 : f32
    %843 = vector.broadcast %cst_269 : f32 to vector<16x128xf32>
    %844 = arith.subf %814, %843 : vector<16x128xf32>
    %845 = arith.mulf %844, %784 : vector<16x128xf32>
    %cst_270 = arith.constant 1.33333337 : f32
    %846 = vector.broadcast %cst_270 : f32 to vector<16x128xf32>
    %847 = arith.subf %846, %844 : vector<16x128xf32>
    %848 = arith.mulf %847, %791 : vector<16x128xf32>
    %849 = arith.addf %845, %848 : vector<16x128xf32>
    %cst_271 = arith.constant -0.166666672 : f32
    %850 = vector.broadcast %cst_271 : f32 to vector<16x128xf32>
    %851 = arith.subf %814, %850 : vector<16x128xf32>
    %852 = arith.mulf %851, %791 : vector<16x128xf32>
    %cst_272 = arith.constant 1.33333337 : f32
    %853 = vector.broadcast %cst_272 : f32 to vector<16x128xf32>
    %854 = arith.subf %853, %851 : vector<16x128xf32>
    %855 = arith.mulf %854, %798 : vector<16x128xf32>
    %856 = arith.addf %852, %855 : vector<16x128xf32>
    %cst_273 = arith.constant 0.166666672 : f32
    %857 = vector.broadcast %cst_273 : f32 to vector<16x128xf32>
    %858 = arith.subf %814, %857 : vector<16x128xf32>
    %859 = arith.mulf %858, %798 : vector<16x128xf32>
    %cst_274 = arith.constant 1.33333337 : f32
    %860 = vector.broadcast %cst_274 : f32 to vector<16x128xf32>
    %861 = arith.subf %860, %858 : vector<16x128xf32>
    %862 = arith.mulf %861, %805 : vector<16x128xf32>
    %863 = arith.addf %859, %862 : vector<16x128xf32>
    %cst_275 = arith.constant 5.000000e-01 : f32
    %864 = vector.broadcast %cst_275 : f32 to vector<16x128xf32>
    %865 = arith.subf %814, %864 : vector<16x128xf32>
    %866 = arith.mulf %865, %805 : vector<16x128xf32>
    %cst_276 = arith.constant 1.33333337 : f32
    %867 = vector.broadcast %cst_276 : f32 to vector<16x128xf32>
    %868 = arith.subf %867, %865 : vector<16x128xf32>
    %869 = arith.mulf %868, %812 : vector<16x128xf32>
    %870 = arith.addf %866, %869 : vector<16x128xf32>
    %871 = arith.negf %598 : vector<16x128xf32>
    %872 = math.exp %871 : vector<16x128xf32>
    %cst_277 = arith.constant 1.000000e+00 : f32
    %873 = vector.broadcast %cst_277 : f32 to vector<16x128xf32>
    %874 = arith.addf %873, %872 : vector<16x128xf32>
    %875 = arith.divf %873, %874 : vector<16x128xf32>
    %876 = arith.mulf %598, %875 : vector<16x128xf32>
    %877 = arith.truncf %876 : vector<16x128xf32> to vector<16x128xbf16>
    %c0_278 = arith.constant 0 : index
    %c0_279 = arith.constant 0 : index
    %878 = vector.load %arg7[%c0_278, %c0_279] : memref<16x1152xbf16, #tpu.memory_space<vmem>>, vector<16x128xbf16>
    tpu.vector_store %arg7[%c0_278, %c0_279], %877 {strides = array<i32>} : memref<16x1152xbf16, #tpu.memory_space<vmem>>, vector<16x128xbf16>,
    %879 = arith.truncf %821 : vector<16x128xf32> to vector<16x128xbf16>
    %c0_280 = arith.constant 0 : index
    %c128_281 = arith.constant 128 : index
    %880 = vector.load %arg7[%c0_280, %c128_281] : memref<16x1152xbf16, #tpu.memory_space<vmem>>, vector<16x128xbf16>
    tpu.vector_store %arg7[%c0_280, %c128_281], %879 {strides = array<i32>} : memref<16x1152xbf16, #tpu.memory_space<vmem>>, vector<16x128xbf16>,
    %881 = arith.truncf %828 : vector<16x128xf32> to vector<16x128xbf16>
    %c0_282 = arith.constant 0 : index
    %c256_283 = arith.constant 256 : index
    %882 = vector.load %arg7[%c0_282, %c256_283] : memref<16x1152xbf16, #tpu.memory_space<vmem>>, vector<16x128xbf16>
    tpu.vector_store %arg7[%c0_282, %c256_283], %881 {strides = array<i32>} : memref<16x1152xbf16, #tpu.memory_space<vmem>>, vector<16x128xbf16>,
    %883 = arith.truncf %835 : vector<16x128xf32> to vector<16x128xbf16>
    %c0_284 = arith.constant 0 : index
    %c384_285 = arith.constant 384 : index
    %884 = vector.load %arg7[%c0_284, %c384_285] : memref<16x1152xbf16, #tpu.memory_space<vmem>>, vector<16x128xbf16>
    tpu.vector_store %arg7[%c0_284, %c384_285], %883 {strides = array<i32>} : memref<16x1152xbf16, #tpu.memory_space<vmem>>, vector<16x128xbf16>,
    %885 = arith.truncf %842 : vector<16x128xf32> to vector<16x128xbf16>
    %c0_286 = arith.constant 0 : index
    %c512_287 = arith.constant 512 : index
    %886 = vector.load %arg7[%c0_286, %c512_287] : memref<16x1152xbf16, #tpu.memory_space<vmem>>, vector<16x128xbf16>
    tpu.vector_store %arg7[%c0_286, %c512_287], %885 {strides = array<i32>} : memref<16x1152xbf16, #tpu.memory_space<vmem>>, vector<16x128xbf16>,
    %887 = arith.truncf %849 : vector<16x128xf32> to vector<16x128xbf16>
    %c0_288 = arith.constant 0 : index
    %c640_289 = arith.constant 640 : index
    %888 = vector.load %arg7[%c0_288, %c640_289] : memref<16x1152xbf16, #tpu.memory_space<vmem>>, vector<16x128xbf16>
    tpu.vector_store %arg7[%c0_288, %c640_289], %887 {strides = array<i32>} : memref<16x1152xbf16, #tpu.memory_space<vmem>>, vector<16x128xbf16>,
    %889 = arith.truncf %856 : vector<16x128xf32> to vector<16x128xbf16>
    %c0_290 = arith.constant 0 : index
    %c768_291 = arith.constant 768 : index
    %890 = vector.load %arg7[%c0_290, %c768_291] : memref<16x1152xbf16, #tpu.memory_space<vmem>>, vector<16x128xbf16>
    tpu.vector_store %arg7[%c0_290, %c768_291], %889 {strides = array<i32>} : memref<16x1152xbf16, #tpu.memory_space<vmem>>, vector<16x128xbf16>,
    %891 = arith.truncf %863 : vector<16x128xf32> to vector<16x128xbf16>
    %c0_292 = arith.constant 0 : index
    %c896_293 = arith.constant 896 : index
    %892 = vector.load %arg7[%c0_292, %c896_293] : memref<16x1152xbf16, #tpu.memory_space<vmem>>, vector<16x128xbf16>
    tpu.vector_store %arg7[%c0_292, %c896_293], %891 {strides = array<i32>} : memref<16x1152xbf16, #tpu.memory_space<vmem>>, vector<16x128xbf16>,
    %893 = arith.truncf %870 : vector<16x128xf32> to vector<16x128xbf16>
    %c0_294 = arith.constant 0 : index
    %c1024_295 = arith.constant 1024 : index
    %894 = vector.load %arg7[%c0_294, %c1024_295] : memref<16x1152xbf16, #tpu.memory_space<vmem>>, vector<16x128xbf16>
    tpu.vector_store %arg7[%c0_294, %c1024_295], %893 {strides = array<i32>} : memref<16x1152xbf16, #tpu.memory_space<vmem>>, vector<16x128xbf16>,
    %c0_296 = arith.constant 0 : index
    %c0_297 = arith.constant 0 : index
    %895 = vector.load %arg7[%c0_296, %c0_297] : memref<16x1152xbf16, #tpu.memory_space<vmem>>, vector<16x1152xbf16>
    %c0_298 = arith.constant 0 : index
    %c0_299 = arith.constant 0 : index
    %896 = vector.load %arg4[%c0_298, %c0_299] : memref<1152x128xbf16, #tpu.memory_space<vmem>>, vector<1152x128xbf16>
    %cst_300 = arith.constant dense<0.000000e+00> : vector<16x128xf32>
    %897 = tpu.matmul %895, %896, %cst_300 {dimension_numbers = #tpu.dot_dimension_numbers<[1], [0], [0], [1], [0, 0, 1, 1], [], []>} : vector<16x1152xbf16>, vector<1152x128xbf16>, vector<16x128xf32> -> vector<16x128xf32>
    %cst_301 = arith.constant -2.200000e+00 : f32
    %898 = vector.broadcast %cst_301 : f32 to vector<16x128xf32>
    %899 = arith.cmpf oge, %897, %898 : vector<16x128xf32>
    %cst_302 = arith.constant -1.800000e+00 : f32
    %900 = vector.broadcast %cst_302 : f32 to vector<16x128xf32>
    %901 = arith.cmpf olt, %897, %900 : vector<16x128xf32>
    %902 = arith.andi %899, %901 : vector<16x128xi1>
    %903 = arith.extui %902 : vector<16x128xi1> to vector<16x128xi32>
    %904 = arith.sitofp %903 : vector<16x128xi32> to vector<16x128xf32>
    %cst_303 = arith.constant -1.800000e+00 : f32
    %905 = vector.broadcast %cst_303 : f32 to vector<16x128xf32>
    %906 = arith.cmpf oge, %897, %905 : vector<16x128xf32>
    %cst_304 = arith.constant -1.400000e+00 : f32
    %907 = vector.broadcast %cst_304 : f32 to vector<16x128xf32>
    %908 = arith.cmpf olt, %897, %907 : vector<16x128xf32>
    %909 = arith.andi %906, %908 : vector<16x128xi1>
    %910 = arith.extui %909 : vector<16x128xi1> to vector<16x128xi32>
    %911 = arith.sitofp %910 : vector<16x128xi32> to vector<16x128xf32>
    %cst_305 = arith.constant -1.400000e+00 : f32
    %912 = vector.broadcast %cst_305 : f32 to vector<16x128xf32>
    %913 = arith.cmpf oge, %897, %912 : vector<16x128xf32>
    %cst_306 = arith.constant -1.000000e+00 : f32
    %914 = vector.broadcast %cst_306 : f32 to vector<16x128xf32>
    %915 = arith.cmpf olt, %897, %914 : vector<16x128xf32>
    %916 = arith.andi %913, %915 : vector<16x128xi1>
    %917 = arith.extui %916 : vector<16x128xi1> to vector<16x128xi32>
    %918 = arith.sitofp %917 : vector<16x128xi32> to vector<16x128xf32>
    %cst_307 = arith.constant -1.000000e+00 : f32
    %919 = vector.broadcast %cst_307 : f32 to vector<16x128xf32>
    %920 = arith.cmpf oge, %897, %919 : vector<16x128xf32>
    %cst_308 = arith.constant -6.000000e-01 : f32
    %921 = vector.broadcast %cst_308 : f32 to vector<16x128xf32>
    %922 = arith.cmpf olt, %897, %921 : vector<16x128xf32>
    %923 = arith.andi %920, %922 : vector<16x128xi1>
    %924 = arith.extui %923 : vector<16x128xi1> to vector<16x128xi32>
    %925 = arith.sitofp %924 : vector<16x128xi32> to vector<16x128xf32>
    %cst_309 = arith.constant -6.000000e-01 : f32
    %926 = vector.broadcast %cst_309 : f32 to vector<16x128xf32>
    %927 = arith.cmpf oge, %897, %926 : vector<16x128xf32>
    %cst_310 = arith.constant -2.000000e-01 : f32
    %928 = vector.broadcast %cst_310 : f32 to vector<16x128xf32>
    %929 = arith.cmpf olt, %897, %928 : vector<16x128xf32>
    %930 = arith.andi %927, %929 : vector<16x128xi1>
    %931 = arith.extui %930 : vector<16x128xi1> to vector<16x128xi32>
    %932 = arith.sitofp %931 : vector<16x128xi32> to vector<16x128xf32>
    %cst_311 = arith.constant -2.000000e-01 : f32
    %933 = vector.broadcast %cst_311 : f32 to vector<16x128xf32>
    %934 = arith.cmpf oge, %897, %933 : vector<16x128xf32>
    %cst_312 = arith.constant 2.000000e-01 : f32
    %935 = vector.broadcast %cst_312 : f32 to vector<16x128xf32>
    %936 = arith.cmpf olt, %897, %935 : vector<16x128xf32>
    %937 = arith.andi %934, %936 : vector<16x128xi1>
    %938 = arith.extui %937 : vector<16x128xi1> to vector<16x128xi32>
    %939 = arith.sitofp %938 : vector<16x128xi32> to vector<16x128xf32>
    %cst_313 = arith.constant 2.000000e-01 : f32
    %940 = vector.broadcast %cst_313 : f32 to vector<16x128xf32>
    %941 = arith.cmpf oge, %897, %940 : vector<16x128xf32>
    %cst_314 = arith.constant 6.000000e-01 : f32
    %942 = vector.broadcast %cst_314 : f32 to vector<16x128xf32>
    %943 = arith.cmpf olt, %897, %942 : vector<16x128xf32>
    %944 = arith.andi %941, %943 : vector<16x128xi1>
    %945 = arith.extui %944 : vector<16x128xi1> to vector<16x128xi32>
    %946 = arith.sitofp %945 : vector<16x128xi32> to vector<16x128xf32>
    %cst_315 = arith.constant 6.000000e-01 : f32
    %947 = vector.broadcast %cst_315 : f32 to vector<16x128xf32>
    %948 = arith.cmpf oge, %897, %947 : vector<16x128xf32>
    %cst_316 = arith.constant 1.000000e+00 : f32
    %949 = vector.broadcast %cst_316 : f32 to vector<16x128xf32>
    %950 = arith.cmpf olt, %897, %949 : vector<16x128xf32>
    %951 = arith.andi %948, %950 : vector<16x128xi1>
    %952 = arith.extui %951 : vector<16x128xi1> to vector<16x128xi32>
    %953 = arith.sitofp %952 : vector<16x128xi32> to vector<16x128xf32>
    %cst_317 = arith.constant 1.000000e+00 : f32
    %954 = vector.broadcast %cst_317 : f32 to vector<16x128xf32>
    %955 = arith.cmpf oge, %897, %954 : vector<16x128xf32>
    %cst_318 = arith.constant 1.400000e+00 : f32
    %956 = vector.broadcast %cst_318 : f32 to vector<16x128xf32>
    %957 = arith.cmpf olt, %897, %956 : vector<16x128xf32>
    %958 = arith.andi %955, %957 : vector<16x128xi1>
    %959 = arith.extui %958 : vector<16x128xi1> to vector<16x128xi32>
    %960 = arith.sitofp %959 : vector<16x128xi32> to vector<16x128xf32>
    %cst_319 = arith.constant 1.400000e+00 : f32
    %961 = vector.broadcast %cst_319 : f32 to vector<16x128xf32>
    %962 = arith.cmpf oge, %897, %961 : vector<16x128xf32>
    %cst_320 = arith.constant 1.800000e+00 : f32
    %963 = vector.broadcast %cst_320 : f32 to vector<16x128xf32>
    %964 = arith.cmpf olt, %897, %963 : vector<16x128xf32>
    %965 = arith.andi %962, %964 : vector<16x128xi1>
    %966 = arith.extui %965 : vector<16x128xi1> to vector<16x128xi32>
    %967 = arith.sitofp %966 : vector<16x128xi32> to vector<16x128xf32>
    %cst_321 = arith.constant 1.800000e+00 : f32
    %968 = vector.broadcast %cst_321 : f32 to vector<16x128xf32>
    %969 = arith.cmpf oge, %897, %968 : vector<16x128xf32>
    %cst_322 = arith.constant 2.200000e+00 : f32
    %970 = vector.broadcast %cst_322 : f32 to vector<16x128xf32>
    %971 = arith.cmpf olt, %897, %970 : vector<16x128xf32>
    %972 = arith.andi %969, %971 : vector<16x128xi1>
    %973 = arith.extui %972 : vector<16x128xi1> to vector<16x128xi32>
    %974 = arith.sitofp %973 : vector<16x128xi32> to vector<16x128xf32>
    %cst_323 = arith.constant 2.500000e+00 : f32
    %975 = vector.broadcast %cst_323 : f32 to vector<16x128xf32>
    %976 = arith.mulf %897, %975 : vector<16x128xf32>
    %cst_324 = arith.constant -5.500000e+00 : f32
    %977 = vector.broadcast %cst_324 : f32 to vector<16x128xf32>
    %978 = arith.subf %976, %977 : vector<16x128xf32>
    %979 = arith.mulf %978, %904 : vector<16x128xf32>
    %cst_325 = arith.constant 2.000000e+00 : f32
    %980 = vector.broadcast %cst_325 : f32 to vector<16x128xf32>
    %981 = arith.subf %980, %978 : vector<16x128xf32>
    %982 = arith.mulf %981, %911 : vector<16x128xf32>
    %983 = arith.addf %979, %982 : vector<16x128xf32>
    %cst_326 = arith.constant -4.500000e+00 : f32
    %984 = vector.broadcast %cst_326 : f32 to vector<16x128xf32>
    %985 = arith.subf %976, %984 : vector<16x128xf32>
    %986 = arith.mulf %985, %911 : vector<16x128xf32>
    %cst_327 = arith.constant 2.000000e+00 : f32
    %987 = vector.broadcast %cst_327 : f32 to vector<16x128xf32>
    %988 = arith.subf %987, %985 : vector<16x128xf32>
    %989 = arith.mulf %988, %918 : vector<16x128xf32>
    %990 = arith.addf %986, %989 : vector<16x128xf32>
    %cst_328 = arith.constant -3.500000e+00 : f32
    %991 = vector.broadcast %cst_328 : f32 to vector<16x128xf32>
    %992 = arith.subf %976, %991 : vector<16x128xf32>
    %993 = arith.mulf %992, %918 : vector<16x128xf32>
    %cst_329 = arith.constant 2.000000e+00 : f32
    %994 = vector.broadcast %cst_329 : f32 to vector<16x128xf32>
    %995 = arith.subf %994, %992 : vector<16x128xf32>
    %996 = arith.mulf %995, %925 : vector<16x128xf32>
    %997 = arith.addf %993, %996 : vector<16x128xf32>
    %cst_330 = arith.constant -2.500000e+00 : f32
    %998 = vector.broadcast %cst_330 : f32 to vector<16x128xf32>
    %999 = arith.subf %976, %998 : vector<16x128xf32>
    %1000 = arith.mulf %999, %925 : vector<16x128xf32>
    %cst_331 = arith.constant 2.000000e+00 : f32
    %1001 = vector.broadcast %cst_331 : f32 to vector<16x128xf32>
    %1002 = arith.subf %1001, %999 : vector<16x128xf32>
    %1003 = arith.mulf %1002, %932 : vector<16x128xf32>
    %1004 = arith.addf %1000, %1003 : vector<16x128xf32>
    %cst_332 = arith.constant -1.500000e+00 : f32
    %1005 = vector.broadcast %cst_332 : f32 to vector<16x128xf32>
    %1006 = arith.subf %976, %1005 : vector<16x128xf32>
    %1007 = arith.mulf %1006, %932 : vector<16x128xf32>
    %cst_333 = arith.constant 2.000000e+00 : f32
    %1008 = vector.broadcast %cst_333 : f32 to vector<16x128xf32>
    %1009 = arith.subf %1008, %1006 : vector<16x128xf32>
    %1010 = arith.mulf %1009, %939 : vector<16x128xf32>
    %1011 = arith.addf %1007, %1010 : vector<16x128xf32>
    %cst_334 = arith.constant -5.000000e-01 : f32
    %1012 = vector.broadcast %cst_334 : f32 to vector<16x128xf32>
    %1013 = arith.subf %976, %1012 : vector<16x128xf32>
    %1014 = arith.mulf %1013, %939 : vector<16x128xf32>
    %cst_335 = arith.constant 2.000000e+00 : f32
    %1015 = vector.broadcast %cst_335 : f32 to vector<16x128xf32>
    %1016 = arith.subf %1015, %1013 : vector<16x128xf32>
    %1017 = arith.mulf %1016, %946 : vector<16x128xf32>
    %1018 = arith.addf %1014, %1017 : vector<16x128xf32>
    %cst_336 = arith.constant 5.000000e-01 : f32
    %1019 = vector.broadcast %cst_336 : f32 to vector<16x128xf32>
    %1020 = arith.subf %976, %1019 : vector<16x128xf32>
    %1021 = arith.mulf %1020, %946 : vector<16x128xf32>
    %cst_337 = arith.constant 2.000000e+00 : f32
    %1022 = vector.broadcast %cst_337 : f32 to vector<16x128xf32>
    %1023 = arith.subf %1022, %1020 : vector<16x128xf32>
    %1024 = arith.mulf %1023, %953 : vector<16x128xf32>
    %1025 = arith.addf %1021, %1024 : vector<16x128xf32>
    %cst_338 = arith.constant 1.500000e+00 : f32
    %1026 = vector.broadcast %cst_338 : f32 to vector<16x128xf32>
    %1027 = arith.subf %976, %1026 : vector<16x128xf32>
    %1028 = arith.mulf %1027, %953 : vector<16x128xf32>
    %cst_339 = arith.constant 2.000000e+00 : f32
    %1029 = vector.broadcast %cst_339 : f32 to vector<16x128xf32>
    %1030 = arith.subf %1029, %1027 : vector<16x128xf32>
    %1031 = arith.mulf %1030, %960 : vector<16x128xf32>
    %1032 = arith.addf %1028, %1031 : vector<16x128xf32>
    %cst_340 = arith.constant 2.500000e+00 : f32
    %1033 = vector.broadcast %cst_340 : f32 to vector<16x128xf32>
    %1034 = arith.subf %976, %1033 : vector<16x128xf32>
    %1035 = arith.mulf %1034, %960 : vector<16x128xf32>
    %cst_341 = arith.constant 2.000000e+00 : f32
    %1036 = vector.broadcast %cst_341 : f32 to vector<16x128xf32>
    %1037 = arith.subf %1036, %1034 : vector<16x128xf32>
    %1038 = arith.mulf %1037, %967 : vector<16x128xf32>
    %1039 = arith.addf %1035, %1038 : vector<16x128xf32>
    %cst_342 = arith.constant 3.500000e+00 : f32
    %1040 = vector.broadcast %cst_342 : f32 to vector<16x128xf32>
    %1041 = arith.subf %976, %1040 : vector<16x128xf32>
    %1042 = arith.mulf %1041, %967 : vector<16x128xf32>
    %cst_343 = arith.constant 2.000000e+00 : f32
    %1043 = vector.broadcast %cst_343 : f32 to vector<16x128xf32>
    %1044 = arith.subf %1043, %1041 : vector<16x128xf32>
    %1045 = arith.mulf %1044, %974 : vector<16x128xf32>
    %1046 = arith.addf %1042, %1045 : vector<16x128xf32>
    %cst_344 = arith.constant 1.250000e+00 : f32
    %1047 = vector.broadcast %cst_344 : f32 to vector<16x128xf32>
    %1048 = arith.mulf %897, %1047 : vector<16x128xf32>
    %cst_345 = arith.constant -2.750000e+00 : f32
    %1049 = vector.broadcast %cst_345 : f32 to vector<16x128xf32>
    %1050 = arith.subf %1048, %1049 : vector<16x128xf32>
    %1051 = arith.mulf %1050, %983 : vector<16x128xf32>
    %cst_346 = arith.constant 1.500000e+00 : f32
    %1052 = vector.broadcast %cst_346 : f32 to vector<16x128xf32>
    %1053 = arith.subf %1052, %1050 : vector<16x128xf32>
    %1054 = arith.mulf %1053, %990 : vector<16x128xf32>
    %1055 = arith.addf %1051, %1054 : vector<16x128xf32>
    %cst_347 = arith.constant -2.250000e+00 : f32
    %1056 = vector.broadcast %cst_347 : f32 to vector<16x128xf32>
    %1057 = arith.subf %1048, %1056 : vector<16x128xf32>
    %1058 = arith.mulf %1057, %990 : vector<16x128xf32>
    %cst_348 = arith.constant 1.500000e+00 : f32
    %1059 = vector.broadcast %cst_348 : f32 to vector<16x128xf32>
    %1060 = arith.subf %1059, %1057 : vector<16x128xf32>
    %1061 = arith.mulf %1060, %997 : vector<16x128xf32>
    %1062 = arith.addf %1058, %1061 : vector<16x128xf32>
    %cst_349 = arith.constant -1.750000e+00 : f32
    %1063 = vector.broadcast %cst_349 : f32 to vector<16x128xf32>
    %1064 = arith.subf %1048, %1063 : vector<16x128xf32>
    %1065 = arith.mulf %1064, %997 : vector<16x128xf32>
    %cst_350 = arith.constant 1.500000e+00 : f32
    %1066 = vector.broadcast %cst_350 : f32 to vector<16x128xf32>
    %1067 = arith.subf %1066, %1064 : vector<16x128xf32>
    %1068 = arith.mulf %1067, %1004 : vector<16x128xf32>
    %1069 = arith.addf %1065, %1068 : vector<16x128xf32>
    %cst_351 = arith.constant -1.250000e+00 : f32
    %1070 = vector.broadcast %cst_351 : f32 to vector<16x128xf32>
    %1071 = arith.subf %1048, %1070 : vector<16x128xf32>
    %1072 = arith.mulf %1071, %1004 : vector<16x128xf32>
    %cst_352 = arith.constant 1.500000e+00 : f32
    %1073 = vector.broadcast %cst_352 : f32 to vector<16x128xf32>
    %1074 = arith.subf %1073, %1071 : vector<16x128xf32>
    %1075 = arith.mulf %1074, %1011 : vector<16x128xf32>
    %1076 = arith.addf %1072, %1075 : vector<16x128xf32>
    %cst_353 = arith.constant -7.500000e-01 : f32
    %1077 = vector.broadcast %cst_353 : f32 to vector<16x128xf32>
    %1078 = arith.subf %1048, %1077 : vector<16x128xf32>
    %1079 = arith.mulf %1078, %1011 : vector<16x128xf32>
    %cst_354 = arith.constant 1.500000e+00 : f32
    %1080 = vector.broadcast %cst_354 : f32 to vector<16x128xf32>
    %1081 = arith.subf %1080, %1078 : vector<16x128xf32>
    %1082 = arith.mulf %1081, %1018 : vector<16x128xf32>
    %1083 = arith.addf %1079, %1082 : vector<16x128xf32>
    %cst_355 = arith.constant -2.500000e-01 : f32
    %1084 = vector.broadcast %cst_355 : f32 to vector<16x128xf32>
    %1085 = arith.subf %1048, %1084 : vector<16x128xf32>
    %1086 = arith.mulf %1085, %1018 : vector<16x128xf32>
    %cst_356 = arith.constant 1.500000e+00 : f32
    %1087 = vector.broadcast %cst_356 : f32 to vector<16x128xf32>
    %1088 = arith.subf %1087, %1085 : vector<16x128xf32>
    %1089 = arith.mulf %1088, %1025 : vector<16x128xf32>
    %1090 = arith.addf %1086, %1089 : vector<16x128xf32>
    %cst_357 = arith.constant 2.500000e-01 : f32
    %1091 = vector.broadcast %cst_357 : f32 to vector<16x128xf32>
    %1092 = arith.subf %1048, %1091 : vector<16x128xf32>
    %1093 = arith.mulf %1092, %1025 : vector<16x128xf32>
    %cst_358 = arith.constant 1.500000e+00 : f32
    %1094 = vector.broadcast %cst_358 : f32 to vector<16x128xf32>
    %1095 = arith.subf %1094, %1092 : vector<16x128xf32>
    %1096 = arith.mulf %1095, %1032 : vector<16x128xf32>
    %1097 = arith.addf %1093, %1096 : vector<16x128xf32>
    %cst_359 = arith.constant 7.500000e-01 : f32
    %1098 = vector.broadcast %cst_359 : f32 to vector<16x128xf32>
    %1099 = arith.subf %1048, %1098 : vector<16x128xf32>
    %1100 = arith.mulf %1099, %1032 : vector<16x128xf32>
    %cst_360 = arith.constant 1.500000e+00 : f32
    %1101 = vector.broadcast %cst_360 : f32 to vector<16x128xf32>
    %1102 = arith.subf %1101, %1099 : vector<16x128xf32>
    %1103 = arith.mulf %1102, %1039 : vector<16x128xf32>
    %1104 = arith.addf %1100, %1103 : vector<16x128xf32>
    %cst_361 = arith.constant 1.250000e+00 : f32
    %1105 = vector.broadcast %cst_361 : f32 to vector<16x128xf32>
    %1106 = arith.subf %1048, %1105 : vector<16x128xf32>
    %1107 = arith.mulf %1106, %1039 : vector<16x128xf32>
    %cst_362 = arith.constant 1.500000e+00 : f32
    %1108 = vector.broadcast %cst_362 : f32 to vector<16x128xf32>
    %1109 = arith.subf %1108, %1106 : vector<16x128xf32>
    %1110 = arith.mulf %1109, %1046 : vector<16x128xf32>
    %1111 = arith.addf %1107, %1110 : vector<16x128xf32>
    %cst_363 = arith.constant 0.833333313 : f32
    %1112 = vector.broadcast %cst_363 : f32 to vector<16x128xf32>
    %1113 = arith.mulf %897, %1112 : vector<16x128xf32>
    %cst_364 = arith.constant -1.83333337 : f32
    %1114 = vector.broadcast %cst_364 : f32 to vector<16x128xf32>
    %1115 = arith.subf %1113, %1114 : vector<16x128xf32>
    %1116 = arith.mulf %1115, %1055 : vector<16x128xf32>
    %cst_365 = arith.constant 1.33333337 : f32
    %1117 = vector.broadcast %cst_365 : f32 to vector<16x128xf32>
    %1118 = arith.subf %1117, %1115 : vector<16x128xf32>
    %1119 = arith.mulf %1118, %1062 : vector<16x128xf32>
    %1120 = arith.addf %1116, %1119 : vector<16x128xf32>
    %cst_366 = arith.constant -1.500000e+00 : f32
    %1121 = vector.broadcast %cst_366 : f32 to vector<16x128xf32>
    %1122 = arith.subf %1113, %1121 : vector<16x128xf32>
    %1123 = arith.mulf %1122, %1062 : vector<16x128xf32>
    %cst_367 = arith.constant 1.33333337 : f32
    %1124 = vector.broadcast %cst_367 : f32 to vector<16x128xf32>
    %1125 = arith.subf %1124, %1122 : vector<16x128xf32>
    %1126 = arith.mulf %1125, %1069 : vector<16x128xf32>
    %1127 = arith.addf %1123, %1126 : vector<16x128xf32>
    %cst_368 = arith.constant -1.16666663 : f32
    %1128 = vector.broadcast %cst_368 : f32 to vector<16x128xf32>
    %1129 = arith.subf %1113, %1128 : vector<16x128xf32>
    %1130 = arith.mulf %1129, %1069 : vector<16x128xf32>
    %cst_369 = arith.constant 1.33333337 : f32
    %1131 = vector.broadcast %cst_369 : f32 to vector<16x128xf32>
    %1132 = arith.subf %1131, %1129 : vector<16x128xf32>
    %1133 = arith.mulf %1132, %1076 : vector<16x128xf32>
    %1134 = arith.addf %1130, %1133 : vector<16x128xf32>
    %cst_370 = arith.constant -0.833333313 : f32
    %1135 = vector.broadcast %cst_370 : f32 to vector<16x128xf32>
    %1136 = arith.subf %1113, %1135 : vector<16x128xf32>
    %1137 = arith.mulf %1136, %1076 : vector<16x128xf32>
    %cst_371 = arith.constant 1.33333337 : f32
    %1138 = vector.broadcast %cst_371 : f32 to vector<16x128xf32>
    %1139 = arith.subf %1138, %1136 : vector<16x128xf32>
    %1140 = arith.mulf %1139, %1083 : vector<16x128xf32>
    %1141 = arith.addf %1137, %1140 : vector<16x128xf32>
    %cst_372 = arith.constant -5.000000e-01 : f32
    %1142 = vector.broadcast %cst_372 : f32 to vector<16x128xf32>
    %1143 = arith.subf %1113, %1142 : vector<16x128xf32>
    %1144 = arith.mulf %1143, %1083 : vector<16x128xf32>
    %cst_373 = arith.constant 1.33333337 : f32
    %1145 = vector.broadcast %cst_373 : f32 to vector<16x128xf32>
    %1146 = arith.subf %1145, %1143 : vector<16x128xf32>
    %1147 = arith.mulf %1146, %1090 : vector<16x128xf32>
    %1148 = arith.addf %1144, %1147 : vector<16x128xf32>
    %cst_374 = arith.constant -0.166666672 : f32
    %1149 = vector.broadcast %cst_374 : f32 to vector<16x128xf32>
    %1150 = arith.subf %1113, %1149 : vector<16x128xf32>
    %1151 = arith.mulf %1150, %1090 : vector<16x128xf32>
    %cst_375 = arith.constant 1.33333337 : f32
    %1152 = vector.broadcast %cst_375 : f32 to vector<16x128xf32>
    %1153 = arith.subf %1152, %1150 : vector<16x128xf32>
    %1154 = arith.mulf %1153, %1097 : vector<16x128xf32>
    %1155 = arith.addf %1151, %1154 : vector<16x128xf32>
    %cst_376 = arith.constant 0.166666672 : f32
    %1156 = vector.broadcast %cst_376 : f32 to vector<16x128xf32>
    %1157 = arith.subf %1113, %1156 : vector<16x128xf32>
    %1158 = arith.mulf %1157, %1097 : vector<16x128xf32>
    %cst_377 = arith.constant 1.33333337 : f32
    %1159 = vector.broadcast %cst_377 : f32 to vector<16x128xf32>
    %1160 = arith.subf %1159, %1157 : vector<16x128xf32>
    %1161 = arith.mulf %1160, %1104 : vector<16x128xf32>
    %1162 = arith.addf %1158, %1161 : vector<16x128xf32>
    %cst_378 = arith.constant 5.000000e-01 : f32
    %1163 = vector.broadcast %cst_378 : f32 to vector<16x128xf32>
    %1164 = arith.subf %1113, %1163 : vector<16x128xf32>
    %1165 = arith.mulf %1164, %1104 : vector<16x128xf32>
    %cst_379 = arith.constant 1.33333337 : f32
    %1166 = vector.broadcast %cst_379 : f32 to vector<16x128xf32>
    %1167 = arith.subf %1166, %1164 : vector<16x128xf32>
    %1168 = arith.mulf %1167, %1111 : vector<16x128xf32>
    %1169 = arith.addf %1165, %1168 : vector<16x128xf32>
    %1170 = arith.negf %897 : vector<16x128xf32>
    %1171 = math.exp %1170 : vector<16x128xf32>
    %cst_380 = arith.constant 1.000000e+00 : f32
    %1172 = vector.broadcast %cst_380 : f32 to vector<16x128xf32>
    %1173 = arith.addf %1172, %1171 : vector<16x128xf32>
    %1174 = arith.divf %1172, %1173 : vector<16x128xf32>
    %1175 = arith.mulf %897, %1174 : vector<16x128xf32>
    %1176 = arith.truncf %1175 : vector<16x128xf32> to vector<16x128xbf16>
    %c0_381 = arith.constant 0 : index
    %c0_382 = arith.constant 0 : index
    %1177 = vector.load %arg7[%c0_381, %c0_382] : memref<16x1152xbf16, #tpu.memory_space<vmem>>, vector<16x128xbf16>
    tpu.vector_store %arg7[%c0_381, %c0_382], %1176 {strides = array<i32>} : memref<16x1152xbf16, #tpu.memory_space<vmem>>, vector<16x128xbf16>,
    %1178 = arith.truncf %1120 : vector<16x128xf32> to vector<16x128xbf16>
    %c0_383 = arith.constant 0 : index
    %c128_384 = arith.constant 128 : index
    %1179 = vector.load %arg7[%c0_383, %c128_384] : memref<16x1152xbf16, #tpu.memory_space<vmem>>, vector<16x128xbf16>
    tpu.vector_store %arg7[%c0_383, %c128_384], %1178 {strides = array<i32>} : memref<16x1152xbf16, #tpu.memory_space<vmem>>, vector<16x128xbf16>,
    %1180 = arith.truncf %1127 : vector<16x128xf32> to vector<16x128xbf16>
    %c0_385 = arith.constant 0 : index
    %c256_386 = arith.constant 256 : index
    %1181 = vector.load %arg7[%c0_385, %c256_386] : memref<16x1152xbf16, #tpu.memory_space<vmem>>, vector<16x128xbf16>
    tpu.vector_store %arg7[%c0_385, %c256_386], %1180 {strides = array<i32>} : memref<16x1152xbf16, #tpu.memory_space<vmem>>, vector<16x128xbf16>,
    %1182 = arith.truncf %1134 : vector<16x128xf32> to vector<16x128xbf16>
    %c0_387 = arith.constant 0 : index
    %c384_388 = arith.constant 384 : index
    %1183 = vector.load %arg7[%c0_387, %c384_388] : memref<16x1152xbf16, #tpu.memory_space<vmem>>, vector<16x128xbf16>
    tpu.vector_store %arg7[%c0_387, %c384_388], %1182 {strides = array<i32>} : memref<16x1152xbf16, #tpu.memory_space<vmem>>, vector<16x128xbf16>,
    %1184 = arith.truncf %1141 : vector<16x128xf32> to vector<16x128xbf16>
    %c0_389 = arith.constant 0 : index
    %c512_390 = arith.constant 512 : index
    %1185 = vector.load %arg7[%c0_389, %c512_390] : memref<16x1152xbf16, #tpu.memory_space<vmem>>, vector<16x128xbf16>
    tpu.vector_store %arg7[%c0_389, %c512_390], %1184 {strides = array<i32>} : memref<16x1152xbf16, #tpu.memory_space<vmem>>, vector<16x128xbf16>,
    %1186 = arith.truncf %1148 : vector<16x128xf32> to vector<16x128xbf16>
    %c0_391 = arith.constant 0 : index
    %c640_392 = arith.constant 640 : index
    %1187 = vector.load %arg7[%c0_391, %c640_392] : memref<16x1152xbf16, #tpu.memory_space<vmem>>, vector<16x128xbf16>
    tpu.vector_store %arg7[%c0_391, %c640_392], %1186 {strides = array<i32>} : memref<16x1152xbf16, #tpu.memory_space<vmem>>, vector<16x128xbf16>,
    %1188 = arith.truncf %1155 : vector<16x128xf32> to vector<16x128xbf16>
    %c0_393 = arith.constant 0 : index
    %c768_394 = arith.constant 768 : index
    %1189 = vector.load %arg7[%c0_393, %c768_394] : memref<16x1152xbf16, #tpu.memory_space<vmem>>, vector<16x128xbf16>
    tpu.vector_store %arg7[%c0_393, %c768_394], %1188 {strides = array<i32>} : memref<16x1152xbf16, #tpu.memory_space<vmem>>, vector<16x128xbf16>,
    %1190 = arith.truncf %1162 : vector<16x128xf32> to vector<16x128xbf16>
    %c0_395 = arith.constant 0 : index
    %c896_396 = arith.constant 896 : index
    %1191 = vector.load %arg7[%c0_395, %c896_396] : memref<16x1152xbf16, #tpu.memory_space<vmem>>, vector<16x128xbf16>
    tpu.vector_store %arg7[%c0_395, %c896_396], %1190 {strides = array<i32>} : memref<16x1152xbf16, #tpu.memory_space<vmem>>, vector<16x128xbf16>,
    %1192 = arith.truncf %1169 : vector<16x128xf32> to vector<16x128xbf16>
    %c0_397 = arith.constant 0 : index
    %c1024_398 = arith.constant 1024 : index
    %1193 = vector.load %arg7[%c0_397, %c1024_398] : memref<16x1152xbf16, #tpu.memory_space<vmem>>, vector<16x128xbf16>
    tpu.vector_store %arg7[%c0_397, %c1024_398], %1192 {strides = array<i32>} : memref<16x1152xbf16, #tpu.memory_space<vmem>>, vector<16x128xbf16>,
    %c0_399 = arith.constant 0 : index
    %c0_400 = arith.constant 0 : index
    %1194 = vector.load %arg7[%c0_399, %c0_400] : memref<16x1152xbf16, #tpu.memory_space<vmem>>, vector<16x1152xbf16>
    %c0_401 = arith.constant 0 : index
    %c0_402 = arith.constant 0 : index
    %1195 = vector.load %arg5[%c0_401, %c0_402] : memref<1152x128xbf16, #tpu.memory_space<vmem>>, vector<1152x128xbf16>
    %cst_403 = arith.constant dense<0.000000e+00> : vector<16x128xf32>
    %1196 = tpu.matmul %1194, %1195, %cst_403 {dimension_numbers = #tpu.dot_dimension_numbers<[1], [0], [0], [1], [0, 0, 1, 1], [], []>} : vector<16x1152xbf16>, vector<1152x128xbf16>, vector<16x128xf32> -> vector<16x128xf32>
    %c0_404 = arith.constant 0 : index
    %c0_405 = arith.constant 0 : index
    %1197 = vector.load %arg6[%c0_404, %c0_405] : memref<16x128xf32, #tpu.memory_space<vmem>>, vector<16x128xf32>
    tpu.vector_store %arg6[%c0_404, %c0_405], %1196 {strides = array<i32>} : memref<16x128xf32, #tpu.memory_space<vmem>>, vector<16x128xf32>,
    return
  }
  func.func @transform_0(%arg0: i32) -> (i32, i32) {
    %c0_i32 = arith.constant 0 : i32
    %c0_i32_0 = arith.constant 0 : i32
    return %arg0, %c0_i32 : i32, i32
  }
  func.func @transform_1(%arg0: i32) -> (i32, i32) {
    %c0_i32 = arith.constant 0 : i32
    %c0_i32_0 = arith.constant 0 : i32
    %c0_i32_1 = arith.constant 0 : i32
    return %c0_i32, %c0_i32_0 : i32, i32
  }
  func.func @transform_2(%arg0: i32) -> (i32, i32) {
    %c0_i32 = arith.constant 0 : i32
    %c0_i32_0 = arith.constant 0 : i32
    %c0_i32_1 = arith.constant 0 : i32
    return %c0_i32, %c0_i32_0 : i32, i32
  }
  func.func @transform_3(%arg0: i32) -> (i32, i32) {
    %c0_i32 = arith.constant 0 : i32
    %c0_i32_0 = arith.constant 0 : i32
    %c0_i32_1 = arith.constant 0 : i32
    return %c0_i32, %c0_i32_0 : i32, i32
  }
  func.func @transform_4(%arg0: i32) -> (i32, i32) {
    %c0_i32 = arith.constant 0 : i32
    %c0_i32_0 = arith.constant 0 : i32
    %c0_i32_1 = arith.constant 0 : i32
    return %c0_i32, %c0_i32_0 : i32, i32
  }
  func.func @transform_5(%arg0: i32) -> (i32, i32) {
    %c0_i32 = arith.constant 0 : i32
    %c0_i32_0 = arith.constant 0 : i32
    return %arg0, %c0_i32 : i32, i32
  }
}

</mosaic_0001>

<bundles_post_ra>
// kernel: tpu_custom_call.1
= control target key start
LH: loop header
LB: loop body
LE: loop exit
PB: predicated region body
PF: predicated region fallthrough
CT: control target
= control target key end

     0   :  { %10 = vsyncpa [#allocation4], 0  ;;  %s8469_s0 = inlined_call_operand.hbm [shape: f32[16,128], index: 0, kind: input, shape index: {}]   ;;  %s8470_s1 = inlined_call_operand.hbm [shape: bf16[1152,128], index: 1, kind: input, shape index: {}]   ;;  %s8471_s2 = inlined_call_operand.hbm [shape: bf16[1152,128], index: 2, kind: input, shape index: {}]   ;;  %s8472_s3 = inlined_call_operand.hbm [shape: bf16[1152,128], index: 3, kind: input, shape index: {}]   ;;  %s8473_s4 = inlined_call_operand.hbm [shape: bf16[1152,128], index: 4, kind: input, shape index: {}]   ;;  %s8474_s5 = inlined_call_operand.hbm [shape: f32[16,128], index: 5, kind: output, shape index: {}]  }
   0x1   :  { %11 = vsyncpa [#allocation7], 0 }
   0x2   :  { %12 = vsyncpa [#allocation10], 0 }
   0x3   :  { %13 = vsyncpa [#allocation5], 0  ;;  %s7322_s18 = smov [#allocation6]  }
   0x4   :  { %s31_s19 = sshll.u32 %s7322_s18, 4  ;;  %s32_s19 = int_to_ptr.vmem [resolvable:$true] %s31_s19 }
   0x5   :  { %s7202_s20 = scalar_lea.vmem %s32_s19, 9216  ;;  %p7207_p1 = scmp.lt.s32.totalorder %s32_s19, %s32_s19 }
   0x6   :  { %p7203_p0 = scmp.ne.s32.totalorder %s32_s19, %s7202_s20  ;;  %p7208_p2 = scmp.lt.s32.totalorder %s7202_s20, %s7202_s20 }
   0x8   :  { %p7209_p3 = por %p7208_p2, %p7207_p1 }
   0xa   :  { %p7210_p4 = pnand %p7209_p3, %p7203_p0 }
   0xc   :  { %7213 = shalt.err (!%p7210_p4)
}
   0xd   :  { %s7323_s21 = smov 64   ;;  %s7324_s22 = smov 4  }
   0xe   :  { %37 = dma.hbm_to_vmem [thread:$0]  %s8470_s1, 9216, %s32_s19, [#allocation7], %s7323_s21, %s7323_s21, %s7324_s22  }
   0xf   :  { %s7325_s25 = smov [#allocation9]   ;;  %s7326_s27 = smov [#allocation3]  }
  0x10   :  { %s55_s26 = sshll.u32 %s7325_s25, 4  ;;  %s19_s28 = sshll.u32 %s7326_s27, 4  ;;  %s56_s26 = int_to_ptr.vmem [resolvable:$true] %s55_s26  ;;  %s20_s28 = int_to_ptr.vmem [resolvable:$true] %s19_s28 }
  0x11   :  { %s7222_s29 = scalar_lea.vmem %s56_s26, 9216  ;;  %p7227_p6 = scmp.lt.s32.totalorder %s56_s26, %s56_s26 }
  0x12   :  { %p7223_p5 = scmp.ne.s32.totalorder %s56_s26, %s7222_s29  ;;  %p7228_p7 = scmp.lt.s32.totalorder %s7222_s29, %s7222_s29 }
  0x14   :  { %p7229_p8 = por %p7228_p7, %p7227_p6 }
  0x16   :  { %p7230_p9 = pnand %p7229_p8, %p7223_p5 }
  0x18   :  { %7233 = shalt.err (!%p7230_p9)
}
  0x19   :  { %61 = dma.hbm_to_vmem [thread:$0]  %s8472_s3, 9216, %s56_s26, [#allocation10], %s7323_s21, %s7323_s21, %s7324_s22  }
  0x1a   :  { %s7242_s1 = scalar_lea.vmem %s20_s28, 256  ;;  %p7247_p11 = scmp.lt.s32.totalorder %s20_s28, %s20_s28 }
  0x1b   :  { %p7243_p10 = scmp.ne.s32.totalorder %s20_s28, %s7242_s1  ;;  %p7248_p12 = scmp.lt.s32.totalorder %s7242_s1, %s7242_s1 }
  0x1d   :  { %p7249_p13 = por %p7248_p12, %p7247_p11 }
  0x1f   :  { %p7250_p0 = pnand %p7249_p13, %p7243_p10 }
  0x21   :  { %7253 = shalt.err (!%p7250_p0)
}
  0x22   :  { %s7327_s7 = smov 128   ;;  %s7328_s8 = smov 8  }
  0x23   :  { %25 = dma.hbm_to_vmem [thread:$0]  %s8469_s0, 256, %s20_s28, [#allocation4], %s7327_s7, %s7327_s7, %s7328_s8  }
  0x24   :  { %s7329_s11 = smov [#allocation8]   ;;  %s7330_s3 = smov [#allocation11]  }
  0x25   :  { %s43_s12 = sshll.u32 %s7329_s11, 4  ;;  %s67_s13 = sshll.u32 %s7330_s3, 4  ;;  %s44_s12 = int_to_ptr.vmem [resolvable:$true] %s43_s12  ;;  %s68_s13 = int_to_ptr.vmem [resolvable:$true] %s67_s13 }
  0x26   :  { %s7262_s14 = scalar_lea.vmem %s44_s12, 9216  ;;  %p7267_p2 = scmp.lt.s32.totalorder %s44_s12, %s44_s12 }
  0x27   :  { %p7263_p1 = scmp.ne.s32.totalorder %s44_s12, %s7262_s14  ;;  %p7268_p3 = scmp.lt.s32.totalorder %s7262_s14, %s7262_s14 }
  0x29   :  { %p7269_p4 = por %p7268_p3, %p7267_p2 }
  0x2b   :  { %p7270_p5 = pnand %p7269_p4, %p7263_p1 }
  0x2d   :  { %7273 = shalt.err (!%p7270_p5)
}
  0x2e   :  { %49 = dma.hbm_to_vmem [thread:$0]  %s8471_s2, 9216, %s44_s12, [#allocation7], %s7323_s21, %s7323_s21, %s7324_s22  }
  0x2f   :  { %s7282_s0 = scalar_lea.vmem %s68_s13, 9216  ;;  %p7287_p7 = scmp.lt.s32.totalorder %s68_s13, %s68_s13 }
  0x30   :  { %p7283_p6 = scmp.ne.s32.totalorder %s68_s13, %s7282_s0  ;;  %p7288_p8 = scmp.lt.s32.totalorder %s7282_s0, %s7282_s0 }
  0x32   :  { %p7289_p9 = por %p7288_p8, %p7287_p7 }
  0x34   :  { %p7290_p10 = pnand %p7289_p9, %p7283_p6 }
  0x36   :  { %7293 = shalt.err (!%p7290_p10)
}
  0x37   :  { %73 = dma.hbm_to_vmem [thread:$0]  %s8473_s4, 9216, %s68_s13, [#allocation10], %s7323_s21, %s7323_s21, %s7324_s22  }
  0x38   :  { %7314 = dma.done.wait [#allocation4], 256  }
  0x39   :  { %7315 = vsyncadd [#allocation4], 4294967040 }
  0x3a   :  { %7316 = dma.done.wait [#allocation7], 18432  }
  0x3b   :  { %7317 = vsyncadd [#allocation7], 4294948864 }
  0x3c   :  { %7318 = dma.done.wait [#allocation10], 18432  }
  0x3d   :  { %7319 = vsyncadd [#allocation10], 4294948864  ;;  %v6869_v0 = vld [vmem:[#allocation6 + $0x78] sm:$0xff]   ;;  %v6873_v4 = vld [vmem:[#allocation6 + $0x70] sm:$0xff]   ;;  %v7331_v34 = vmov 0.0   ;;  %s7333_s2 = smov [#allocation12]  }
  0x3e   :  { %v6870_v1 = vld [vmem:[#allocation6 + $0x38] sm:$0xff]   ;;  %6389 = vmatprep.subr.bf16.mxu0 %v6869_v0  ;;  %v6874_v5 = vld [vmem:[#allocation6 + $0x30] sm:$0xff]   ;;  %v6877_v8 = vld [vmem:[#allocation6 + $0x68] sm:$0xff]   ;;  %s5407_s4 = sshll.u32 %s7333_s2, 4  ;;  %s5408_s4 = int_to_ptr.vmem [resolvable:$true] %s5407_s4 }
  0x3f   :  { %v6871_v2 = vld [vmem:[#allocation6 + $0xf8] sm:$0xff]   ;;  %6390 = vmatpush3.bf16.msra.mxu0 %v6870_v1  ;;  %v6875_v6 = vld [vmem:[#allocation6 + $0xf0] sm:$0xff]   ;;  %v6878_v9 = vld [vmem:[#allocation6 + $0x28] sm:$0xff]   ;;  %s7294_s19 = scalar_lea.vmem %s5408_s4, 256  ;;  %p7299_p12 = scmp.lt.s32.totalorder %s5408_s4, %s5408_s4 }
  0x40   :  { %v6872_v3 = vld [vmem:[#allocation6 + $0xb8] sm:$0xff]   ;;  %6411 = vmatprep.subr.bf16.mxu1 %v6871_v2  ;;  %6391 = vmatprep.subr.bf16.mxu0 %v6873_v4  ;;  %v6876_v7 = vld [vmem:[#allocation6 + $0xb0] sm:$0xff]   ;;  %v6879_v10 = vld [vmem:[#allocation6 + $0xe8] sm:$0xff]   ;;  %p7295_p11 = scmp.ne.s32.totalorder %s5408_s4, %s7294_s19  ;;  %p7300_p13 = scmp.lt.s32.totalorder %s7294_s19, %s7294_s19 }
  0x41   :  { %6412 = vmatpush3.bf16.msra.mxu1 %v6872_v3  ;;  %v6880_v11 = vld [vmem:[#allocation6 + $0xa8] sm:$0xff]   ;;  %v6881_v12 = vld [vmem:[#allocation6 + $0x60] sm:$0xff]   ;;  %v6885_v16 = vld [vmem:[#allocation6 + $0x58] sm:$0xff]  }
  0x42   :  { %6413 = vmatprep.subr.bf16.mxu1 %v6875_v6  ;;  %v6882_v13 = vld [vmem:[#allocation6 + $0x20] sm:$0xff]   ;;  %v6886_v17 = vld [vmem:[#allocation6 + $0x18] sm:$0xff]   ;;  %v6889_v20 = vld [vmem:[#allocation6 + $0x50] sm:$0xff]   ;;  %p7301_p0 = por %p7300_p13, %p7299_p12 }
  0x43   :  { %6392 = vmatpush3.bf16.msra.mxu0 %v6874_v5  ;;  %v6883_v14 = vld [vmem:[#allocation6 + $0xe0] sm:$0xff]   ;;  %v6887_v18 = vld [vmem:[#allocation6 + $0xd8] sm:$0xff]   ;;  %v6890_v21 = vld [vmem:[#allocation6 + $0x10] sm:$0xff]  }
  0x44   :  { %6393 = vmatprep.subr.bf16.mxu0 %v6877_v8  ;;  %v6884_v15 = vld [vmem:[#allocation6 + $0xa0] sm:$0xff]   ;;  %v6888_v19 = vld [vmem:[#allocation6 + $0x98] sm:$0xff]   ;;  %v6891_v22 = vld [vmem:[#allocation6 + $0xd0] sm:$0xff]   ;;  %p7302_p1 = pnand %p7301_p0, %p7295_p11 }
  0x45   :  { %6414 = vmatpush3.bf16.msra.mxu1 %v6876_v7  ;;  %v6892_v23 = vld [vmem:[#allocation6 + $0x90] sm:$0xff]   ;;  %v6893_v24 = vld [vmem:[#allocation6 + $0x48] sm:$0xff]   ;;  %v6897_v28 = vld [vmem:[#allocation6 + $0x40] sm:$0xff]  }
  0x46   :  { %6415 = vmatprep.subr.bf16.mxu1 %v6879_v10  ;;  %v6894_v25 = vld [vmem:[#allocation6 + $0x8] sm:$0xff]   ;;  %v6898_v29 = vld [vmem:[#allocation6] sm:$0xff]   ;;  %v7394_v32 = vld [vmem:[#allocation3] sm:$0xff] }
  0x47   :  { %6394 = vmatpush3.bf16.msra.mxu0 %v6878_v9  ;;  %v6895_v26 = vld [vmem:[#allocation6 + $0xc8] sm:$0xff]   ;;  %v6899_v30 = vld [vmem:[#allocation6 + $0xc0] sm:$0xff]   ;;  %v7396_v33 = vld [vmem:[#allocation3 + $0x8] sm:$0xff]  ;;  %vm92_vm0 = vcmp.ge.f32.partialorder %v7394_v32, -2.2  ;;  %vm114_vm10 = vcmp.lt.f32.partialorder %v7394_v32, -1.0 }
  0x48   :  { %6395 = vmatprep.subr.bf16.mxu0 %v6881_v12  ;;  %v6896_v27 = vld [vmem:[#allocation6 + $0x88] sm:$0xff]   ;;  %v6900_v31 = vld [vmem:[#allocation6 + $0x80] sm:$0xff]   ;;  %vm93_vm1 = vcmp.ge.f32.partialorder %v7396_v33, -2.2  ;;  %vm94_vm2 = vcmp.lt.f32.partialorder %v7394_v32, -1.8 }
  0x49   :  { %6416 = vmatpush3.bf16.msra.mxu1 %v6880_v11  ;;  %vm95_vm3 = vcmp.lt.f32.partialorder %v7396_v33, -1.8  ;;  %vm96_vm4 = vmand %vm92_vm0, %vm94_vm2  ;;  %vm102_vm5 = vcmp.ge.f32.partialorder %v7394_v32, -1.8  ;;  %vm103_vm6 = vcmp.ge.f32.partialorder %v7396_v33, -1.8 }
  0x4a   :  { %6417 = vmatprep.subr.bf16.mxu1 %v6883_v14  ;;  %vm97_vm7 = vmand %vm93_vm1, %vm95_vm3  ;;  %vm104_vm8 = vcmp.lt.f32.partialorder %v7394_v32, -1.4  ;;  %vm105_vm9 = vcmp.lt.f32.partialorder %v7396_v33, -1.4  ;;  %vm112_vm12 = vcmp.ge.f32.partialorder %v7394_v32, -1.4 }
  0x4b   :  { %6396 = vmatpush3.bf16.msra.mxu0 %v6882_v13  ;;  %vm106_vm11 = vmand %vm102_vm5, %vm104_vm8  ;;  %vm113_vm13 = vcmp.ge.f32.partialorder %v7396_v33, -1.4  ;;  %vm115_vm14 = vcmp.lt.f32.partialorder %v7396_v33, -1.0  ;;  %v5421_v35 = vsel %vm96_vm4, 1.0, %v7331_v34  ;;  %v5422_v36 = vsel %vm97_vm7, 1.0, %v7331_v34  ;;  %v6901_v37 = vld [vmem:[#allocation6 + $0x178] sm:$0xff]  }
  0x4c   :  { %6397 = vmatprep.subr.bf16.mxu0 %v6885_v16  ;;  %vm107_vm15 = vmand %vm103_vm6, %vm105_vm9  ;;  %vm122_vm0 = vcmp.ge.f32.partialorder %v7394_v32, -1.0  ;;  %vm124_vm1 = vcmp.lt.f32.partialorder %v7394_v32, -0.6  ;;  %v5423_v38 = vsel %vm106_vm11, 1.0, %v7331_v34  ;;  %vm123_vm3 = vcmp.ge.f32.partialorder %v7396_v33, -1.0  ;;  %v6903_v56 = vld [vmem:[#allocation6 + $0x1f8] sm:$0xff]  }
  0x4d   :  { %6418 = vmatpush3.bf16.msra.mxu1 %v6884_v15  ;;  %vm116_vm2 = vmand %vm112_vm12, %vm114_vm10  ;;  %vm125_vm5 = vcmp.lt.f32.partialorder %v7396_v33, -0.6  ;;  %v7418_v39 = vmul.f32 2.5, %v7394_v32  ;;  %v5424_v40 = vsel %vm107_vm15, 1.0, %v7331_v34  ;;  %vm133_vm6 = vcmp.ge.f32.partialorder %v7396_v33, -0.6 }
  0x4e   :  { %6419 = vmatprep.subr.bf16.mxu1 %v6887_v18  ;;  %vm117_vm4 = vmand %vm113_vm13, %vm115_vm14  ;;  %vm135_vm7 = vcmp.lt.f32.partialorder %v7396_v33, -0.2  ;;  %v7426_v41 = vmul.f32 2.5, %v7396_v33  ;;  %v5425_v42 = vsel %vm116_vm2, 1.0, %v7331_v34  ;;  %v7434_v45 = vmul.f32 1.25, %v7394_v32 }
  0x4f   :  { %6398 = vmatpush3.bf16.msra.mxu0 %v6886_v17  ;;  %vm126_vm8 = vmand %vm122_vm0, %vm124_vm1  ;;  %v5443_v43 = vadd.f32 5.5, %v7418_v39  ;;  %v5445_v44 = vadd.f32 4.5, %v7418_v39  ;;  %v5426_v46 = vsel %vm117_vm4, 1.0, %v7331_v34  ;;  %v5447_v51 = vadd.f32 3.5, %v7418_v39 }
  0x50   :  { %6399 = vmatprep.subr.bf16.mxu0 %v6889_v20  ;;  %vm127_vm9 = vmand %vm123_vm3, %vm125_vm5  ;;  %v5444_v47 = vadd.f32 5.5, %v7426_v41  ;;  %v5446_v48 = vadd.f32 4.5, %v7426_v41  ;;  %v5448_v49 = vadd.f32 3.5, %v7426_v41  ;;  %v7443_v50 = vsel %vm126_vm8, 1.0, %v7331_v34 }
  0x51   :  { %6420 = vmatpush3.bf16.msra.mxu1 %v6888_v19  ;;  %v5428_v52 = vsel %vm127_vm9, 1.0, %v7331_v34  ;;  %vm137_vm10 = vmand %vm133_vm6, %vm135_vm7  ;;  %v208_v54 = vsub.f32 2.0, %v5443_v43  ;;  %v206_v57 = vmul.f32 %v5443_v43, %v5421_v35  ;;  %v218_v58 = vsub.f32 2.0, %v5445_v44 }
  0x52   :  { %6421 = vmatprep.subr.bf16.mxu1 %v6891_v22  ;;  %v207_v53 = vmul.f32 %v5444_v47, %v5422_v36  ;;  %v209_v55 = vsub.f32 2.0, %v5444_v47  ;;  %v219_v59 = vsub.f32 2.0, %v5446_v48  ;;  %v216_v61 = vmul.f32 %v5445_v44, %v5423_v38 }
  0x53   :  { %6400 = vmatpush3.bf16.msra.mxu0 %v6890_v21  ;;  %v217_v62 = vmul.f32 %v5446_v48, %v5424_v40  ;;  %v229_v63 = vsub.f32 2.0, %v5448_v49  ;;  %v7452_v0 = vsel %vm137_vm10, 1.0, %v7331_v34  ;;  %v227_v2 = vmul.f32 %v5448_v49, %v5426_v46 }
  0x54   :  { %6401 = vmatprep.subr.bf16.mxu0 %v6893_v24  ;;  %v211_v60 = vmul.f32 %v5424_v40, %v209_v55  ;;  %v221_v1 = vmul.f32 %v5426_v46, %v219_v59  ;;  %v5450_v3 = vadd.f32 2.5, %v7426_v41  ;;  %v228_v5 = vsub.f32 2.0, %v5447_v51 }
  0x55   :  { %6422 = vmatpush3.bf16.msra.mxu1 %v6892_v23  ;;  %v231_v6 = vmul.f32 %v5428_v52, %v229_v63  ;;  %v7456_v7 = vmul.f32 1.25, %v7396_v33  ;;  %v210_v8 = vmul.f32 %v5423_v38, %v208_v54  ;;  %v220_v9 = vmul.f32 %v5425_v42, %v218_v58 }
  0x56   :  { %6423 = vmatprep.subr.bf16.mxu1 %v6895_v26  ;;  %v213_v4 = vadd.f32 %v211_v60, %v207_v53  ;;  %v237_v10 = vmul.f32 %v5450_v3, %v5428_v52  ;;  %v239_v11 = vsub.f32 2.0, %v5450_v3  ;;  %v223_v12 = vadd.f32 %v221_v1, %v217_v62 }
  0x57   :  { %6402 = vmatpush3.bf16.msra.mxu0 %v6894_v25  ;;  %v5463_v13 = vadd.f32 2.75, %v7434_v45  ;;  %v5464_v14 = vadd.f32 2.75, %v7456_v7  ;;  %v233_v15 = vadd.f32 %v231_v6, %v227_v2  ;;  %v5466_v17 = vadd.f32 2.25, %v7456_v7 }
  0x58   :  { %6403 = vmatprep.subr.bf16.mxu0 %v6897_v28  ;;  %v241_v16 = vmul.f32 %v7452_v0, %v239_v11  ;;  %v5468_v18 = vadd.f32 1.75, %v7456_v7  ;;  %v226_v19 = vmul.f32 %v5447_v51, %v5425_v42  ;;  %v230_v20 = vmul.f32 %v7443_v50, %v228_v5 }
  0x59   :  { %6424 = vmatpush3.bf16.msra.mxu1 %v6896_v27  ;;  %v309_v21 = vmul.f32 %v5464_v14, %v213_v4  ;;  %v311_v22 = vsub.f32 1.5, %v5464_v14  ;;  %v212_v23 = vadd.f32 %v210_v8, %v206_v57  ;;  %v222_v24 = vadd.f32 %v220_v9, %v216_v61 }
  0x5a   :  { %6425 = vmatprep.subr.bf16.mxu1 %v6899_v30  ;;  %v7464_v25 = vadd.f32 %v241_v16, %v237_v10  ;;  %v5465_v26 = vadd.f32 2.25, %v7434_v45  ;;  %v310_v27 = vsub.f32 1.5, %v5463_v13  ;;  %v321_v30 = vsub.f32 1.5, %v5466_v17 }
  0x5b   :  { %6404 = vmatpush3.bf16.msra.mxu0 %v6898_v29  ;;  %v313_v28 = vmul.f32 %v311_v22, %v223_v12  ;;  %v319_v29 = vmul.f32 %v5466_v17, %v223_v12  ;;  %v331_v35 = vsub.f32 1.5, %v5468_v18  ;;  %v7468_v36 = vmul.f32 0.8333333, %v7394_v32 }
  0x5c   :  { %6433 = vmatprep.subr.bf16.mxu0 %v6901_v37  ;;  %v7471_v37 = vmul.f32 0.8333333, %v7396_v33  ;;  %v7473_v38 = vadd.f32 %v230_v20, %v226_v19  ;;  %v323_v42 = vmul.f32 %v321_v30, %v233_v15  ;;  %v5497_v43 = vmul.f32 -1.442695, %v7394_v32 }
  0x5d   :  { %6426 = vmatpush3.bf16.msra.mxu1 %v6900_v31  ;;  %v329_v31 = vmul.f32 %v5468_v18, %v233_v15  ;;  %v315_v40 = vadd.f32 %v313_v28, %v309_v21  ;;  %v308_v44 = vmul.f32 %v5463_v13, %v212_v23  ;;  %v320_v46 = vsub.f32 1.5, %v5465_v26 }
  0x5e   :  { %6455 = vmatprep.subr.bf16.mxu1 %v6903_v56  ;;  %v333_v47 = vmul.f32 %v331_v35, %v7464_v25  ;;  %v5482_v48 = vadd.f32 1.8333334, %v7471_v37  ;;  %v325_v49 = vadd.f32 %v323_v42, %v319_v29  ;;  %v5484_v51 = vadd.f32 1.5, %v7471_v37 }
  0x5f   :  { %7161 = vpow2.f32 %v5497_v43  ;;  %v5498_v52 = vmul.f32 -1.442695, %v7396_v33  ;;  %v312_v53 = vmul.f32 %v310_v27, %v222_v24  ;;  %v5481_v55 = vadd.f32 1.8333334, %v7468_v36 }
  0x60   :  { %v7480_v54 = vadd.f32 %v333_v47, %v329_v31  ;;  %v401_v56 = vmul.f32 %v5482_v48, %v315_v40  ;;  %v403_v57 = vsub.f32 1.3333334, %v5482_v48  ;;  %v411_v58 = vmul.f32 %v5484_v51, %v325_v49 }
  0x61   :  { %v413_v59 = vsub.f32 1.3333334, %v5484_v51  ;;  %7163 = vpow2.f32 %v5498_v52  ;;  %v318_v60 = vmul.f32 %v5465_v26, %v222_v24  ;;  %vm132_vm11 = vcmp.ge.f32.partialorder %v7394_v32, -0.6 }
  0x62   :  { %vm134_vm12 = vcmp.lt.f32.partialorder %v7394_v32, -0.2  ;;  %vm142_vm13 = vcmp.ge.f32.partialorder %v7394_v32, -0.2  ;;  %v405_v61 = vmul.f32 %v403_v57, %v325_v49  ;;  %vm143_vm15 = vcmp.ge.f32.partialorder %v7396_v33, -0.2 }
  0x63   :  { %v415_v62 = vmul.f32 %v413_v59, %v7480_v54  ;;  %vm136_vm14 = vmand %vm132_vm11, %vm134_vm12  ;;  %vm144_vm0 = vcmp.lt.f32.partialorder %v7394_v32, 0.2  ;;  %v314_v63 = vadd.f32 %v312_v53, %v308_v44  ;;  %v322_v1 = vmul.f32 %v320_v46, %v7473_v38 }
  0x64   :  { %vm145_vm1 = vcmp.lt.f32.partialorder %v7396_v33, 0.2  ;;  %vm146_vm2 = vmand %vm142_vm13, %vm144_vm0  ;;  %vm153_vm3 = vcmp.ge.f32.partialorder %v7396_v33, 0.2  ;;  %v402_v2 = vsub.f32 1.3333334, %v5481_v55  ;;  %v407_v3 = vadd.f32 %v405_v61, %v401_v56 }
  0x65   :  { %v417_v4 = vadd.f32 %v415_v62, %v411_v58  ;;  %vm147_vm5 = vmand %vm143_vm15, %vm145_vm1  ;;  %vm155_vm4 = vcmp.lt.f32.partialorder %v7396_v33, 0.6  ;;  %v5429_v5 = vsel %vm136_vm14, 1.0, %v7331_v34  ;;  %v5449_v6 = vadd.f32 2.5, %v7418_v39 }
  0x66   :  { %vm157_vm6 = vmand %vm153_vm3, %vm155_vm4  ;;  %v5451_v8 = vadd.f32 1.5, %v7418_v39  ;;  %v5452_v9 = vadd.f32 1.5, %v7426_v41  ;;  %v7498_v11 = vsel %vm146_vm2, 1.0, %v7331_v34  ;;  %v5432_v12 = vsel %vm147_vm5, 1.0, %v7331_v34 }
  0x67   :  { %v6209_v10 = vpack.c.bf16 %v417_v4, %v407_v3  ;;  %v5454_v13 = vadd.f32 0.5, %v7426_v41  ;;  %v324_v14 = vadd.f32 %v322_v1, %v318_v60  ;;  %v7503_v15 = vsel %vm157_vm6, 1.0, %v7331_v34 }
  0x68   :  { %v236_v16 = vmul.f32 %v5449_v6, %v7443_v50  ;;  %v238_v17 = vsub.f32 2.0, %v5449_v6  ;;  %v246_v18 = vmul.f32 %v5451_v8, %v5429_v5  ;;  %v247_v19 = vmul.f32 %v5452_v9, %v7452_v0 }
  0x69   :  { %6361 = vst [vmem:[#allocation2 + $0x28] sm:$0xff] %v6209_v10   ;;  %v248_v20 = vsub.f32 2.0, %v5451_v8  ;;  %v249_v21 = vsub.f32 2.0, %v5452_v9  ;;  %v257_v23 = vmul.f32 %v5454_v13, %v5432_v12  ;;  %v259_v24 = vsub.f32 2.0, %v5454_v13 }
  0x6a   :  { %v240_v22 = vmul.f32 %v5429_v5, %v238_v17  ;;  %v5467_v26 = vadd.f32 1.75, %v7434_v45  ;;  %v5469_v29 = vadd.f32 1.25, %v7434_v45  ;;  %v5470_v30 = vadd.f32 1.25, %v7456_v7 }
  0x6b   :  { %v250_v27 = vmul.f32 %v7498_v11, %v248_v20  ;;  %v251_v28 = vmul.f32 %v5432_v12, %v249_v21  ;;  %v400_v31 = vmul.f32 %v5481_v55, %v314_v63  ;;  %v404_v35 = vmul.f32 %v402_v2, %v324_v14 }
  0x6c   :  { %v7162_v50 = vpop.eup %7161  ;;  %v242_v40 = vadd.f32 %v240_v22, %v236_v16  ;;  %v261_v0 = vmul.f32 %v7503_v15, %v259_v24  ;;  %v328_v44 = vmul.f32 %v5467_v26, %v7473_v38  ;;  %v330_v46 = vsub.f32 1.5, %v5467_v26 }
  0x6d   :  { %v7512_v42 = vadd.f32 %v250_v27, %v246_v18  ;;  %v253_v43 = vadd.f32 %v251_v28, %v247_v19  ;;  %v484_v48 = vadd.f32 1.0, %v7162_v50  ;;  %v340_v52 = vsub.f32 1.5, %v5469_v29 }
  0x6e   :  { %v7164_v47 = vpop.eup %7163  ;;  %v7515_v49 = vadd.f32 %v261_v0, %v257_v23  ;;  %v338_v51 = vmul.f32 %v5469_v29, %v242_v40  ;;  %v332_v56 = vmul.f32 %v330_v46, %v242_v40  ;;  %v339_v55 = vmul.f32 %v5470_v30, %v7464_v25 }
  0x6f   :  { %v485_v53 = vadd.f32 1.0, %v7164_v47  ;;  %v341_v57 = vsub.f32 1.5, %v5470_v30  ;;  %v342_v58 = vmul.f32 %v340_v52, %v7512_v42  ;;  %v5472_v59 = vadd.f32 0.75, %v7456_v7 }
  0x70   :  { %v5483_v60 = vadd.f32 1.5, %v7468_v36  ;;  %v5485_v38 = vadd.f32 1.1666666, %v7468_v36  ;;  %v334_v61 = vadd.f32 %v332_v56, %v328_v44  ;;  %v5486_v63 = vadd.f32 1.1666666, %v7471_v37 }
  0x71   :  { %7165 = vrcp.f32 %v485_v53  ;;  %v343_v62 = vmul.f32 %v341_v57, %v253_v43  ;;  %v7523_v1 = vadd.f32 %v342_v58, %v338_v51  ;;  %v349_v2 = vmul.f32 %v5472_v59, %v253_v43 }
  0x72   :  { %7167 = vrcp.f32 %v484_v48  ;;  %v351_v3 = vsub.f32 1.5, %v5472_v59  ;;  %v410_v4 = vmul.f32 %v5483_v60, %v324_v14  ;;  %v412_v5 = vsub.f32 1.3333334, %v5483_v60 }
  0x73   :  { %v345_v25 = vadd.f32 %v343_v62, %v339_v55  ;;  %v421_v6 = vmul.f32 %v5486_v63, %v7480_v54  ;;  %v422_v9 = vsub.f32 1.3333334, %v5485_v38  ;;  %v423_v10 = vsub.f32 1.3333334, %v5486_v63 }
  0x74   :  { %v353_v8 = vmul.f32 %v351_v3, %v7515_v49  ;;  %v5488_v12 = vadd.f32 0.8333333, %v7471_v37  ;;  %v7528_v13 = vadd.f32 %v404_v35, %v400_v31  ;;  %v5453_v16 = vadd.f32 0.5, %v7418_v39 }
  0x75   :  { %v414_v17 = vmul.f32 %v412_v5, %v334_v61  ;;  %v420_v19 = vmul.f32 %v5485_v38, %v334_v61  ;;  %v424_v20 = vmul.f32 %v422_v9, %v7523_v1  ;;  %v425_v14 = vmul.f32 %v423_v10, %v345_v25 }
  0x76   :  { %v7531_v18 = vadd.f32 %v353_v8, %v349_v2  ;;  %v5456_v21 = vadd.f32 -0.5, %v7426_v41  ;;  %v431_v54 = vmul.f32 %v5488_v12, %v345_v25  ;;  %v433_v22 = vsub.f32 1.3333334, %v5488_v12 }
  0x77   :  { %vm164_vm7 = vcmp.lt.f32.partialorder %v7394_v32, 1.0  ;;  %v256_v23 = vmul.f32 %v5453_v16, %v7498_v11  ;;  %v416_v24 = vadd.f32 %v414_v17, %v410_v4  ;;  %v427_v26 = vadd.f32 %v425_v14, %v421_v6  ;;  %v6904_v14 = vld [vmem:[#allocation6 + $0x1b8] sm:$0xff]  }
  0x78   :  { %vm152_vm8 = vcmp.ge.f32.partialorder %v7394_v32, 0.2  ;;  %v435_v27 = vmul.f32 %v433_v22, %v7531_v18  ;;  %vm154_vm9 = vcmp.lt.f32.partialorder %v7394_v32, 0.6  ;;  %vm162_vm10 = vcmp.ge.f32.partialorder %v7394_v32, 0.6 }
  0x79   :  { %vm163_vm11 = vcmp.ge.f32.partialorder %v7396_v33, 0.6  ;;  %v426_v28 = vadd.f32 %v424_v20, %v420_v19  ;;  %vm156_vm12 = vmand %vm152_vm8, %vm154_vm9  ;;  %vm165_vm13 = vcmp.lt.f32.partialorder %v7396_v33, 1.0  ;;  %vm173_vm14 = vcmp.ge.f32.partialorder %v7396_v33, 1.0 }
  0x7a   :  { %vm175_vm15 = vcmp.lt.f32.partialorder %v7396_v33, 1.4  ;;  %v437_v11 = vadd.f32 %v435_v27, %v431_v54  ;;  %v5433_v29 = vsel %vm156_vm12, 1.0, %v7331_v34  ;;  %vm166_vm0 = vmand %vm162_vm10, %vm164_vm7  ;;  %v258_v30 = vsub.f32 2.0, %v5453_v16 }
  0x7b   :  { %v5455_v50 = vadd.f32 -0.5, %v7418_v39  ;;  %v267_v31 = vmul.f32 %v5456_v21, %v7503_v15  ;;  %vm167_vm1 = vmand %vm163_vm11, %vm165_vm13  ;;  %v7551_v35 = vsel %vm166_vm0, 1.0, %v7331_v34  ;;  %v269_v40 = vsub.f32 2.0, %v5456_v21 }
  0x7c   :  { %v5458_v0 = vadd.f32 -1.5, %v7426_v41  ;;  %v6219_v43 = vpack.c.bf16 %v437_v11, %v427_v26  ;;  %v5436_v44 = vsel %vm167_vm1, 1.0, %v7331_v34  ;;  %vm177_vm2 = vmand %vm173_vm14, %vm175_vm15  ;;  %v260_v46 = vmul.f32 %v5433_v29, %v258_v30  ;;  %v6907_v26 = vld [vmem:[#allocation6 + $0x1f0] sm:$0xff]  }
  0x7d   :  { %v5471_v47 = vadd.f32 0.75, %v7434_v45  ;;  %v6214_v51 = vpack.c.bf16 %v426_v28, %v416_v24  ;;  %v266_v52 = vmul.f32 %v5455_v50, %v5433_v29  ;;  %v268_v53 = vsub.f32 2.0, %v5455_v50 }
  0x7e   :  { %v7166_v48 = vpop.eup %7165  ;;  %v271_v56 = vmul.f32 %v5436_v44, %v269_v40  ;;  %6363 = vst [vmem:[#allocation2 + $0x30] sm:$0xff] %v6219_v43   ;;  %v7558_v57 = vsel %vm177_vm2, 1.0, %v7331_v34  ;;  %v262_v58 = vadd.f32 %v260_v46, %v256_v23  ;;  %v277_v59 = vmul.f32 %v5458_v0, %v5436_v44  ;;  %v6902_v43 = vld [vmem:[#allocation6 + $0x138] sm:$0xff]   ;;  %v6908_v44 = vld [vmem:[#allocation6 + $0x1b0] sm:$0xff]  }
  0x7f   :  { %v7168_v15 = vpop.eup %7167  ;;  %v491_v55 = vmul.f32 %v7166_v48, %v7396_v33  ;;  %v270_v60 = vmul.f32 %v7551_v35, %v268_v53  ;;  %v279_v61 = vsub.f32 2.0, %v5458_v0  ;;  %v348_v62 = vmul.f32 %v5471_v47, %v7512_v42 }
  0x80   :  { %v273_v38 = vadd.f32 %v271_v56, %v267_v31  ;;  %v350_v2 = vsub.f32 1.5, %v5471_v47  ;;  %v5473_v3 = vadd.f32 0.25, %v7434_v45  ;;  %v5474_v25 = vadd.f32 0.25, %v7456_v7  ;;  %v6905_v56 = vld [vmem:[#allocation6 + $0x170] sm:$0xff]  }
  0x81   :  { %v6130_v63 = vpack.c.bf16 %v491_v55, %v491_v55  ;;  %v7564_v4 = vadd.f32 %v270_v60, %v266_v52  ;;  %v281_v5 = vmul.f32 %v7558_v57, %v279_v61  ;;  %v5476_v6 = vadd.f32 -0.25, %v7456_v7 }
  0x82   :  { %v5487_v8 = vadd.f32 0.8333333, %v7468_v36  ;;  %v490_v9 = vmul.f32 %v7168_v15, %v7394_v32  ;;  %v352_v10 = vmul.f32 %v350_v2, %v262_v58  ;;  %v358_v12 = vmul.f32 %v5473_v3, %v262_v58 }
  0x83   :  { %501 = vst [vmem:[#allocation2 + $0x24] sm:$0xf] %v6130_v63  ;;  %v360_v42 = vsub.f32 1.5, %v5473_v3  ;;  %v7570_v16 = vadd.f32 %v281_v5, %v277_v59  ;;  %v359_v17 = vmul.f32 %v5474_v25, %v7515_v49  ;;  %v361_v19 = vsub.f32 1.5, %v5474_v25  ;;  %v6912_v63 = vld [vmem:[#allocation6 + $0x1a8] sm:$0xff]   ;;  %v6915_v5 = vld [vmem:[#allocation6 + $0x1e0] sm:$0xff]  }
  0x84   :  { %v371_v20 = vsub.f32 1.5, %v5476_v6  ;;  %v354_v21 = vadd.f32 %v352_v10, %v348_v62  ;;  %v369_v22 = vmul.f32 %v5476_v6, %v273_v38  ;;  %v432_v23 = vsub.f32 1.3333334, %v5487_v8  ;;  %v6909_v62 = vld [vmem:[#allocation6 + $0x168] sm:$0xff]  }
  0x85   :  { %v362_v54 = vmul.f32 %v360_v42, %v7564_v4  ;;  %v588_v24 = vld [vmem:[#allocation2 + $0x2c] sm:$0xff]  ;;  %v363_v27 = vmul.f32 %v361_v19, %v273_v38  ;;  %v5489_v11 = vadd.f32 0.5, %v7468_v36  ;;  %v5490_v29 = vadd.f32 0.5, %v7471_v37  ;;  %v6910_v19 = vld [vmem:[#allocation6 + $0x128] sm:$0xff]  }
  0x86   :  { %v373_v28 = vmul.f32 %v371_v20, %v7570_v16  ;;  %v6204_v30 = vpack.c.bf16 %v7528_v13, %v490_v9  ;;  %v5520_v49 = vcombine.high %v6214_v51, %v588_v24  ;;  %v5519_v50 = vcombine.low %v6214_v51, %v588_v24  ;;  %v6906_v38 = vld [vmem:[#allocation6 + $0x130] sm:$0xff]   ;;  %v6916_v24 = vld [vmem:[#allocation6 + $0x1a0] sm:$0xff]  }
  0x87   :  { %v7578_v31 = vadd.f32 %v362_v54, %v358_v12  ;;  %v365_v40 = vadd.f32 %v363_v27, %v359_v17  ;;  %v430_v0 = vmul.f32 %v5487_v8, %v7523_v1  ;;  %v434_v46 = vmul.f32 %v432_v23, %v354_v21  ;;  %v6913_v23 = vld [vmem:[#allocation6 + $0x160] sm:$0xff]  }
  0x88   :  { %1287 = vmatprep.mubr.bf16.mxu1 %v5520_v49  ;;  %v441_v47 = vmul.f32 %v5490_v29, %v7531_v18  ;;  %v443_v48 = vsub.f32 1.3333334, %v5490_v29  ;;  %v5492_v52 = vadd.f32 0.16666667, %v7471_v37  ;;  %v7583_v13 = vadd.f32 %v373_v28, %v369_v22  ;;  %v6911_v18 = vld [vmem:[#allocation6 + $0x1e8] sm:$0xff]   ;;  %v6919_v29 = vld [vmem:[#allocation6 + $0x1d8] sm:$0xff]  }
  0x89   :  { %1288 = vmatmul.mubr.bf16.vlgmr.msra.gmra.mxu1 %v5519_v50  ;;  %v442_v51 = vsub.f32 1.3333334, %v5489_v11  ;;  %vm172_vm3 = vcmp.ge.f32.partialorder %v7394_v32, 1.0  ;;  %vm174_vm5 = vcmp.lt.f32.partialorder %v7394_v32, 1.4  ;;  %v5457_v25 = vadd.f32 -1.5, %v7418_v39 }
  0x8a   :  { %v587_v53 = vld [vmem:[#allocation2 + $0x24] sm:$0xff]  ;;  %6456 = vmatpush3.bf16.msra.mxu1 %v6904_v14  ;;  %v445_v55 = vmul.f32 %v443_v48, %v365_v40  ;;  %vm176_vm4 = vmand %vm172_vm3, %vm174_vm5  ;;  %vm182_vm6 = vcmp.ge.f32.partialorder %v7394_v32, 1.4  ;;  %v451_v58 = vmul.f32 %v5492_v52, %v365_v40  ;;  %v453_v59 = vsub.f32 1.3333334, %v5492_v52 }
  0x8b   :  { %v5518_v1 = vcombine.high %v6204_v30, %v587_v53  ;;  %v5517_v15 = vcombine.low %v6204_v30, %v587_v53  ;;  %6457 = vmatprep.subr.bf16.mxu1 %v6907_v26  ;;  %v5437_v60 = vsel %vm176_vm4, 1.0, %v7331_v34  ;;  %vm183_vm7 = vcmp.ge.f32.partialorder %v7396_v33, 1.4  ;;  %v6922_v14 = vld [vmem:[#allocation6 + $0x110] sm:$0xff]  }
  0x8c   :  { %v447_v61 = vadd.f32 %v445_v55, %v441_v47  ;;  %vm184_vm8 = vcmp.lt.f32.partialorder %v7394_v32, 1.8  ;;  %vm185_vm9 = vcmp.lt.f32.partialorder %v7396_v33, 1.8  ;;  %v455_v2 = vmul.f32 %v453_v59, %v7583_v13  ;;  %v6914_v47 = vld [vmem:[#allocation6 + $0x120] sm:$0xff]  }
  0x8d   :  { %1246 = vmatprep.mubr.bf16.mxu0 %v5518_v1  ;;  %vm7595_vm10 = vmand %vm182_vm6, %vm184_vm8  ;;  %vm193_vm11 = vcmp.ge.f32.partialorder %v7396_v33, 1.8  ;;  %vm195_vm12 = vcmp.lt.f32.partialorder %v7396_v33, 2.2  ;;  %v436_v6 = vadd.f32 %v434_v46, %v430_v0  ;;  %v440_v8 = vmul.f32 %v5489_v11, %v354_v21 }
  0x8e   :  { %1247 = vmatmul.mubr.bf16.vlgmr.msra.gmra.mxu0 %v5517_v15  ;;  %6458 = vmatpush3.bf16.msra.mxu1 %v6908_v44  ;;  %vm187_vm13 = vmand %vm183_vm7, %vm185_vm9  ;;  %v5459_v32 = vadd.f32 -2.5, %v7418_v39  ;;  %v5460_v9 = vadd.f32 -2.5, %v7426_v41  ;;  %v444_v10 = vmul.f32 %v442_v51, %v7578_v31  ;;  %v457_v12 = vadd.f32 %v455_v2, %v451_v58  ;;  %v6923_v58 = vld [vmem:[#allocation6 + $0x1d0] sm:$0xff]  }
  0x8f   :  { %6434 = vmatpush3.bf16.msra.mxu0 %v6902_v43  ;;  %6459 = vmatprep.subr.bf16.mxu1 %v6911_v18  ;;  %v7610_v42 = vsel %vm7595_vm10, 1.0, %v7331_v34  ;;  %v278_v17 = vsub.f32 2.0, %v5457_v25  ;;  %v5440_v20 = vsel %vm187_vm13, 1.0, %v7331_v34  ;;  %vm7617_vm14 = vmand %vm193_vm11, %vm195_vm12  ;;  %v276_v21 = vmul.f32 %v5457_v25, %v7551_v35  ;;  %v6917_v18 = vld [vmem:[#allocation6 + $0x158] sm:$0xff]   ;;  %v6921_v25 = vld [vmem:[#allocation6 + $0x150] sm:$0xff]  }
  0x90   :  { %6435 = vmatprep.subr.bf16.mxu0 %v6905_v56  ;;  %v286_v54 = vmul.f32 %v5459_v32, %v5437_v60  ;;  %v288_v22 = vsub.f32 2.0, %v5459_v32  ;;  %v6229_v26 = vpack.c.bf16 %v457_v12, %v447_v61  ;;  %v287_v28 = vmul.f32 %v5460_v9, %v7558_v57  ;;  %v6920_v56 = vld [vmem:[#allocation6 + $0x198] sm:$0xff]  }
  0x91   :  { %v280_v27 = vmul.f32 %v5437_v60, %v278_v17  ;;  %v289_v11 = vsub.f32 2.0, %v5460_v9  ;;  %v5462_v30 = vadd.f32 -3.5, %v7426_v41  ;;  %v5475_v49 = vadd.f32 -0.25, %v7434_v45  ;;  %v6918_v61 = vld [vmem:[#allocation6 + $0x118] sm:$0xff]  }
  0x92   :  { %6460 = vmatpush3.bf16.msra.mxu1 %v6912_v63  ;;  %v290_v33 = vmul.f32 %v7610_v42, %v288_v22  ;;  %v5477_v35 = vadd.f32 -0.75, %v7434_v45  ;;  %v446_v50 = vadd.f32 %v444_v10, %v440_v8  ;;  %6365 = vst [vmem:[#allocation2 + $0x38] sm:$0xff] %v6229_v26   ;;  %v5442_v57 = vsel %vm7617_vm14, 1.0, %v7331_v34  ;;  %v6931_v26 = vld [vmem:[#allocation6 + $0x1c0] sm:$0xff]  }
  0x93   :  { %6436 = vmatpush3.bf16.msra.mxu0 %v6906_v38  ;;  %6461 = vmatprep.subr.bf16.mxu1 %v6915_v5  ;;  %v291_v40 = vmul.f32 %v5440_v20, %v289_v11  ;;  %v5478_v0 = vadd.f32 -0.75, %v7456_v7  ;;  %v282_v43 = vadd.f32 %v280_v27, %v276_v21  ;;  %v297_v44 = vmul.f32 %v5462_v30, %v5440_v20  ;;  %v6928_v21 = vld [vmem:[#allocation6 + $0x188] sm:$0xff]  }
  0x94   :  { %6437 = vmatprep.subr.bf16.mxu0 %v6909_v62  ;;  %v299_v46 = vsub.f32 2.0, %v5462_v30  ;;  %v7631_v41 = vadd.f32 %v290_v33, %v286_v54  ;;  %v370_v52 = vsub.f32 1.5, %v5475_v49  ;;  %v380_v1 = vsub.f32 1.5, %v5477_v35 }
  0x95   :  { %v293_v48 = vadd.f32 %v291_v40, %v287_v28  ;;  %v379_v53 = vmul.f32 %v5478_v0, %v7570_v16  ;;  %v381_v15 = vsub.f32 1.5, %v5478_v0  ;;  %v5480_v55 = vadd.f32 -1.25, %v7456_v7  ;;  %v6924_v16 = vld [vmem:[#allocation6 + $0x190] sm:$0xff]  }
  0x96   :  { %6462 = vmatpush3.bf16.msra.mxu1 %v6916_v24  ;;  %v301_v51 = vmul.f32 %v5442_v57, %v299_v46  ;;  %v7635_v59 = vpack.c.bf16 %v446_v50, %v436_v6  ;;  %v5491_v60 = vadd.f32 0.16666667, %v7468_v36  ;;  %v5494_v38 = vadd.f32 -0.16666667, %v7471_v37  ;;  %v6927_v6 = vld [vmem:[#allocation6 + $0x1c8] sm:$0xff]   ;;  %v6932_v57 = vld [vmem:[#allocation6 + $0x180] sm:$0xff]  }
  0x97   :  { %6438 = vmatpush3.bf16.msra.mxu0 %v6910_v19  ;;  %6463 = vmatprep.subr.bf16.mxu1 %v6919_v29  ;;  %v368_v63 = vmul.f32 %v5475_v49, %v7564_v4  ;;  %v372_v2 = vmul.f32 %v370_v52, %v282_v43  ;;  %v383_v3 = vmul.f32 %v381_v15, %v293_v48  ;;  %v5461_v7 = vadd.f32 -3.5, %v7418_v39  ;;  %v6925_v24 = vld [vmem:[#allocation6 + $0x148] sm:$0xff]   ;;  %v7193_v29 = vld [vmem:[#allocation3] sm:$0xff]  ;;  %v6929_v46 = vld [vmem:[#allocation6 + $0x140] sm:$0xff]  }
  0x98   :  { %6439 = vmatprep.subr.bf16.mxu0 %v6913_v23  ;;  %v303_v62 = vadd.f32 %v301_v51, %v297_v44  ;;  %v389_v5 = vmul.f32 %v5480_v55, %v293_v48  ;;  %v391_v8 = vsub.f32 1.5, %v5480_v55  ;;  %v5493_v32 = vadd.f32 -0.16666667, %v7468_v36  ;;  %v6926_v50 = vld [vmem:[#allocation6 + $0x108] sm:$0xff]  }
  0x99   :  { %v7642_v9 = vld [vmem:[#allocation2 + $0x34] sm:$0xff]  ;;  %v378_v10 = vmul.f32 %v5477_v35, %v282_v43  ;;  %v382_v12 = vmul.f32 %v380_v1, %v7631_v41  ;;  %v385_v17 = vadd.f32 %v383_v3, %v379_v53  ;;  %v452_v19 = vsub.f32 1.3333334, %v5491_v60 }
  0x9a   :  { %6464 = vmatpush3.bf16.msra.mxu1 %v6920_v56  ;;  %v5522_v4 = vcombine.high %v7635_v59, %v7642_v9  ;;  %v393_v39 = vmul.f32 %v391_v8, %v303_v62  ;;  %v463_v20 = vsub.f32 1.3333334, %v5494_v38  ;;  %v374_v54 = vadd.f32 %v372_v2, %v368_v63  ;;  %v6934_v2 = vld [vmem:[#allocation6 + $0x230] sm:$0xff]   ;;  %v6936_v8 = vld [vmem:[#allocation6 + $0x220] sm:$0xff]  }
  0x9b   :  { %6440 = vmatpush3.bf16.msra.mxu0 %v6914_v47  ;;  %6465 = vmatprep.subr.bf16.mxu1 %v6923_v58  ;;  %v461_v22 = vmul.f32 %v5494_v38, %v7583_v13  ;;  %v5496_v23 = vadd.f32 -0.5, %v7471_v37  ;;  %v462_v28 = vsub.f32 1.3333334, %v5493_v32  ;;  %vm192_vm15 = vcmp.ge.f32.partialorder %v7193_v29, 1.8 }
  0x9c   :  { %6441 = vmatprep.subr.bf16.mxu0 %v6917_v18  ;;  %1328 = vmatprep.mubr.bf16.mxu0 %v5522_v4  ;;  %v395_v27 = vadd.f32 %v393_v39, %v389_v5  ;;  %v465_v11 = vmul.f32 %v463_v20, %v385_v17  ;;  %v384_v33 = vadd.f32 %v382_v12, %v378_v10  ;;  %vm194_vm0 = vcmp.lt.f32.partialorder %v7193_v29, 2.2  ;;  %v6940_v10 = vld [vmem:[#allocation6 + $0x200] sm:$0xff]   ;;  %v6944_v4 = vld [vmem:[#allocation8 + $0xf0] sm:$0xff]   ;;  %v6950_v20 = vld [vmem:[#allocation8 + $0x78] sm:$0xff]  }
  0x9d   :  { %v471_v30 = vmul.f32 %v5496_v23, %v385_v17  ;;  %v473_v49 = vsub.f32 1.3333334, %v5496_v23  ;;  %v296_v35 = vmul.f32 %v5461_v7, %v7610_v42  ;;  %v298_v13 = vsub.f32 2.0, %v5461_v7  ;;  %vm196_vm1 = vmand %vm192_vm15, %vm194_vm0  ;;  %v6942_v17 = vld [vmem:[#allocation8 + $0xf8] sm:$0xff]   ;;  %v6945_v39 = vld [vmem:[#allocation8 + $0xb0] sm:$0xff]  }
  0x9e   :  { %6466 = vmatpush3.bf16.msra.mxu1 %v6924_v16  ;;  %v5479_v37 = vadd.f32 -1.25, %v7434_v45  ;;  %v450_v40 = vmul.f32 %v5491_v60, %v7578_v31  ;;  %v467_v0 = vadd.f32 %v465_v11, %v461_v22  ;;  %v5495_v44 = vadd.f32 -0.5, %v7468_v36  ;;  %v6930_v31 = vld [vmem:[#allocation6 + $0x100] sm:$0xff]   ;;  %v6933_v60 = vld [vmem:[#allocation6 + $0x238] sm:$0xff]   ;;  %v6956_v22 = vld [vmem:[#allocation8 + $0x30] sm:$0xff]  }
  0x9f   :  { %6442 = vmatpush3.bf16.msra.mxu0 %v6918_v61  ;;  %6467 = vmatprep.subr.bf16.mxu1 %v6927_v6  ;;  %v475_v43 = vmul.f32 %v473_v49, %v395_v27  ;;  %v454_v47 = vmul.f32 %v452_v19, %v374_v54  ;;  %v460_v48 = vmul.f32 %v5493_v32, %v374_v54  ;;  %v5441_v52 = vsel %vm196_vm1, 1.0, %v7331_v34  ;;  %v6937_v32 = vld [vmem:[#allocation6 + $0x218] sm:$0xff]   ;;  %v6938_v6 = vld [vmem:[#allocation6 + $0x210] sm:$0xff]   ;;  %v6947_v23 = vld [vmem:[#allocation8 + $0xa8] sm:$0xff]  }
  0xa0   :  { %6443 = vmatprep.subr.bf16.mxu0 %v6921_v25  ;;  %v390_v42 = vsub.f32 1.5, %v5479_v37  ;;  %v464_v53 = vmul.f32 %v462_v28, %v384_v33  ;;  %v300_v56 = vmul.f32 %v5441_v52, %v298_v13  ;;  %v472_v51 = vsub.f32 1.3333334, %v5495_v44  ;;  %v6943_v19 = vld [vmem:[#allocation8 + $0xb8] sm:$0xff]   ;;  %v6954_v54 = vld [vmem:[#allocation8 + $0x70] sm:$0xff]   ;;  %v6960_v27 = vld [vmem:[#allocation8 + $0x28] sm:$0xff]  }
  0xa1   :  { %v477_v45 = vadd.f32 %v475_v43, %v471_v30  ;;  %v388_v55 = vmul.f32 %v5479_v37, %v7631_v41  ;;  %v456_v36 = vadd.f32 %v454_v47, %v450_v40  ;;  %v470_v61 = vmul.f32 %v5495_v44, %v384_v33  ;;  %v6949_v28 = vld [vmem:[#allocation8 + $0xa0] sm:$0xff]   ;;  %v6951_v29 = vld [vmem:[#allocation8 + $0xd8] sm:$0xff]   ;;  %v6957_v13 = vld [vmem:[#allocation8 + $0x90] sm:$0xff]  }
  0xa2   :  { %6468 = vmatpush3.bf16.msra.mxu1 %v6928_v21  ;;  %v302_v15 = vadd.f32 %v300_v56, %v296_v35  ;;  %v466_v18 = vadd.f32 %v464_v53, %v460_v48  ;;  %v5521_v16 = vcombine.low %v7635_v59, %v7642_v9  ;;  %vm8475_vm2 = vmmov 0   ;;  %v6935_v59 = vld [vmem:[#allocation6 + $0x228] sm:$0xff]   ;;  %v6952_v21 = vld [vmem:[#allocation8 + $0x38] sm:$0xff]   ;;  %v6962_v11 = vld [vmem:[#allocation8 + $0x60] sm:$0xff]  }
  0xa3   :  { %6444 = vmatpush3.bf16.msra.mxu0 %v6922_v14  ;;  %6469 = vmatprep.subr.bf16.mxu1 %v6931_v26  ;;  %v6239_v1 = vpack.c.bf16 %v477_v45, %v467_v0  ;;  %v6939_v9 = vld [vmem:[#allocation6 + $0x208] sm:$0xff]   ;;  %v6948_v26 = vld [vmem:[#allocation8 + $0xe0] sm:$0xff]   ;;  %v6953_v30 = vld [vmem:[#allocation8 + $0x98] sm:$0xff]  }
  0xa4   :  { %6445 = vmatprep.subr.bf16.mxu0 %v6925_v24  ;;  %v392_v58 = vmul.f32 %v390_v42, %v302_v15  ;;  %v6234_v62 = vpack.c.bf16 %v466_v18, %v456_v36  ;;  %v6946_v14 = vld [vmem:[#allocation8 + $0xe8] sm:$0xff]   ;;  %v6964_v33 = vld [vmem:[#allocation8 + $0x20] sm:$0xff]   ;;  %v6966_v49 = vld [vmem:[#allocation8 + $0x58] sm:$0xff]  }
  0xa5   :  { %6367 = vst [vmem:[#allocation2 + $0x40] sm:$0xff] %v6239_v1   ;;  %v6958_v24 = vld [vmem:[#allocation8 + $0x68] sm:$0xff]   ;;  %v6955_v35 = vld [vmem:[#allocation8 + $0xd0] sm:$0xff]   ;;  %v6965_v40 = vld [vmem:[#allocation8 + $0x80] sm:$0xff]  }
  0xa6   :  { %6470 = vmatpush3.bf16.msra.mxu1 %v6932_v57  ;;  %v394_v38 = vadd.f32 %v392_v58, %v388_v55  ;;  %v6959_v37 = vld [vmem:[#allocation8 + $0xc8] sm:$0xff]   ;;  %v6963_v57 = vld [vmem:[#allocation8 + $0xc0] sm:$0xff]   ;;  %v6967_v0 = vld [vmem:[#allocation8 + $0x1f8] sm:$0xff]  }
  0xa7   :  { %6446 = vmatpush3.bf16.msra.mxu0 %v6926_v50  ;;  %6486 = vmatprep.subr.bf16.mxu1 %v6950_v20  ;;  %v6961_v50 = vld [vmem:[#allocation8 + $0x88] sm:$0xff]   ;;  %v6968_v43 = vld [vmem:[#allocation8 + $0x18] sm:$0xff]   ;;  %v6972_v47 = vld [vmem:[#allocation8 + $0x10] sm:$0xff]  }
  0xa8   :  { %6447 = vmatprep.subr.bf16.mxu0 %v6929_v46  ;;  %v474_v63 = vmul.f32 %v472_v51, %v394_v38  ;;  %v6970_v46 = vld [vmem:[#allocation8 + $0x50] sm:$0xff]   ;;  %v6974_v48 = vld [vmem:[#allocation8 + $0x48] sm:$0xff]   ;;  %v6978_v45 = vld [vmem:[#allocation8 + $0x40] sm:$0xff]  }
  0xa9   :  { %v6976_v53 = vld [vmem:[#allocation8 + $0x8] sm:$0xff]  }
  0xaa   :  { %v476_v41 = vadd.f32 %v474_v63, %v470_v61 }
  0xab   :  { %6448 = vmatpush3.bf16.msra.mxu0 %v6930_v31  ;;  %v6980_v31 = vld [vmem:[#allocation8] sm:$0xff]  }
  0xac   :  { %6777 = vmatprep.subr.bf16.mxu0 %v7331_v34  ;;  %v590_v3 = vld [vmem:[#allocation2 + $0x3c] sm:$0xff]  ;;  %v6145_v5 = vpack.c.bf16 %v476_v41, %v476_v41 }
  0xad   :  { %v5524_v25 = vcombine.high %v6234_v62, %v590_v3  ;;  %v5523_v7 = vcombine.low %v6234_v62, %v590_v3 }
  0xae   :  { %1329 = vmatmul.mubr.bf16.vlgmr.msra.gmra.mxu0 %v5521_v16  ;;  %580 = vst [vmem:[#allocation2 + $0x20] sm:$0xf] %v6145_v5 }
  0xaf   :  { %6778 = vmatpush3.bf16.msra.mxu0 %v6933_v60  ;;  %6793 = vmatprep.mubr.msk.bf16.mxu0 %vm8475_vm2, %v7331_v34 }
  0xb0   :  { %6779 = vmatprep.subr.bf16.mxu0 %v7331_v34  ;;  %1369 = vmatprep.mubr.bf16.mxu1 %v5524_v25 }
  0xb1   :  { %1370 = vmatmul.mubr.bf16.vlgmr.msra.gmra.mxu1 %v5523_v7 }
  0xb2   :  { %6487 = vmatpush3.bf16.msra.mxu1 %v6952_v21 }
  0xb3   :  { %6780 = vmatpush3.bf16.msra.mxu0 %v6934_v2  ;;  %6488 = vmatprep.subr.bf16.mxu1 %v6954_v54 }
  0xb4   :  { %6781 = vmatprep.subr.bf16.mxu0 %v7331_v34 }
  0xb5   :  { %v6941_v12 = vld [vmem:[#allocation2 + $0x20] ss:$36 sps:$4 sm:$0xff]  }
  0xb6   :  { %6489 = vmatpush3.bf16.msra.mxu1 %v6956_v22 }
  0xb7   :  { %6782 = vmatpush3.bf16.msra.mxu0 %v6935_v59  ;;  %6490 = vmatprep.subr.bf16.mxu1 %v6958_v24 }
  0xb8   :  { %6783 = vmatprep.subr.bf16.mxu0 %v7331_v34 }
  0xba   :  { %6491 = vmatpush3.bf16.msra.mxu1 %v6960_v27 }
  0xbb   :  { %6784 = vmatpush3.bf16.msra.mxu0 %v6936_v8  ;;  %6492 = vmatprep.subr.bf16.mxu1 %v6962_v11 }
  0xbc   :  { %6785 = vmatprep.subr.bf16.mxu0 %v7331_v34 }
  0xbe   :  { %6493 = vmatpush3.bf16.msra.mxu1 %v6964_v33 }
  0xbf   :  { %6786 = vmatpush3.bf16.msra.mxu0 %v6937_v32  ;;  %6494 = vmatprep.subr.bf16.mxu1 %v6966_v49 }
  0xc0   :  { %6787 = vmatprep.subr.bf16.mxu0 %v7331_v34 }
  0xc2   :  { %6495 = vmatpush3.bf16.msra.mxu1 %v6968_v43 }
  0xc3   :  { %6788 = vmatpush3.bf16.msra.mxu0 %v6938_v6  ;;  %6496 = vmatprep.subr.bf16.mxu1 %v6970_v46 }
  0xc4   :  { %6789 = vmatprep.subr.bf16.mxu0 %v7331_v34 }
  0xc6   :  { %6497 = vmatpush3.bf16.msra.mxu1 %v6972_v47 }
  0xc7   :  { %6790 = vmatpush3.bf16.msra.mxu0 %v6939_v9  ;;  %6498 = vmatprep.subr.bf16.mxu1 %v6974_v48 }
  0xc8   :  { %6791 = vmatprep.subr.bf16.mxu0 %v7331_v34 }
  0xca   :  { %6499 = vmatpush3.bf16.msra.mxu1 %v6976_v53 }
  0xcb   :  { %6792 = vmatpush3.bf16.msra.mxu0 %v6940_v10  ;;  %6500 = vmatprep.subr.bf16.mxu1 %v6978_v45 }
  0xcc   :  { %6508 = vmatprep.subr.bf16.mxu0 %v6942_v17  ;;  %v6982_v17 = vld [vmem:[#allocation8 + $0x178] sm:$0xff]  }
  0xce   :  { %6794 = vmatmul.mubr.bf16.vlgmr.msra.gmra.mxu0 %v6941_v12  ;;  %6501 = vmatpush3.bf16.msra.mxu1 %v6980_v31 }
  0xcf   :  { %6509 = vmatpush3.bf16.msra.mxu0 %v6943_v19  ;;  %6530 = vmatprep.subr.bf16.mxu1 %v6982_v17 }
  0xd0   :  { %6510 = vmatprep.subr.bf16.mxu0 %v6944_v4 }
  0xd3   :  { %6511 = vmatpush3.bf16.msra.mxu0 %v6945_v39 }
  0xd4   :  { %6512 = vmatprep.subr.bf16.mxu0 %v6946_v14 }
  0xd7   :  { %6513 = vmatpush3.bf16.msra.mxu0 %v6947_v23 }
  0xd8   :  { %6514 = vmatprep.subr.bf16.mxu0 %v6948_v26 }
  0xdb   :  { %6515 = vmatpush3.bf16.msra.mxu0 %v6949_v28 }
  0xdc   :  { %6516 = vmatprep.subr.bf16.mxu0 %v6951_v29 }
  0xdf   :  { %6517 = vmatpush3.bf16.msra.mxu0 %v6953_v30 }
  0xe0   :  { %6518 = vmatprep.subr.bf16.mxu0 %v6955_v35 }
  0xe3   :  { %6519 = vmatpush3.bf16.msra.mxu0 %v6957_v13 }
  0xe4   :  { %6520 = vmatprep.subr.bf16.mxu0 %v6959_v37 }
  0xe7   :  { %6521 = vmatpush3.bf16.msra.mxu0 %v6961_v50 }
  0xe8   :  { %6522 = vmatprep.subr.bf16.mxu0 %v6963_v57 }
  0xeb   :  { %6523 = vmatpush3.bf16.msra.mxu0 %v6965_v40 }
  0xec   :  { %6552 = vmatprep.subr.bf16.mxu0 %v6967_v0 }
 0x149   :  { %v6427_v52 = vpop.f32.mrf.mxu1 }
 0x14b   :  { %v6428_v56 = vpop.f32.mrf.mxu1 }
 0x14c   :  { %v6429_v16 = vadd.f32 %v6428_v56, %v6427_v52 }
 0x14d   :  { %v6430_v1 = vpop.f32.mrf.mxu1 }
 0x14e   :  { %v6405_v44 = vpop.f32.mrf.mxu0 }
 0x14f   :  { %v6431_v36 = vpop.f32.mrf.mxu1 }
 0x150   :  { %v6406_v42 = vpop.f32.mrf.mxu0  ;;  %v6432_v25 = vadd.f32 %v6431_v36, %v6430_v1 }
 0x151   :  { %v6407_v61 = vadd.f32 %v6406_v42, %v6405_v44 }
 0x152   :  { %v6408_v51 = vpop.f32.mrf.mxu0 }
 0x153   :  { %v1290_v41 = vadd.f32 %v6429_v16, %v6407_v61 }
 0x154   :  { %v6409_v15 = vpop.f32.mrf.mxu0 }
 0x155   :  { %v6410_v3 = vadd.f32 %v6409_v15, %v6408_v51 }
 0x157   :  { %v1293_v32 = vadd.f32 %v6432_v25, %v6410_v3 }
 0x16e   :  { %v6449_v55 = vpop.f32.mrf.mxu0 }
 0x170   :  { %v6450_v18 = vpop.f32.mrf.mxu0 }
 0x171   :  { %v6471_v58 = vpop.f32.mrf.mxu1  ;;  %v6451_v62 = vadd.f32 %v6450_v18, %v6449_v55 }
 0x172   :  { %v6452_v60 = vpop.f32.mrf.mxu0 }
 0x173   :  { %v6472_v38 = vpop.f32.mrf.mxu1  ;;  %v1331_v7 = vadd.f32 %v6451_v62, %v1290_v41 }
 0x174   :  { %v6453_v63 = vpop.f32.mrf.mxu0  ;;  %v6473_v5 = vadd.f32 %v6472_v38, %v6471_v58 }
 0x175   :  { %v6474_v2 = vpop.f32.mrf.mxu1  ;;  %v6454_v59 = vadd.f32 %v6453_v63, %v6452_v60 }
 0x176   :  { %v1372_v10 = vadd.f32 %v6473_v5, %v1331_v7 }
 0x177   :  { %v6475_v8 = vpop.f32.mrf.mxu1  ;;  %v1334_v6 = vadd.f32 %v6454_v59, %v1293_v32 }
 0x178   :  { %v6476_v9 = vadd.f32 %v6475_v8, %v6474_v2 }
 0x17a   :  { %v1375_v39 = vadd.f32 %v6476_v9, %v1334_v6 }
 0x18e   :  { %v1412_v12 = vpop.f32.mrf.mxu0 }
 0x18f   :  { %v7668_v19 = vadd.f32 %v1412_v12, %v1372_v10 }
 0x190   :  { %v6795_v4 = vpop.f32.mrf.mxu0 }
 0x191   :  { %vm1429_vm3 = vcmp.ge.f32.partialorder %v7668_v19, -1.8  ;;  %vm1431_vm5 = vcmp.lt.f32.partialorder %v7668_v19, -1.4  ;;  %vm1439_vm4 = vcmp.ge.f32.partialorder %v7668_v19, -1.4 }
 0x192   :  { %v1415_v20 = vpop.f32.mrf.mxu0  ;;  %vm1433_vm6 = vmand %vm1429_vm3, %vm1431_vm5  ;;  %vm1441_vm7 = vcmp.lt.f32.partialorder %v7668_v19, -1.0  ;;  %vm1449_vm8 = vcmp.ge.f32.partialorder %v7668_v19, -1.0  ;;  %vm1451_vm9 = vcmp.lt.f32.partialorder %v7668_v19, -0.6  ;;  %vm1459_vm10 = vcmp.ge.f32.partialorder %v7668_v19, -0.6 }
 0x193   :  { %v7677_v14 = vadd.f32 %v1415_v20, %v1375_v39  ;;  %vm7679_vm11 = vmand %vm1439_vm4, %vm1441_vm7  ;;  %vm1461_vm12 = vcmp.lt.f32.partialorder %v7668_v19, -0.2  ;;  %v7685_v22 = vsel %vm1433_vm6, 1.0, %v7331_v34  ;;  %vm1471_vm15 = vcmp.lt.f32.partialorder %v7668_v19, 0.2 }
 0x194   :  { %v6796_v54 = vpop.f32.mrf.mxu0  ;;  %vm7687_vm13 = vmand %vm1449_vm8, %vm1451_vm9  ;;  %v7694_v24 = vmul.f32 2.5, %v7668_v19  ;;  %v5602_v27 = vsel %vm7679_vm11, 1.0, %v7331_v34  ;;  %v7713_v28 = vmul.f32 1.25, %v7668_v19 }
 0x195   :  { %vm1420_vm0 = vcmp.ge.f32.partialorder %v7677_v14, -2.2  ;;  %vm1422_vm1 = vcmp.lt.f32.partialorder %v7677_v14, -1.8  ;;  %vm1430_vm3 = vcmp.ge.f32.partialorder %v7677_v14, -1.8  ;;  %vm7699_vm5 = vmand %vm1459_vm10, %vm1461_vm12 }
 0x196   :  { %vm1424_vm4 = vmand %vm1420_vm0, %vm1422_vm1  ;;  %vm1432_vm6 = vcmp.lt.f32.partialorder %v7677_v14, -1.4  ;;  %vm1440_vm7 = vcmp.ge.f32.partialorder %v7677_v14, -1.4  ;;  %vm1442_vm8 = vcmp.lt.f32.partialorder %v7677_v14, -1.0  ;;  %vm1450_vm9 = vcmp.ge.f32.partialorder %v7677_v14, -1.0 }
 0x197   :  { %vm1434_vm2 = vmand %vm1430_vm3, %vm1432_vm6  ;;  %vm1452_vm14 = vcmp.lt.f32.partialorder %v7677_v14, -0.6  ;;  %vm1460_vm10 = vcmp.ge.f32.partialorder %v7677_v14, -0.6  ;;  %v5599_v11 = vsel %vm1424_vm4, 1.0, %v7331_v34  ;;  %v5604_v33 = vsel %vm7687_vm13, 1.0, %v7331_v34 }
 0x198   :  { %v5601_v29 = vsel %vm1434_vm2, 1.0, %v7331_v34  ;;  %vm1444_vm12 = vmand %vm1440_vm7, %vm1442_vm8  ;;  %vm1462_vm0 = vcmp.lt.f32.partialorder %v7677_v14, -0.2  ;;  %v5606_v30 = vsel %vm7699_vm5, 1.0, %v7331_v34  ;;  %vm1470_vm11 = vcmp.ge.f32.partialorder %v7677_v14, -0.2 }
 0x199   :  { %vm1454_vm1 = vmand %vm1450_vm9, %vm1452_vm14  ;;  %vm1472_vm3 = vcmp.lt.f32.partialorder %v7677_v14, 0.2  ;;  %v7727_v49 = vmul.f32 2.5, %v7677_v14  ;;  %vm1480_vm4 = vcmp.ge.f32.partialorder %v7677_v14, 0.2  ;;  %v5622_v35 = vadd.f32 4.5, %v7694_v24 }
 0x19a   :  { %vm1464_vm2 = vmand %vm1460_vm10, %vm1462_vm0  ;;  %vm1482_vm6 = vcmp.lt.f32.partialorder %v7677_v14, 0.6  ;;  %v5624_v13 = vadd.f32 3.5, %v7694_v24  ;;  %v5603_v37 = vsel %vm1444_vm12, 1.0, %v7331_v34  ;;  %vm8487_vm13 = vcmp.ge.f32.partialorder %v7668_v19, -0.2 }
 0x19b   :  { %vm1473_vm14 = vmand %vm8487_vm13, %vm1471_vm15  ;;  %v5621_v50 = vadd.f32 5.5, %v7727_v49  ;;  %v5623_v57 = vadd.f32 4.5, %v7727_v49  ;;  %v5625_v40 = vadd.f32 3.5, %v7727_v49  ;;  %v5605_v0 = vsel %vm1454_vm1, 1.0, %v7331_v34 }
 0x19c   :  { %v5607_v43 = vsel %vm1464_vm2, 1.0, %v7331_v34  ;;  %vm1474_vm5 = vmand %vm1470_vm11, %vm1472_vm3  ;;  %v7746_v44 = vsel %vm1473_vm14, 1.0, %v7331_v34  ;;  %v1545_v46 = vsub.f32 2.0, %v5622_v35  ;;  %v1543_v52 = vmul.f32 %v5622_v35, %v7685_v22 }
 0x19d   :  { %v5609_v47 = vsel %vm1474_vm5, 1.0, %v7331_v34  ;;  %vm1484_vm15 = vmand %vm1480_vm4, %vm1482_vm6  ;;  %v1536_v48 = vsub.f32 2.0, %v5621_v50  ;;  %v1553_v42 = vmul.f32 %v5624_v13, %v5602_v27  ;;  %v1534_v53 = vmul.f32 %v5621_v50, %v5599_v11 }
 0x19e   :  { %v1544_v45 = vmul.f32 %v5623_v57, %v5601_v29  ;;  %v1546_v56 = vsub.f32 2.0, %v5623_v57  ;;  %v1547_v51 = vmul.f32 %v5602_v27, %v1545_v46  ;;  %v1555_v1 = vsub.f32 2.0, %v5624_v13 }
 0x19f   :  { %v1538_v31 = vmul.f32 %v5601_v29, %v1536_v48  ;;  %v1556_v15 = vsub.f32 2.0, %v5625_v40  ;;  %v5626_v55 = vadd.f32 2.5, %v7694_v24  ;;  %v7754_v36 = vsel %vm1484_vm15, 1.0, %v7331_v34 }
 0x1a0   :  { %v1548_v18 = vmul.f32 %v5603_v37, %v1546_v56  ;;  %v5627_v58 = vadd.f32 2.5, %v7727_v49  ;;  %v5628_v60 = vadd.f32 1.5, %v7694_v24  ;;  %v7758_v38 = vadd.f32 %v1547_v51, %v1543_v52 }
 0x1a1   :  { %v1554_v61 = vmul.f32 %v5625_v40, %v5603_v37  ;;  %v1557_v16 = vmul.f32 %v5604_v33, %v1555_v1  ;;  %v1558_v62 = vmul.f32 %v5605_v0, %v1556_v15  ;;  %v1540_v63 = vadd.f32 %v1538_v31, %v1534_v53 }
 0x1a2   :  { %v1563_v2 = vmul.f32 %v5626_v55, %v5604_v33  ;;  %v1565_v41 = vsub.f32 2.0, %v5626_v55  ;;  %v1566_v3 = vsub.f32 2.0, %v5627_v58  ;;  %v1550_v25 = vadd.f32 %v1548_v18, %v1544_v45 }
 0x1a3   :  { %v1559_v7 = vadd.f32 %v1557_v16, %v1553_v42  ;;  %v1564_v5 = vmul.f32 %v5627_v58, %v5605_v0  ;;  %v5629_v59 = vadd.f32 1.5, %v7727_v49  ;;  %v1575_v6 = vsub.f32 2.0, %v5628_v60 }
 0x1a4   :  { %v1567_v8 = vmul.f32 %v5606_v30, %v1565_v41  ;;  %v1568_v32 = vmul.f32 %v5607_v43, %v1566_v3  ;;  %v5631_v9 = vadd.f32 0.5, %v7727_v49  ;;  %v1560_v10 = vadd.f32 %v1558_v62, %v1554_v61 }
 0x1a5   :  { %v1576_v12 = vsub.f32 2.0, %v5629_v59  ;;  %v7763_v17 = vmul.f32 1.25, %v7677_v14  ;;  %v5642_v4 = vadd.f32 2.25, %v7713_v28  ;;  %v1573_v20 = vmul.f32 %v5628_v60, %v5606_v30 }
 0x1a6   :  { %v1569_v39 = vadd.f32 %v1567_v8, %v1563_v2  ;;  %v1574_v21 = vmul.f32 %v5629_v59, %v5607_v43  ;;  %v1577_v54 = vmul.f32 %v7746_v44, %v1575_v6  ;;  %v1586_v26 = vsub.f32 2.0, %v5631_v9 }
 0x1a7   :  { %v1578_v23 = vmul.f32 %v5609_v47, %v1576_v12  ;;  %v5641_v27 = vadd.f32 2.75, %v7763_v17  ;;  %v5643_v11 = vadd.f32 2.25, %v7763_v17  ;;  %v1570_v29 = vadd.f32 %v1568_v32, %v1564_v5 }
 0x1a8   :  { %v1584_v33 = vmul.f32 %v5631_v9, %v5609_v47  ;;  %v1647_v35 = vsub.f32 1.5, %v5642_v4  ;;  %v5644_v13 = vadd.f32 1.75, %v7713_v28  ;;  %v7770_v37 = vadd.f32 %v1577_v54, %v1573_v20 }
 0x1a9   :  { %v1588_v50 = vmul.f32 %v7754_v36, %v1586_v26  ;;  %v1638_v57 = vsub.f32 1.5, %v5641_v27  ;;  %v1645_v30 = vmul.f32 %v5642_v4, %v7758_v38  ;;  %v1580_v40 = vadd.f32 %v1578_v23, %v1574_v21 }
 0x1aa   :  { %v1648_v0 = vsub.f32 1.5, %v5643_v11  ;;  %v1649_v43 = vmul.f32 %v1647_v35, %v1559_v7  ;;  %v5645_v46 = vadd.f32 1.75, %v7763_v17  ;;  %v1636_v48 = vmul.f32 %v5641_v27, %v1540_v63 }
 0x1ab   :  { %v1640_v52 = vmul.f32 %v1638_v57, %v1550_v25  ;;  %v1646_v42 = vmul.f32 %v5643_v11, %v1550_v25  ;;  %v1657_v53 = vsub.f32 1.5, %v5644_v13  ;;  %v7775_v47 = vadd.f32 %v1588_v50, %v1584_v33 }
 0x1ac   :  { %v1650_v45 = vmul.f32 %v1648_v0, %v1560_v10  ;;  %v1655_v56 = vmul.f32 %v5644_v13, %v1559_v7  ;;  %v1658_v51 = vsub.f32 1.5, %v5645_v46  ;;  %v1656_v31 = vmul.f32 %v5645_v46, %v1560_v10 }
 0x1ad   :  { %v1659_v1 = vmul.f32 %v1657_v53, %v1569_v39  ;;  %v5646_v15 = vadd.f32 1.25, %v7713_v28  ;;  %v5647_v55 = vadd.f32 1.25, %v7763_v17  ;;  %v7779_v18 = vadd.f32 %v1649_v43, %v1645_v30 }
 0x1ae   :  { %v1660_v58 = vmul.f32 %v1658_v51, %v1570_v29  ;;  %v5649_v60 = vadd.f32 0.75, %v7763_v17  ;;  %v7783_v61 = vmul.f32 0.8333333, %v7668_v19  ;;  %v1642_v16 = vadd.f32 %v1640_v52, %v1636_v48 }
 0x1af   :  { %v1652_v62 = vadd.f32 %v1650_v45, %v1646_v42  ;;  %v1665_v63 = vmul.f32 %v5646_v15, %v1569_v39  ;;  %v1667_v2 = vsub.f32 1.5, %v5646_v15  ;;  %v1661_v41 = vadd.f32 %v1659_v1, %v1655_v56 }
 0x1b0   :  { %v1666_v3 = vmul.f32 %v5647_v55, %v1570_v29  ;;  %v1668_v25 = vsub.f32 1.5, %v5647_v55  ;;  %v1678_v7 = vsub.f32 1.5, %v5649_v60  ;;  %v1662_v5 = vadd.f32 %v1660_v58, %v1656_v31 }
 0x1b1   :  { %v1669_v59 = vmul.f32 %v1667_v2, %v7770_v37  ;;  %v7787_v8 = vmul.f32 0.8333333, %v7677_v14  ;;  %v5660_v32 = vadd.f32 1.5, %v7783_v61  ;;  %v1676_v9 = vmul.f32 %v5649_v60, %v1580_v40 }
 0x1b2   :  { %v1670_v6 = vmul.f32 %v1668_v25, %v1580_v40  ;;  %v1680_v10 = vmul.f32 %v1678_v7, %v7775_v47  ;;  %v5662_v12 = vadd.f32 1.1666666, %v7783_v61  ;;  %vm1479_vm7 = vcmp.ge.f32.partialorder %v7668_v19, 0.2 }
 0x1b3   :  { %v7792_v4 = vadd.f32 %v1669_v59, %v1665_v63  ;;  %v5659_v39 = vadd.f32 1.8333334, %v7787_v8  ;;  %v5661_v20 = vadd.f32 1.5, %v7787_v8  ;;  %v1737_v54 = vmul.f32 %v5660_v32, %v7779_v18 }
 0x1b4   :  { %v1672_v21 = vadd.f32 %v1670_v6, %v1666_v3  ;;  %v1739_v23 = vsub.f32 1.3333334, %v5660_v32  ;;  %v5663_v26 = vadd.f32 1.1666666, %v7787_v8  ;;  %v1747_v13 = vmul.f32 %v5662_v12, %v1661_v41 }
 0x1b5   :  { %v1728_v27 = vmul.f32 %v5659_v39, %v1642_v16  ;;  %v1730_v11 = vsub.f32 1.3333334, %v5659_v39  ;;  %v1738_v29 = vmul.f32 %v5661_v20, %v1652_v62  ;;  %v1740_v33 = vsub.f32 1.3333334, %v5661_v20 }
 0x1b6   :  { %v1741_v35 = vmul.f32 %v1739_v23, %v1661_v41  ;;  %v1749_v50 = vsub.f32 1.3333334, %v5662_v12  ;;  %vm1481_vm8 = vcmp.lt.f32.partialorder %v7668_v19, 0.6  ;;  %v1750_v40 = vsub.f32 1.3333334, %v5663_v26 }
 0x1b7   :  { %v1732_v57 = vmul.f32 %v1730_v11, %v1652_v62  ;;  %v1742_v30 = vmul.f32 %v1740_v33, %v1662_v5  ;;  %v5665_v0 = vadd.f32 0.8333333, %v7787_v8  ;;  %v7801_v43 = vadd.f32 %v1680_v10, %v1676_v9  ;;  %vm1483_vm10 = vmand %vm1479_vm7, %vm1481_vm8 }
 0x1b8   :  { %v1743_v46 = vadd.f32 %v1741_v35, %v1737_v54  ;;  %v1748_v48 = vmul.f32 %v5663_v26, %v1662_v5  ;;  %v1751_v52 = vmul.f32 %v1749_v50, %v7792_v4  ;;  %v1752_v45 = vmul.f32 %v1750_v40, %v1672_v21 }
 0x1b9   :  { %v1734_v42 = vadd.f32 %v1732_v57, %v1728_v27  ;;  %v1744_v53 = vadd.f32 %v1742_v30, %v1738_v29  ;;  %vm1489_vm9 = vcmp.ge.f32.partialorder %v7668_v19, 0.6  ;;  %v1758_v56 = vmul.f32 %v5665_v0, %v1672_v21 }
 0x1ba   :  { %v1760_v51 = vsub.f32 1.3333334, %v5665_v0  ;;  %vm1490_vm12 = vcmp.ge.f32.partialorder %v7677_v14, 0.6  ;;  %vm1491_vm0 = vcmp.lt.f32.partialorder %v7668_v19, 1.0  ;;  %v1753_v31 = vadd.f32 %v1751_v52, %v1747_v13 }
 0x1bb   :  { %v6249_v1 = vpack.c.bf16 %v1744_v53, %v1734_v42  ;;  %vm1492_vm1 = vcmp.lt.f32.partialorder %v7677_v14, 1.0  ;;  %vm1499_vm11 = vcmp.ge.f32.partialorder %v7668_v19, 1.0  ;;  %v1754_v15 = vadd.f32 %v1752_v45, %v1748_v48  ;;  %vm1493_vm3 = vmand %vm1489_vm9, %vm1491_vm0 }
 0x1bc   :  { %v1762_v55 = vmul.f32 %v1760_v51, %v7801_v43  ;;  %vm1500_vm2 = vcmp.ge.f32.partialorder %v7677_v14, 1.0  ;;  %v5610_v58 = vsel %vm1483_vm10, 1.0, %v7331_v34  ;;  %vm1494_vm4 = vmand %vm1490_vm12, %vm1492_vm1  ;;  %vm1501_vm6 = vcmp.lt.f32.partialorder %v7668_v19, 1.4 }
 0x1bd   :  { %6368 = vst [vmem:[#allocation2 + $0x28] sm:$0xff] %v6249_v1   ;;  %vm1502_vm13 = vcmp.lt.f32.partialorder %v7677_v14, 1.4  ;;  %v5630_v60 = vadd.f32 0.5, %v7694_v24  ;;  %vm1503_vm14 = vmand %vm1499_vm11, %vm1501_vm6  ;;  %vm1509_vm5 = vcmp.ge.f32.partialorder %v7668_v19, 1.4  ;;  %v7822_v62 = vpack.c.bf16 %v1753_v31, %v1743_v46 }
 0x1be   :  { %v1764_v16 = vadd.f32 %v1762_v55, %v1758_v56  ;;  %vm1510_vm15 = vcmp.ge.f32.partialorder %v7677_v14, 1.4  ;;  %vm1511_vm7 = vcmp.lt.f32.partialorder %v7668_v19, 1.8  ;;  %v5612_v63 = vsel %vm1493_vm3, 1.0, %v7331_v34  ;;  %vm7825_vm8 = vmand %vm1500_vm2, %vm1502_vm13 }
 0x1bf   :  { %vm1512_vm9 = vcmp.lt.f32.partialorder %v7677_v14, 1.8  ;;  %vm1520_vm10 = vcmp.ge.f32.partialorder %v7677_v14, 1.8  ;;  %v5613_v3 = vsel %vm1494_vm4, 1.0, %v7331_v34  ;;  %vm1513_vm12 = vmand %vm1509_vm5, %vm1511_vm7  ;;  %v1585_v25 = vsub.f32 2.0, %v5630_v60 }
 0x1c0   :  { %v6259_v41 = vpack.c.bf16 %v1764_v16, %v1754_v15  ;;  %vm1522_vm0 = vcmp.lt.f32.partialorder %v7677_v14, 2.2  ;;  %v5614_v7 = vsel %vm1503_vm14, 1.0, %v7331_v34  ;;  %vm1514_vm1 = vmand %vm1510_vm15, %vm1512_vm9  ;;  %v5632_v5 = vadd.f32 -0.5, %v7694_v24 }
 0x1c1   :  { %v5633_v59 = vadd.f32 -0.5, %v7727_v49  ;;  %v5634_v32 = vadd.f32 -1.5, %v7694_v24  ;;  %vm1524_vm11 = vmand %vm1520_vm10, %vm1522_vm0  ;;  %v1583_v6 = vmul.f32 %v5630_v60, %v7746_v44  ;;  %v1587_v9 = vmul.f32 %v5610_v58, %v1585_v25 }
 0x1c2   :  { %6370 = vst [vmem:[#allocation2 + $0x30] sm:$0xff] %v6259_v41   ;;  %v5635_v10 = vadd.f32 -1.5, %v7727_v49  ;;  %v5636_v12 = vadd.f32 -2.5, %v7694_v24  ;;  %v5615_v39 = vsel %vm7825_vm8, 1.0, %v7331_v34  ;;  %v7844_v20 = vsel %vm1513_vm12, 1.0, %v7331_v34 }
 0x1c3   :  { %v5617_v21 = vsel %vm1514_vm1, 1.0, %v7331_v34  ;;  %v1595_v54 = vsub.f32 2.0, %v5632_v5  ;;  %v5619_v23 = vsel %vm1524_vm11, 1.0, %v7331_v34  ;;  %v1593_v26 = vmul.f32 %v5632_v5, %v5610_v58 }
 0x1c4   :  { %v1594_v44 = vmul.f32 %v5633_v59, %v7754_v36  ;;  %v1596_v27 = vsub.f32 2.0, %v5633_v59  ;;  %v1605_v29 = vsub.f32 2.0, %v5634_v32  ;;  %v1606_v33 = vsub.f32 2.0, %v5635_v10 }
 0x1c5   :  { %v1597_v11 = vmul.f32 %v5612_v63, %v1595_v54  ;;  %v5637_v35 = vadd.f32 -2.5, %v7727_v49  ;;  %v7850_v13 = vadd.f32 %v1587_v9, %v1583_v6  ;;  %v1615_v57 = vsub.f32 2.0, %v5636_v12  ;;  %v6973_v54 = vld [vmem:[#allocation8 + $0x1b0] sm:$0xff]  }
 0x1c6   :  { %v1598_v50 = vmul.f32 %v5613_v3, %v1596_v27  ;;  %v5639_v30 = vadd.f32 -3.5, %v7727_v49  ;;  %v1603_v40 = vmul.f32 %v5634_v32, %v5612_v63  ;;  %v1604_v0 = vmul.f32 %v5635_v10, %v5613_v3  ;;  %v6969_v49 = vld [vmem:[#allocation8 + $0x1b8] sm:$0xff]   ;;  %v6971_v3 = vld [vmem:[#allocation8 + $0x1f0] sm:$0xff]  }
 0x1c7   :  { %v1607_v46 = vmul.f32 %v5614_v7, %v1605_v29  ;;  %v1608_v48 = vmul.f32 %v5615_v39, %v1606_v33  ;;  %v1599_v52 = vadd.f32 %v1597_v11, %v1593_v26  ;;  %v1613_v42 = vmul.f32 %v5636_v12, %v5614_v7  ;;  %v6975_v11 = vld [vmem:[#allocation8 + $0x1e8] sm:$0xff]  }
 0x1c8   :  { %v1614_v53 = vmul.f32 %v5637_v35, %v5615_v39  ;;  %v1616_v36 = vsub.f32 2.0, %v5637_v35  ;;  %v1600_v56 = vadd.f32 %v1598_v50, %v1594_v44  ;;  %v1617_v51 = vmul.f32 %v7844_v20, %v1615_v57 }
 0x1c9   :  { %v1915_v45 = vld [vmem:[#allocation2 + $0x2c] sm:$0xff]  ;;  %v1626_v31 = vsub.f32 2.0, %v5639_v30  ;;  %v5650_v1 = vadd.f32 0.25, %v7713_v28  ;;  %v1624_v60 = vmul.f32 %v5639_v30, %v5617_v21  ;;  %v1609_v16 = vadd.f32 %v1607_v46, %v1603_v40 }
 0x1ca   :  { %v5697_v15 = vcombine.high %v7822_v62, %v1915_v45  ;;  %v5696_v55 = vcombine.low %v7822_v62, %v1915_v45  ;;  %v1618_v58 = vmul.f32 %v5617_v21, %v1616_v36  ;;  %v1610_v63 = vadd.f32 %v1608_v48, %v1604_v0 }
 0x1cb   :  { %v1628_v2 = vmul.f32 %v5619_v23, %v1626_v31  ;;  %v5651_v41 = vadd.f32 0.25, %v7763_v17  ;;  %v1687_v25 = vsub.f32 1.5, %v5650_v1  ;;  %v5652_v7 = vadd.f32 -0.25, %v7713_v28 }
 0x1cc   :  { %2614 = vmatprep.mubr.bf16.mxu0 %v5697_v15  ;;  %v5653_v5 = vadd.f32 -0.25, %v7763_v17  ;;  %v5654_v59 = vadd.f32 -0.75, %v7713_v28  ;;  %v7861_v32 = vadd.f32 %v1617_v51, %v1613_v42  ;;  %v1685_v62 = vmul.f32 %v5650_v1, %v7850_v13  ;;  %v6977_v42 = vld [vmem:[#allocation8 + $0x1a8] sm:$0xff]   ;;  %v6979_v51 = vld [vmem:[#allocation8 + $0x1e0] sm:$0xff]  }
 0x1cd   :  { %2615 = vmatmul.mubr.bf16.vlgmr.msra.gmra.mxu0 %v5696_v55  ;;  %v1686_v6 = vmul.f32 %v5651_v41, %v7775_v47  ;;  %v1688_v9 = vsub.f32 1.5, %v5651_v41  ;;  %v1620_v10 = vadd.f32 %v1618_v58, %v1614_v53  ;;  %v1630_v12 = vadd.f32 %v1628_v2, %v1624_v60 }
 0x1ce   :  { %6553 = vmatpush3.bf16.msra.mxu0 %v6969_v49  ;;  %v1689_v39 = vmul.f32 %v1687_v25, %v1599_v52  ;;  %v1698_v21 = vsub.f32 1.5, %v5653_v5  ;;  %v1695_v26 = vmul.f32 %v5652_v7, %v1599_v52  ;;  %v1697_v44 = vsub.f32 1.5, %v5652_v7 }
 0x1cf   :  { %v1690_v23 = vmul.f32 %v1688_v9, %v1600_v56  ;;  %v5655_v27 = vadd.f32 -0.75, %v7763_v17  ;;  %6554 = vmatprep.subr.bf16.mxu0 %v6971_v3  ;;  %v1696_v29 = vmul.f32 %v5653_v5, %v1600_v56  ;;  %v1707_v35 = vsub.f32 1.5, %v5654_v59  ;;  %v6981_v3 = vld [vmem:[#allocation8 + $0x1a0] sm:$0xff]  }
 0x1d0   :  { %v1700_v33 = vmul.f32 %v1698_v21, %v1610_v63  ;;  %v5657_v50 = vadd.f32 -1.25, %v7763_v17  ;;  %v1699_v57 = vmul.f32 %v1697_v44, %v1609_v16  ;;  %v5667_v40 = vadd.f32 0.5, %v7787_v8  ;;  %v6985_v44 = vld [vmem:[#allocation8 + $0x198] sm:$0xff]  }
 0x1d1   :  { %v1692_v47 = vadd.f32 %v1690_v23, %v1686_v6  ;;  %v1708_v30 = vsub.f32 1.5, %v5655_v27  ;;  %v7868_v0 = vadd.f32 %v1689_v39, %v1685_v62  ;;  %v1705_v46 = vmul.f32 %v5654_v59, %v1609_v16  ;;  %v6983_v59 = vld [vmem:[#allocation8 + $0x1d8] sm:$0xff]  }
 0x1d2   :  { %v1706_v48 = vmul.f32 %v5655_v27, %v1610_v63  ;;  %v1709_v52 = vmul.f32 %v1707_v35, %v7861_v32  ;;  %6555 = vmatpush3.bf16.msra.mxu0 %v6973_v54  ;;  %v1716_v36 = vmul.f32 %v5657_v50, %v1620_v10  ;;  %v1718_v45 = vsub.f32 1.5, %v5657_v50 }
 0x1d3   :  { %v1710_v53 = vmul.f32 %v1708_v30, %v1620_v10  ;;  %v1770_v56 = vsub.f32 1.3333334, %v5667_v40  ;;  %6556 = vmatprep.subr.bf16.mxu0 %v6975_v11  ;;  %v1702_v17 = vadd.f32 %v1700_v33, %v1696_v29  ;;  %v1768_v31 = vmul.f32 %v5667_v40, %v7801_v43 }
 0x1d4   :  { %v5668_v1 = vadd.f32 0.16666667, %v7783_v61  ;;  %v5669_v15 = vadd.f32 0.16666667, %v7787_v8  ;;  %v1701_v55 = vadd.f32 %v1699_v57, %v1695_v26  ;;  %v1720_v49 = vmul.f32 %v1718_v45, %v1630_v12  ;;  %v6989_v45 = vld [vmem:[#allocation8 + $0x190] sm:$0xff]  }
 0x1d5   :  { %v1772_v58 = vmul.f32 %v1770_v56, %v1692_v47  ;;  %v5671_v60 = vadd.f32 -0.16666667, %v7787_v8  ;;  %v7875_v16 = vadd.f32 %v1709_v52, %v1705_v46  ;;  %v1712_v63 = vadd.f32 %v1710_v53, %v1706_v48 }
 0x1d6   :  { %v1778_v2 = vmul.f32 %v5669_v15, %v1692_v47  ;;  %v1780_v41 = vsub.f32 1.3333334, %v5669_v15  ;;  %6557 = vmatpush3.bf16.msra.mxu0 %v6977_v42  ;;  %v1722_v25 = vadd.f32 %v1720_v49, %v1716_v36  ;;  %v7878_v7 = vmul.f32 %v5668_v1, %v7868_v0 }
 0x1d7   :  { %v1779_v43 = vsub.f32 1.3333334, %v5668_v1  ;;  %v5670_v5 = vadd.f32 -0.16666667, %v7783_v61  ;;  %6558 = vmatprep.subr.bf16.mxu0 %v6979_v51  ;;  %v1774_v62 = vadd.f32 %v1772_v58, %v1768_v31  ;;  %v1788_v9 = vmul.f32 %v5671_v60, %v1702_v17 }
 0x1d8   :  { %v1782_v6 = vmul.f32 %v1780_v41, %v1702_v17  ;;  %v1790_v10 = vsub.f32 1.3333334, %v5671_v60  ;;  %v5673_v12 = vadd.f32 -0.5, %v7787_v8  ;;  %vm1419_vm3 = vcmp.ge.f32.partialorder %v7668_v19, -2.2  ;;  %v6987_v8 = vld [vmem:[#allocation8 + $0x1d0] sm:$0xff]  }
 0x1d9   :  { %vm1421_vm2 = vcmp.lt.f32.partialorder %v7668_v19, -1.8  ;;  %v5620_v39 = vadd.f32 5.5, %v7694_v24  ;;  %v1781_v21 = vmul.f32 %v1779_v43, %v1701_v55  ;;  %v1787_v23 = vmul.f32 %v5670_v5, %v1701_v55  ;;  %v6995_v43 = vld [vmem:[#allocation8 + $0x1c0] sm:$0xff]  }
 0x1da   :  { %v1784_v54 = vadd.f32 %v1782_v6, %v1778_v2  ;;  %v1792_v26 = vmul.f32 %v1790_v10, %v1712_v63  ;;  %6559 = vmatpush3.bf16.msra.mxu0 %v6981_v3  ;;  %vm1423_vm4 = vmand %vm1419_vm3, %vm1421_vm2  ;;  %v1798_v27 = vmul.f32 %v5673_v12, %v1712_v63  ;;  %v1800_v11 = vsub.f32 1.3333334, %v5673_v12  ;;  %v6993_v3 = vld [vmem:[#allocation8 + $0x188] sm:$0xff]   ;;  %v6997_v10 = vld [vmem:[#allocation8 + $0x180] sm:$0xff]  }
 0x1db   :  { %v5598_v29 = vsel %vm1423_vm4, 1.0, %v7331_v34  ;;  %v1535_v33 = vsub.f32 2.0, %v5620_v39  ;;  %6560 = vmatprep.subr.bf16.mxu0 %v6983_v59  ;;  %v1789_v35 = vsub.f32 1.3333334, %v5670_v5  ;;  %v5640_v46 = vadd.f32 2.75, %v7713_v28 }
 0x1dc   :  { %v1794_v50 = vadd.f32 %v1792_v26, %v1788_v9  ;;  %v6269_v47 = vpack.c.bf16 %v1784_v54, %v1774_v62  ;;  %v1533_v57 = vmul.f32 %v5620_v39, %v5598_v29  ;;  %v1802_v30 = vmul.f32 %v1800_v11, %v1722_v25 }
 0x1dd   :  { %v1537_v40 = vmul.f32 %v7685_v22, %v1535_v33  ;;  %v5658_v48 = vadd.f32 1.8333334, %v7783_v61  ;;  %v1791_v52 = vmul.f32 %v1789_v35, %v7875_v16  ;;  %v5674_v42 = vmul.f32 -1.442695, %v7668_v19  ;;  %v6991_v22 = vld [vmem:[#allocation8 + $0x1c8] sm:$0xff]  }
 0x1de   :  { %6372 = vst [vmem:[#allocation2 + $0x38] sm:$0xff] %v6269_v47   ;;  %v5675_v53 = vmul.f32 -1.442695, %v7677_v14  ;;  %6561 = vmatpush3.bf16.msra.mxu0 %v6985_v44  ;;  %v5648_v36 = vadd.f32 0.75, %v7713_v28  ;;  %v1804_v56 = vadd.f32 %v1802_v30, %v1798_v27  ;;  %v1637_v17 = vsub.f32 1.5, %v5640_v46 }
 0x1df   :  { %v1539_v51 = vadd.f32 %v1537_v40, %v1533_v57  ;;  %v1729_v31 = vsub.f32 1.3333334, %v5658_v48  ;;  %6562 = vmatprep.subr.bf16.mxu0 %v6987_v8  ;;  %7169 = vpow2.f32 %v5674_v42  ;;  %v5664_v55 = vadd.f32 0.8333333, %v7783_v61 }
 0x1e0   :  { %v1675_v1 = vmul.f32 %v5648_v36, %v7770_v37  ;;  %v1677_v15 = vsub.f32 1.5, %v5648_v36  ;;  %v6279_v49 = vpack.c.bf16 %v1804_v56, %v1794_v50  ;;  %v1639_v60 = vmul.f32 %v1637_v17, %v7758_v38 }
 0x1e1   :  { %v1635_v58 = vmul.f32 %v5640_v46, %v1539_v51  ;;  %v1731_v63 = vmul.f32 %v1729_v31, %v7779_v18  ;;  %7171 = vpow2.f32 %v5675_v53  ;;  %v1757_v41 = vmul.f32 %v5664_v55, %v7792_v4 }
 0x1e2   :  { %v1679_v2 = vmul.f32 %v1677_v15, %v7850_v13  ;;  %6563 = vmatpush3.bf16.msra.mxu0 %v6989_v45  ;;  %6374 = vst [vmem:[#allocation2 + $0x40] sm:$0xff] %v6279_v49   ;;  %v5666_v37 = vadd.f32 0.5, %v7783_v61  ;;  %vm1519_vm6 = vcmp.ge.f32.partialorder %v7668_v19, 1.8  ;;  %vm1521_vm13 = vcmp.lt.f32.partialorder %v7668_v19, 2.2 }
 0x1e3   :  { %v1641_v25 = vadd.f32 %v1639_v60, %v1635_v58  ;;  %6564 = vmatprep.subr.bf16.mxu0 %v6991_v22  ;;  %v1759_v5 = vsub.f32 1.3333334, %v5664_v55  ;;  %vm1523_vm14 = vmand %vm1519_vm6, %vm1521_vm13  ;;  %v5638_v18 = vadd.f32 -3.5, %v7694_v24  ;;  %v1783_v13 = vadd.f32 %v1781_v21, %v7878_v7  ;;  %v6984_v15 = vld [vmem:[#allocation8 + $0x138] sm:$0xff]   ;;  %v6986_v55 = vld [vmem:[#allocation8 + $0x170] sm:$0xff]  }
 0x1e4   :  { %v1681_v38 = vadd.f32 %v1679_v2, %v1675_v1  ;;  %v1793_v4 = vadd.f32 %v1791_v52, %v1787_v23  ;;  %v1769_v62 = vsub.f32 1.3333334, %v5666_v37  ;;  %v5656_v39 = vadd.f32 -1.25, %v7713_v28  ;;  %v6988_v58 = vld [vmem:[#allocation8 + $0x130] sm:$0xff]   ;;  %v6992_v60 = vld [vmem:[#allocation8 + $0x128] sm:$0xff]   ;;  %v6998_v2 = vld [vmem:[#allocation8 + $0x158] sm:$0xff]  }
 0x1e5   :  { %v1727_v59 = vmul.f32 %v5658_v48, %v1641_v25  ;;  %v1625_v12 = vsub.f32 2.0, %v5638_v18  ;;  %v5618_v44 = vsel %vm1523_vm14, 1.0, %v7331_v34  ;;  %v1623_v24 = vmul.f32 %v5638_v18, %v7844_v20  ;;  %v1916_v31 = vld [vmem:[#allocation2 + $0x34] sm:$0xff]  ;;  %v7001_v25 = vld [vmem:[#allocation8 + $0x110] sm:$0xff]  }
 0x1e6   :  { %v1761_v6 = vmul.f32 %v1759_v5, %v1681_v38  ;;  %v1767_v9 = vmul.f32 %v5666_v37, %v1681_v38  ;;  %6565 = vmatpush3.bf16.msra.mxu0 %v6993_v3  ;;  %v1771_v26 = vmul.f32 %v1769_v62, %v7868_v0  ;;  %v6274_v21 = vpack.c.bf16 %v1793_v4, %v1783_v13  ;;  %v7000_v3 = vld [vmem:[#allocation8 + $0x150] sm:$0xff]   ;;  %v7002_v37 = vld [vmem:[#allocation8 + $0x148] sm:$0xff]   ;;  %v7004_v38 = vld [vmem:[#allocation8 + $0x140] sm:$0xff]  }
 0x1e7   :  { %v1733_v54 = vadd.f32 %v1731_v63, %v1727_v59  ;;  %6566 = vmatprep.subr.bf16.mxu0 %v6995_v43  ;;  %v1627_v7 = vmul.f32 %v5618_v44, %v1625_v12  ;;  %v1715_v33 = vmul.f32 %v5656_v39, %v7861_v32  ;;  %v1717_v8 = vsub.f32 1.5, %v5656_v39  ;;  %v6996_v63 = vld [vmem:[#allocation8 + $0x120] sm:$0xff]   ;;  %v7003_v43 = vld [vmem:[#allocation8 + $0x108] sm:$0xff]   ;;  %v7006_v18 = vld [vmem:[#allocation8 + $0x238] sm:$0xff]  }
 0x1e8   :  { %v1763_v27 = vadd.f32 %v1761_v6, %v1757_v41  ;;  %v1773_v23 = vadd.f32 %v1771_v26, %v1767_v9  ;;  %v5672_v28 = vadd.f32 -0.5, %v7783_v61  ;;  %v6999_v41 = vld [vmem:[#allocation8 + $0x118] sm:$0xff]   ;;  %v7005_v5 = vld [vmem:[#allocation8 + $0x100] sm:$0xff]   ;;  %v7007_v4 = vld [vmem:[#allocation8 + $0x230] sm:$0xff]   ;;  %vm8490_vm5 = vmmov 0  }
 0x1e9   :  { %v1917_v11 = vld [vmem:[#allocation2 + $0x3c] sm:$0xff]  ;;  %v1629_v29 = vadd.f32 %v1627_v7, %v1623_v24  ;;  %v7010_v6 = vld [vmem:[#allocation8 + $0x218] sm:$0xff]   ;;  %v7011_v9 = vld [vmem:[#allocation8 + $0x210] sm:$0xff]  }
 0x1ea   :  { %6567 = vmatpush3.bf16.msra.mxu0 %v6997_v10  ;;  %v5701_v35 = vcombine.high %v6274_v21, %v1917_v11  ;;  %v7910_v50 = vpack.c.bf16 %v1773_v23, %v1763_v27  ;;  %v5700_v0 = vcombine.low %v6274_v21, %v1917_v11  ;;  %v1797_v30 = vmul.f32 %v5672_v28, %v7875_v16  ;;  %v7008_v59 = vld [vmem:[#allocation8 + $0x228] sm:$0xff]   ;;  %v7009_v62 = vld [vmem:[#allocation8 + $0x220] sm:$0xff]   ;;  %v7016_v26 = vld [vmem:[#allocation9 + $0xb8] sm:$0xff]  }
 0x1eb   :  { %v1719_v47 = vmul.f32 %v1717_v8, %v1629_v29  ;;  %v1799_v40 = vsub.f32 1.3333334, %v5672_v28  ;;  %v7012_v10 = vld [vmem:[#allocation8 + $0x208] sm:$0xff]   ;;  %v7013_v12 = vld [vmem:[#allocation8 + $0x200] sm:$0xff]   ;;  %v7017_v44 = vld [vmem:[#allocation9 + $0xf0] sm:$0xff]  }
 0x1ec   :  { %v7170_v57 = vpop.eup %7169  ;;  %2696 = vmatprep.mubr.bf16.mxu0 %v5701_v35  ;;  %v5699_v49 = vcombine.high %v7910_v50, %v1916_v31  ;;  %v5698_v13 = vcombine.low %v7910_v50, %v1916_v31  ;;  %v7018_v27 = vld [vmem:[#allocation9 + $0xb0] sm:$0xff]   ;;  %v7023_v24 = vld [vmem:[#allocation9 + $0x78] sm:$0xff]   ;;  %v7019_v7 = vld [vmem:[#allocation9 + $0xe8] sm:$0xff]  }
 0x1ed   :  { %2697 = vmatmul.mubr.bf16.vlgmr.msra.gmra.mxu0 %v5700_v0  ;;  %v1721_v20 = vadd.f32 %v1719_v47, %v1715_v33  ;;  %v1811_v42 = vadd.f32 1.0, %v7170_v57  ;;  %v7025_v21 = vld [vmem:[#allocation9 + $0x38] sm:$0xff]   ;;  %v7027_v23 = vld [vmem:[#allocation9 + $0x70] sm:$0xff]   ;;  %6583 = vmatprep.subr.bf16.mxu0 %v7023_v24  ;;  %v7020_v29 = vld [vmem:[#allocation9 + $0xa8] sm:$0xff]  }
 0x1ee   :  { %v7172_v46 = vpop.eup %7171  ;;  %6584 = vmatpush3.bf16.msra.mxu0 %v7025_v21  ;;  %v7029_v11 = vld [vmem:[#allocation9 + $0x30] sm:$0xff]   ;;  %v7031_v33 = vld [vmem:[#allocation9 + $0x68] sm:$0xff]   ;;  %v7021_v8 = vld [vmem:[#allocation9 + $0xe0] sm:$0xff]  }
 0x1ef   :  { %v1812_v48 = vadd.f32 1.0, %v7172_v46  ;;  %v1801_v52 = vmul.f32 %v1799_v40, %v1721_v20  ;;  %6585 = vmatprep.subr.bf16.mxu0 %v7027_v23  ;;  %v7033_v28 = vld [vmem:[#allocation9 + $0x28] sm:$0xff]   ;;  %v7022_v35 = vld [vmem:[#allocation9 + $0xa0] sm:$0xff]   ;;  %v7024_v0 = vld [vmem:[#allocation9 + $0xd8] sm:$0xff]  }
 0x1f0   :  { %v7035_v50 = vld [vmem:[#allocation9 + $0x60] sm:$0xff]   ;;  %v7026_v57 = vld [vmem:[#allocation9 + $0x98] sm:$0xff]   ;;  %v7030_v40 = vld [vmem:[#allocation9 + $0x90] sm:$0xff]  }
 0x1f1   :  { %7173 = vrcp.f32 %v1812_v48  ;;  %v1803_v32 = vadd.f32 %v1801_v52, %v1797_v30  ;;  %v7037_v47 = vld [vmem:[#allocation9 + $0x20] sm:$0xff]   ;;  %v7039_v20 = vld [vmem:[#allocation9 + $0x58] sm:$0xff]   ;;  %v7028_v30 = vld [vmem:[#allocation9 + $0xd0] sm:$0xff]  }
 0x1f2   :  { %7175 = vrcp.f32 %v1811_v42  ;;  %6586 = vmatpush3.bf16.msra.mxu0 %v7029_v11  ;;  %v7032_v46 = vld [vmem:[#allocation9 + $0xc8] sm:$0xff]   ;;  %v7036_v52 = vld [vmem:[#allocation9 + $0xc0] sm:$0xff]  }
 0x1f3   :  { %v6163_v53 = vpack.c.bf16 %v1803_v32, %v1803_v32  ;;  %6587 = vmatprep.subr.bf16.mxu0 %v7031_v33  ;;  %v7034_v48 = vld [vmem:[#allocation9 + $0x88] sm:$0xff]   ;;  %v7038_v42 = vld [vmem:[#allocation9 + $0x80] sm:$0xff]   ;;  %v7040_v32 = vld [vmem:[#allocation9 + $0x1f8] sm:$0xff]  }
 0x1f5   :  { %1907 = vst [vmem:[#allocation2 + $0x20] sm:$0xf] %v6163_v53  ;;  %v7041_v53 = vld [vmem:[#allocation9 + $0x18] sm:$0xff]  }
 0x1f6   :  { %6588 = vmatpush3.bf16.msra.mxu0 %v7033_v28 }
 0x1f7   :  { %6589 = vmatprep.subr.bf16.mxu0 %v7035_v50 }
 0x1fa   :  { %6590 = vmatpush3.bf16.msra.mxu0 %v7037_v47 }
 0x1fb   :  { %6591 = vmatprep.subr.bf16.mxu0 %v7039_v20 }
 0x1fc   :  { %v7014_v39 = vld [vmem:[#allocation2 + $0x20] ss:$36 sps:$4 sm:$0xff]  }
 0x1fe   :  { %v7174_v61 = vpop.eup %7173  ;;  %6592 = vmatpush3.bf16.msra.mxu0 %v7041_v53 }
 0x1ff   :  { %v1818_v36 = vmul.f32 %v7174_v61, %v7677_v14  ;;  %v7176_v56 = vpop.eup %7175  ;;  %v6990_v14 = vld [vmem:[#allocation8 + $0x168] sm:$0xff]  }
 0x200   :  { %v1817_v51 = vmul.f32 %v7176_v56, %v7668_v19  ;;  %v6994_v19 = vld [vmem:[#allocation8 + $0x160] sm:$0xff]   ;;  %v7047_v56 = vld [vmem:[#allocation9 + $0x48] sm:$0xff]  }
 0x201   :  { %v6148_v45 = vpack.c.bf16 %v1818_v36, %v1818_v36  ;;  %v7043_v36 = vld [vmem:[#allocation9 + $0x50] sm:$0xff]  }
 0x202   :  { %v6244_v17 = vpack.c.bf16 %v1733_v54, %v1817_v51  ;;  %v7015_v54 = vld [vmem:[#allocation9 + $0xf8] sm:$0xff]   ;;  %6593 = vmatprep.subr.bf16.mxu0 %v7043_v36 }
 0x203   :  { %1828 = vst [vmem:[#allocation2 + $0x24] sm:$0xf] %v6148_v45  ;;  %v7045_v45 = vld [vmem:[#allocation9 + $0x10] sm:$0xff]  }
 0x204   :  { %6594 = vmatpush3.bf16.msra.mxu0 %v7045_v45 }
 0x205   :  { %6595 = vmatprep.subr.bf16.mxu0 %v7047_v56 }
 0x20a   :  { %v1914_v16 = vld [vmem:[#allocation2 + $0x24] sm:$0xff] }
 0x20b   :  { %v5695_v22 = vcombine.high %v6244_v17, %v1914_v16  ;;  %v5694_v1 = vcombine.low %v6244_v17, %v1914_v16  ;;  %v7049_v17 = vld [vmem:[#allocation9 + $0x8] sm:$0xff]   ;;  %v7051_v16 = vld [vmem:[#allocation9 + $0x40] sm:$0xff]  }
 0x20c   :  { %6596 = vmatpush3.bf16.msra.mxu0 %v7049_v17 }
 0x20d   :  { %2573 = vmatprep.mubr.bf16.mxu1 %v5695_v22  ;;  %6597 = vmatprep.subr.bf16.mxu0 %v7051_v16 }
 0x20e   :  { %2574 = vmatmul.mubr.bf16.vlgmr.msra.gmra.mxu1 %v5694_v1  ;;  %v7053_v1 = vld [vmem:[#allocation9] sm:$0xff]  }
 0x20f   :  { %6531 = vmatpush3.bf16.msra.mxu1 %v6984_v15  ;;  %2655 = vmatprep.mubr.bf16.mxu1 %v5699_v49 }
 0x210   :  { %6532 = vmatprep.subr.bf16.mxu1 %v6986_v55  ;;  %6598 = vmatpush3.bf16.msra.mxu0 %v7053_v1 }
 0x213   :  { %6533 = vmatpush3.bf16.msra.mxu1 %v6988_v58 }
 0x214   :  { %6534 = vmatprep.subr.bf16.mxu1 %v6990_v14 }
 0x217   :  { %6535 = vmatpush3.bf16.msra.mxu1 %v6992_v60 }
 0x218   :  { %6536 = vmatprep.subr.bf16.mxu1 %v6994_v19 }
 0x21b   :  { %6537 = vmatpush3.bf16.msra.mxu1 %v6996_v63 }
 0x21c   :  { %6538 = vmatprep.subr.bf16.mxu1 %v6998_v2 }
 0x21f   :  { %6539 = vmatpush3.bf16.msra.mxu1 %v6999_v41 }
 0x220   :  { %6540 = vmatprep.subr.bf16.mxu1 %v7000_v3 }
 0x223   :  { %6541 = vmatpush3.bf16.msra.mxu1 %v7001_v25 }
 0x224   :  { %6542 = vmatprep.subr.bf16.mxu1 %v7002_v37 }
 0x227   :  { %6543 = vmatpush3.bf16.msra.mxu1 %v7003_v43 }
 0x228   :  { %6544 = vmatprep.subr.bf16.mxu1 %v7004_v38 }
 0x22b   :  { %6545 = vmatpush3.bf16.msra.mxu1 %v7005_v5 }
 0x22c   :  { %6797 = vmatprep.subr.bf16.mxu1 %v7331_v34 }
 0x22e   :  { %2656 = vmatmul.mubr.bf16.vlgmr.msra.gmra.mxu1 %v5698_v13 }
 0x22f   :  { %6798 = vmatpush3.bf16.msra.mxu1 %v7006_v18  ;;  %6813 = vmatprep.mubr.msk.bf16.mxu1 %vm8490_vm5, %v7331_v34 }
 0x230   :  { %6799 = vmatprep.subr.bf16.mxu1 %v7331_v34 }
 0x233   :  { %6800 = vmatpush3.bf16.msra.mxu1 %v7007_v4 }
 0x234   :  { %6801 = vmatprep.subr.bf16.mxu1 %v7331_v34 }
 0x237   :  { %6802 = vmatpush3.bf16.msra.mxu1 %v7008_v59 }
 0x238   :  { %6803 = vmatprep.subr.bf16.mxu1 %v7331_v34 }
 0x23b   :  { %6804 = vmatpush3.bf16.msra.mxu1 %v7009_v62 }
 0x23c   :  { %6805 = vmatprep.subr.bf16.mxu1 %v7331_v34 }
 0x23f   :  { %6806 = vmatpush3.bf16.msra.mxu1 %v7010_v6 }
 0x240   :  { %6807 = vmatprep.subr.bf16.mxu1 %v7331_v34 }
 0x243   :  { %6808 = vmatpush3.bf16.msra.mxu1 %v7011_v9 }
 0x244   :  { %6809 = vmatprep.subr.bf16.mxu1 %v7331_v34 }
 0x247   :  { %6810 = vmatpush3.bf16.msra.mxu1 %v7012_v10 }
 0x248   :  { %6811 = vmatprep.subr.bf16.mxu1 %v7331_v34 }
 0x24b   :  { %6812 = vmatpush3.bf16.msra.mxu1 %v7013_v12 }
 0x24c   :  { %6605 = vmatprep.subr.bf16.mxu1 %v7015_v54 }
 0x24e   :  { %6814 = vmatmul.mubr.bf16.vlgmr.msra.gmra.mxu1 %v7014_v39 }
 0x24f   :  { %6606 = vmatpush3.bf16.msra.mxu1 %v7016_v26  ;;  %v7055_v26 = vld [vmem:[#allocation9 + $0x178] sm:$0xff]  }
 0x250   :  { %6607 = vmatprep.subr.bf16.mxu1 %v7017_v44  ;;  %6627 = vmatprep.subr.bf16.mxu0 %v7055_v26 }
 0x253   :  { %6608 = vmatpush3.bf16.msra.mxu1 %v7018_v27 }
 0x254   :  { %6609 = vmatprep.subr.bf16.mxu1 %v7019_v7 }
 0x257   :  { %6610 = vmatpush3.bf16.msra.mxu1 %v7020_v29 }
 0x258   :  { %6611 = vmatprep.subr.bf16.mxu1 %v7021_v8 }
 0x25b   :  { %6612 = vmatpush3.bf16.msra.mxu1 %v7022_v35 }
 0x25c   :  { %6613 = vmatprep.subr.bf16.mxu1 %v7024_v0 }
 0x25f   :  { %6614 = vmatpush3.bf16.msra.mxu1 %v7026_v57 }
 0x260   :  { %6615 = vmatprep.subr.bf16.mxu1 %v7028_v30 }
 0x263   :  { %6616 = vmatpush3.bf16.msra.mxu1 %v7030_v40 }
 0x264   :  { %6617 = vmatprep.subr.bf16.mxu1 %v7032_v46 }
 0x267   :  { %6618 = vmatpush3.bf16.msra.mxu1 %v7034_v48 }
 0x268   :  { %6619 = vmatprep.subr.bf16.mxu1 %v7036_v52 }
 0x26b   :  { %6620 = vmatpush3.bf16.msra.mxu1 %v7038_v42 }
 0x26c   :  { %6649 = vmatprep.subr.bf16.mxu1 %v7040_v32 }
 0x28d   :  { %v6524_v31 = vpop.f32.mrf.mxu0 }
 0x28f   :  { %v6525_v15 = vpop.f32.mrf.mxu0 }
 0x290   :  { %v6526_v3 = vadd.f32 %v6525_v15, %v6524_v31 }
 0x291   :  { %v6527_v49 = vpop.f32.mrf.mxu0 }
 0x293   :  { %v6528_v14 = vpop.f32.mrf.mxu0 }
 0x294   :  { %v6529_v18 = vadd.f32 %v6528_v14, %v6527_v49 }
 0x2ad   :  { %v6568_v19 = vpop.f32.mrf.mxu0 }
 0x2af   :  { %v6569_v41 = vpop.f32.mrf.mxu0 }
 0x2b0   :  { %v6570_v62 = vadd.f32 %v6569_v41, %v6568_v19 }
 0x2b1   :  { %v6571_v5 = vpop.f32.mrf.mxu0 }
 0x2b3   :  { %v6572_v6 = vpop.f32.mrf.mxu0 }
 0x2b4   :  { %v6573_v39 = vadd.f32 %v6572_v6, %v6571_v5 }
 0x2ce   :  { %v6502_v61 = vpop.f32.mrf.mxu1 }
 0x2d0   :  { %v6503_v51 = vpop.f32.mrf.mxu1 }
 0x2d1   :  { %v6504_v2 = vadd.f32 %v6503_v51, %v6502_v61 }
 0x2d2   :  { %v6505_v22 = vpop.f32.mrf.mxu1 }
 0x2d3   :  { %v2617_v43 = vadd.f32 %v6526_v3, %v6504_v2 }
 0x2d4   :  { %v6506_v55 = vpop.f32.mrf.mxu1 }
 0x2d5   :  { %v6507_v38 = vadd.f32 %v6506_v55, %v6505_v22 }
 0x2d7   :  { %v2620_v59 = vadd.f32 %v6529_v18, %v6507_v38 }
 0x2ee   :  { %v6546_v58 = vpop.f32.mrf.mxu1 }
 0x2f0   :  { %v6547_v60 = vpop.f32.mrf.mxu1 }
 0x2f1   :  { %v6548_v25 = vadd.f32 %v6547_v60, %v6546_v58 }
 0x2f2   :  { %v6549_v63 = vpop.f32.mrf.mxu1 }
 0x2f3   :  { %v2658_v13 = vadd.f32 %v6548_v25, %v2617_v43 }
 0x2f4   :  { %v6550_v37 = vpop.f32.mrf.mxu1 }
 0x2f5   :  { %v6551_v4 = vadd.f32 %v6550_v37, %v6549_v63  ;;  %v2699_v10 = vadd.f32 %v6570_v62, %v2658_v13 }
 0x2f7   :  { %v2661_v9 = vadd.f32 %v6551_v4, %v2620_v59 }
 0x2f9   :  { %v2702_v27 = vadd.f32 %v6573_v39, %v2661_v9 }
 0x30e   :  { %v2739_v12 = vpop.f32.mrf.mxu1 }
 0x30f   :  { %v7927_v54 = vadd.f32 %v2739_v12, %v2699_v10 }
 0x310   :  { %v6815_v44 = vpop.f32.mrf.mxu1 }
 0x311   :  { %vm2756_vm15 = vcmp.ge.f32.partialorder %v7927_v54, -1.8  ;;  %vm2758_vm7 = vcmp.lt.f32.partialorder %v7927_v54, -1.4  ;;  %vm2766_vm8 = vcmp.ge.f32.partialorder %v7927_v54, -1.4 }
 0x312   :  { %v2742_v24 = vpop.f32.mrf.mxu1  ;;  %vm7932_vm9 = vmand %vm2756_vm15, %vm2758_vm7  ;;  %vm2768_vm10 = vcmp.lt.f32.partialorder %v7927_v54, -1.0  ;;  %vm2776_vm12 = vcmp.ge.f32.partialorder %v7927_v54, -1.0  ;;  %vm2778_vm0 = vcmp.lt.f32.partialorder %v7927_v54, -0.6  ;;  %vm2786_vm1 = vcmp.ge.f32.partialorder %v7927_v54, -0.6 }
 0x313   :  { %v7940_v21 = vadd.f32 %v2742_v24, %v2702_v27  ;;  %vm7942_vm11 = vmand %vm2766_vm8, %vm2768_vm10  ;;  %vm2788_vm3 = vcmp.lt.f32.partialorder %v7927_v54, -0.2  ;;  %v7953_v33 = vmul.f32 2.5, %v7927_v54  ;;  %v7969_v28 = vsel %vm7932_vm9, 1.0, %v7331_v34 }
 0x314   :  { %v6816_v11 = vpop.f32.mrf.mxu1  ;;  %vm7947_vm2 = vmand %vm2776_vm12, %vm2778_vm0  ;;  %v5779_v35 = vsel %vm7942_vm11, 1.0, %v7331_v34  ;;  %v7984_v47 = vmul.f32 1.25, %v7927_v54 }
 0x315   :  { %vm2747_vm6 = vcmp.ge.f32.partialorder %v7940_v21, -2.2  ;;  %vm2749_vm13 = vcmp.lt.f32.partialorder %v7940_v21, -1.8  ;;  %vm2757_vm14 = vcmp.ge.f32.partialorder %v7940_v21, -1.8  ;;  %vm7958_vm15 = vmand %vm2786_vm1, %vm2788_vm3 }
 0x316   :  { %vm2751_vm7 = vmand %vm2747_vm6, %vm2749_vm13  ;;  %vm2759_vm8 = vcmp.lt.f32.partialorder %v7940_v21, -1.4  ;;  %vm2767_vm10 = vcmp.ge.f32.partialorder %v7940_v21, -1.4  ;;  %vm2769_vm12 = vcmp.lt.f32.partialorder %v7940_v21, -1.0  ;;  %vm2777_vm0 = vcmp.ge.f32.partialorder %v7940_v21, -1.0 }
 0x317   :  { %vm2761_vm4 = vmand %vm2757_vm14, %vm2759_vm8  ;;  %vm2779_vm1 = vcmp.lt.f32.partialorder %v7940_v21, -0.6  ;;  %vm2787_vm3 = vcmp.ge.f32.partialorder %v7940_v21, -0.6  ;;  %v5776_v50 = vsel %vm2751_vm7, 1.0, %v7331_v34  ;;  %v5781_v20 = vsel %vm7947_vm2, 1.0, %v7331_v34 }
 0x318   :  { %vm7977_vm6 = vmand %vm2767_vm10, %vm2769_vm12  ;;  %vm2789_vm13 = vcmp.lt.f32.partialorder %v7940_v21, -0.2  ;;  %vm2798_vm14 = vcmp.lt.f32.partialorder %v7927_v54, 0.2  ;;  %vm2797_vm11 = vcmp.ge.f32.partialorder %v7940_v21, -0.2 }
 0x319   :  { %vm7986_vm9 = vmand %vm2777_vm0, %vm2779_vm1  ;;  %vm2799_vm7 = vcmp.lt.f32.partialorder %v7940_v21, 0.2  ;;  %v7996_v30 = vmul.f32 2.5, %v7940_v21  ;;  %v5778_v40 = vsel %vm2761_vm4, 1.0, %v7331_v34  ;;  %vm2807_vm10 = vcmp.ge.f32.partialorder %v7940_v21, 0.2 }
 0x31a   :  { %vm2791_vm8 = vmand %vm2787_vm3, %vm2789_vm13  ;;  %v5799_v46 = vadd.f32 4.5, %v7953_v33  ;;  %v5801_v48 = vadd.f32 3.5, %v7953_v33  ;;  %vm8503_vm12 = vcmp.ge.f32.partialorder %v7927_v54, -0.2  ;;  %vm2809_vm2 = vcmp.lt.f32.partialorder %v7940_v21, 0.6 }
 0x31b   :  { %vm2800_vm0 = vmand %vm8503_vm12, %vm2798_vm14  ;;  %v5798_v52 = vadd.f32 5.5, %v7996_v30  ;;  %v5800_v42 = vadd.f32 4.5, %v7996_v30  ;;  %v5802_v32 = vadd.f32 3.5, %v7996_v30  ;;  %v5780_v53 = vsel %vm7977_vm6, 1.0, %v7331_v34 }
 0x31c   :  { %v5782_v61 = vsel %vm7986_vm9, 1.0, %v7331_v34  ;;  %v5783_v36 = vsel %vm7958_vm15, 1.0, %v7331_v34  ;;  %vm2801_vm4 = vmand %vm2797_vm11, %vm2799_vm7  ;;  %v2872_v45 = vsub.f32 2.0, %v5799_v46  ;;  %v5784_v56 = vsel %vm2791_vm8, 1.0, %v7331_v34 }
 0x31d   :  { %v8023_v51 = vsel %vm2800_vm0, 1.0, %v7331_v34  ;;  %v2863_v17 = vsub.f32 2.0, %v5798_v52  ;;  %v2870_v16 = vmul.f32 %v5799_v46, %v7969_v28  ;;  %v5786_v31 = vsel %vm2801_vm4, 1.0, %v7331_v34  ;;  %vm2811_vm1 = vmand %vm2807_vm10, %vm2809_vm2 }
 0x31e   :  { %v2873_v22 = vsub.f32 2.0, %v5800_v42  ;;  %v2874_v1 = vmul.f32 %v5779_v35, %v2872_v45  ;;  %v2880_v15 = vmul.f32 %v5801_v48, %v5779_v35  ;;  %v2882_v49 = vsub.f32 2.0, %v5801_v48 }
 0x31f   :  { %v2865_v55 = vmul.f32 %v5778_v40, %v2863_v17  ;;  %v2883_v58 = vsub.f32 2.0, %v5802_v32  ;;  %v5803_v14 = vadd.f32 2.5, %v7953_v33  ;;  %v2861_v60 = vmul.f32 %v5798_v52, %v5776_v50 }
 0x320   :  { %v2875_v19 = vmul.f32 %v5780_v53, %v2873_v22  ;;  %v5804_v63 = vadd.f32 2.5, %v7996_v30  ;;  %v5805_v2 = vadd.f32 1.5, %v7953_v33  ;;  %v8033_v41 = vsel %vm2811_vm1, 1.0, %v7331_v34 }
 0x321   :  { %v2871_v3 = vmul.f32 %v5800_v42, %v5778_v40  ;;  %v8035_v25 = vadd.f32 %v2874_v1, %v2870_v16  ;;  %v2881_v37 = vmul.f32 %v5802_v32, %v5780_v53  ;;  %v2884_v43 = vmul.f32 %v5781_v20, %v2882_v49 }
 0x322   :  { %v2885_v38 = vmul.f32 %v5782_v61, %v2883_v58  ;;  %v2892_v5 = vsub.f32 2.0, %v5803_v14  ;;  %v2893_v18 = vsub.f32 2.0, %v5804_v63  ;;  %v2867_v13 = vadd.f32 %v2865_v55, %v2861_v60 }
 0x323   :  { %v2877_v4 = vadd.f32 %v2875_v19, %v2871_v3  ;;  %v2890_v59 = vmul.f32 %v5803_v14, %v5781_v20  ;;  %v5806_v62 = vadd.f32 1.5, %v7996_v30  ;;  %v2902_v10 = vsub.f32 2.0, %v5805_v2 }
 0x324   :  { %v2894_v6 = vmul.f32 %v5783_v36, %v2892_v5  ;;  %v2895_v9 = vmul.f32 %v5784_v56, %v2893_v18  ;;  %v5808_v12 = vadd.f32 0.5, %v7996_v30  ;;  %v2891_v39 = vmul.f32 %v5804_v63, %v5782_v61 }
 0x325   :  { %v2903_v26 = vsub.f32 2.0, %v5806_v62  ;;  %v8040_v44 = vmul.f32 1.25, %v7940_v21  ;;  %v5819_v27 = vadd.f32 2.25, %v7984_v47  ;;  %v2886_v24 = vadd.f32 %v2884_v43, %v2880_v15 }
 0x326   :  { %v2887_v7 = vadd.f32 %v2885_v38, %v2881_v37  ;;  %v2900_v23 = vmul.f32 %v5805_v2, %v5783_v36  ;;  %v2904_v11 = vmul.f32 %v8023_v51, %v2902_v10  ;;  %v2901_v29 = vmul.f32 %v5806_v62, %v5784_v56 }
 0x327   :  { %v2913_v8 = vsub.f32 2.0, %v5808_v12  ;;  %v5818_v35 = vadd.f32 2.75, %v8040_v44  ;;  %v5820_v50 = vadd.f32 2.25, %v8040_v44  ;;  %v2896_v0 = vadd.f32 %v2894_v6, %v2890_v59 }
 0x328   :  { %v2897_v57 = vadd.f32 %v2895_v9, %v2891_v39  ;;  %v2905_v20 = vmul.f32 %v5786_v31, %v2903_v26  ;;  %v5821_v40 = vadd.f32 1.75, %v7984_v47  ;;  %v8047_v46 = vadd.f32 %v2904_v11, %v2900_v23 }
 0x329   :  { %v2911_v48 = vmul.f32 %v5808_v12, %v5786_v31  ;;  %v2965_v52 = vsub.f32 1.5, %v5818_v35  ;;  %v2974_v42 = vsub.f32 1.5, %v5819_v27  ;;  %v2915_v32 = vmul.f32 %v8033_v41, %v2913_v8 }
 0x32a   :  { %v2972_v53 = vmul.f32 %v5819_v27, %v8035_v25  ;;  %v2975_v61 = vsub.f32 1.5, %v5820_v50  ;;  %v5822_v36 = vadd.f32 1.75, %v8040_v44  ;;  %v2963_v45 = vmul.f32 %v5818_v35, %v2867_v13 }
 0x32b   :  { %v2967_v56 = vmul.f32 %v2965_v52, %v2877_v4  ;;  %v2976_v17 = vmul.f32 %v2974_v42, %v2886_v24  ;;  %v2984_v16 = vsub.f32 1.5, %v5821_v40  ;;  %v2907_v22 = vadd.f32 %v2905_v20, %v2901_v29 }
 0x32c   :  { %v2973_v1 = vmul.f32 %v5820_v50, %v2877_v4  ;;  %v2977_v15 = vmul.f32 %v2975_v61, %v2887_v7  ;;  %v2985_v55 = vsub.f32 1.5, %v5822_v36  ;;  %v2982_v49 = vmul.f32 %v5821_v40, %v2886_v24 }
 0x32d   :  { %v2986_v58 = vmul.f32 %v2984_v16, %v2896_v0  ;;  %v5823_v31 = vadd.f32 1.25, %v7984_v47  ;;  %v5824_v14 = vadd.f32 1.25, %v8040_v44  ;;  %v2983_v60 = vmul.f32 %v5822_v36, %v2887_v7 }
 0x32e   :  { %v2987_v19 = vmul.f32 %v2985_v55, %v2897_v57  ;;  %v5826_v63 = vadd.f32 0.75, %v8040_v44  ;;  %v8056_v2 = vmul.f32 0.8333333, %v7927_v54  ;;  %v8058_v3 = vadd.f32 %v2915_v32, %v2911_v48 }
 0x32f   :  { %v2969_v37 = vadd.f32 %v2967_v56, %v2963_v45  ;;  %v8060_v43 = vadd.f32 %v2976_v17, %v2972_v53  ;;  %v2994_v38 = vsub.f32 1.5, %v5823_v31  ;;  %v2979_v5 = vadd.f32 %v2977_v15, %v2973_v1 }
 0x330   :  { %v2992_v18 = vmul.f32 %v5823_v31, %v2896_v0  ;;  %v2993_v13 = vmul.f32 %v5824_v14, %v2897_v57  ;;  %v2995_v4 = vsub.f32 1.5, %v5824_v14  ;;  %v2988_v59 = vadd.f32 %v2986_v58, %v2982_v49 }
 0x331   :  { %v2996_v62 = vmul.f32 %v2994_v38, %v8047_v46  ;;  %v3005_v6 = vsub.f32 1.5, %v5826_v63  ;;  %v8064_v9 = vmul.f32 0.8333333, %v7940_v21  ;;  %v2989_v10 = vadd.f32 %v2987_v19, %v2983_v60 }
 0x332   :  { %v2997_v12 = vmul.f32 %v2995_v4, %v2907_v22  ;;  %v5837_v39 = vadd.f32 1.5, %v8056_v2  ;;  %v5839_v26 = vadd.f32 1.1666666, %v8056_v2  ;;  %v3003_v27 = vmul.f32 %v5826_v63, %v2907_v22 }
 0x333   :  { %v3007_v24 = vmul.f32 %v3005_v6, %v8058_v3  ;;  %v5836_v7 = vadd.f32 1.8333334, %v8064_v9  ;;  %v5838_v23 = vadd.f32 1.5, %v8064_v9  ;;  %v8071_v11 = vadd.f32 %v2996_v62, %v2992_v18 }
 0x334   :  { %v2999_v29 = vadd.f32 %v2997_v12, %v2993_v13  ;;  %v5840_v8 = vadd.f32 1.1666666, %v8064_v9  ;;  %vm2806_vm15 = vcmp.ge.f32.partialorder %v7927_v54, 0.2  ;;  %v3064_v20 = vmul.f32 %v5837_v39, %v8060_v43 }
 0x335   :  { %v3055_v35 = vmul.f32 %v5836_v7, %v2969_v37  ;;  %v3057_v50 = vsub.f32 1.3333334, %v5836_v7  ;;  %v3065_v0 = vmul.f32 %v5838_v23, %v2979_v5  ;;  %v3067_v57 = vsub.f32 1.3333334, %v5838_v23 }
 0x336   :  { %v3066_v40 = vsub.f32 1.3333334, %v5837_v39  ;;  %v3076_v48 = vsub.f32 1.3333334, %v5839_v26  ;;  %vm2808_vm3 = vcmp.lt.f32.partialorder %v7927_v54, 0.6  ;;  %v8078_v61 = vadd.f32 %v3007_v24, %v3003_v27 }
 0x337   :  { %v3059_v52 = vmul.f32 %v3057_v50, %v2979_v5  ;;  %v3069_v42 = vmul.f32 %v3067_v57, %v2989_v10  ;;  %v3077_v32 = vsub.f32 1.3333334, %v5840_v8  ;;  %v5842_v53 = vadd.f32 0.8333333, %v8064_v9  ;;  %vm8090_vm11 = vmand %vm2806_vm15, %vm2808_vm3 }
 0x338   :  { %v3068_v36 = vmul.f32 %v3066_v40, %v2988_v59  ;;  %v3074_v45 = vmul.f32 %v5839_v26, %v2988_v59  ;;  %v3075_v56 = vmul.f32 %v5840_v8, %v2989_v10  ;;  %v3078_v22 = vmul.f32 %v3076_v48, %v8071_v11 }
 0x339   :  { %v3061_v17 = vadd.f32 %v3059_v52, %v3055_v35  ;;  %v3071_v16 = vadd.f32 %v3069_v42, %v3065_v0  ;;  %v3079_v1 = vmul.f32 %v3077_v32, %v2999_v29  ;;  %v3085_v15 = vmul.f32 %v5842_v53, %v2999_v29 }
 0x33a   :  { %v3087_v55 = vsub.f32 1.3333334, %v5842_v53  ;;  %vm2816_vm6 = vcmp.ge.f32.partialorder %v7927_v54, 0.6  ;;  %vm2818_vm13 = vcmp.lt.f32.partialorder %v7927_v54, 1.0  ;;  %vm2819_vm9 = vcmp.lt.f32.partialorder %v7940_v21, 1.0 }
 0x33b   :  { %v6289_v49 = vpack.c.bf16 %v3071_v16, %v3061_v17  ;;  %vm2817_vm14 = vcmp.ge.f32.partialorder %v7940_v21, 0.6  ;;  %v3070_v58 = vadd.f32 %v3068_v36, %v3064_v20  ;;  %v3081_v31 = vadd.f32 %v3079_v1, %v3075_v56  ;;  %vm8095_vm8 = vmand %vm2816_vm6, %vm2818_vm13 }
 0x33c   :  { %v3089_v14 = vmul.f32 %v3087_v55, %v8078_v61  ;;  %vm2826_vm7 = vcmp.ge.f32.partialorder %v7927_v54, 1.0  ;;  %vm2827_vm10 = vcmp.ge.f32.partialorder %v7940_v21, 1.0  ;;  %vm2828_vm12 = vcmp.lt.f32.partialorder %v7927_v54, 1.4  ;;  %vm8105_vm2 = vmand %vm2817_vm14, %vm2819_vm9 }
 0x33d   :  { %6375 = vst [vmem:[#allocation2 + $0x28] sm:$0xff] %v6289_v49   ;;  %vm2829_vm0 = vcmp.lt.f32.partialorder %v7940_v21, 1.4  ;;  %v5807_v63 = vadd.f32 0.5, %v7953_v33  ;;  %v3080_v37 = vadd.f32 %v3078_v22, %v3074_v45  ;;  %vm2836_vm4 = vcmp.ge.f32.partialorder %v7927_v54, 1.4  ;;  %vm8111_vm15 = vmand %vm2826_vm7, %vm2828_vm12 }
 0x33e   :  { %v3091_v38 = vadd.f32 %v3089_v14, %v3085_v15  ;;  %vm2838_vm1 = vcmp.lt.f32.partialorder %v7927_v54, 1.8  ;;  %vm2837_vm3 = vcmp.ge.f32.partialorder %v7940_v21, 1.4  ;;  %vm2839_vm6 = vcmp.lt.f32.partialorder %v7940_v21, 1.8  ;;  %vm8117_vm13 = vmand %vm2827_vm10, %vm2829_vm0 }
 0x33f   :  { %vm2847_vm14 = vcmp.ge.f32.partialorder %v7940_v21, 1.8  ;;  %vm2849_vm9 = vcmp.lt.f32.partialorder %v7940_v21, 2.2  ;;  %v2912_v59 = vsub.f32 2.0, %v5807_v63  ;;  %vm8123_vm5 = vmand %vm2836_vm4, %vm2838_vm1  ;;  %v5809_v6 = vadd.f32 -0.5, %v7953_v33 }
 0x340   :  { %v6299_v13 = vpack.c.bf16 %v3091_v38, %v3081_v31  ;;  %v5810_v10 = vadd.f32 -0.5, %v7996_v30  ;;  %v5811_v12 = vadd.f32 -1.5, %v7953_v33  ;;  %v6294_v39 = vpack.c.bf16 %v3080_v37, %v3070_v58  ;;  %vm8133_vm7 = vmand %vm2837_vm3, %vm2839_vm6  ;;  %v7042_v37 = vld [vmem:[#allocation9 + $0x1b8] sm:$0xff]  }
 0x341   :  { %v5787_v26 = vsel %vm8090_vm11, 1.0, %v7331_v34  ;;  %v5812_v24 = vadd.f32 -1.5, %v7996_v30  ;;  %v5813_v7 = vadd.f32 -2.5, %v7953_v33  ;;  %v5789_v23 = vsel %vm8095_vm8, 1.0, %v7331_v34  ;;  %vm2851_vm10 = vmand %vm2847_vm14, %vm2849_vm9 }
 0x342   :  { %6377 = vst [vmem:[#allocation2 + $0x30] sm:$0xff] %v6299_v13   ;;  %v5790_v29 = vsel %vm8105_vm2, 1.0, %v7331_v34  ;;  %v2914_v8 = vmul.f32 %v5787_v26, %v2912_v59  ;;  %v2922_v35 = vsub.f32 2.0, %v5809_v6  ;;  %v5791_v50 = vsel %vm8111_vm15, 1.0, %v7331_v34 }
 0x343   :  { %v5792_v0 = vsel %vm8117_vm13, 1.0, %v7331_v34  ;;  %v2910_v57 = vmul.f32 %v5807_v63, %v8023_v51  ;;  %v2923_v20 = vsub.f32 2.0, %v5810_v10  ;;  %v8157_v40 = vsel %vm8123_vm5, 1.0, %v7331_v34 }
 0x344   :  { %v2932_v48 = vsub.f32 2.0, %v5811_v12  ;;  %v2933_v52 = vsub.f32 2.0, %v5812_v24  ;;  %v5814_v42 = vadd.f32 -2.5, %v7996_v30  ;;  %v5794_v32 = vsel %vm8133_vm7, 1.0, %v7331_v34 }
 0x345   :  { %v5796_v53 = vsel %vm2851_vm10, 1.0, %v7331_v34  ;;  %v2924_v36 = vmul.f32 %v5789_v23, %v2922_v35  ;;  %v2942_v45 = vsub.f32 2.0, %v5813_v7  ;;  %v8164_v56 = vadd.f32 %v2914_v8, %v2910_v57  ;;  %v7046_v8 = vld [vmem:[#allocation9 + $0x1b0] sm:$0xff]  }
 0x346   :  { %v2920_v51 = vmul.f32 %v5809_v6, %v5787_v26  ;;  %v2921_v17 = vmul.f32 %v5810_v10, %v8033_v41  ;;  %v2930_v16 = vmul.f32 %v5811_v12, %v5789_v23  ;;  %v2925_v22 = vmul.f32 %v5790_v29, %v2923_v20  ;;  %v7048_v20 = vld [vmem:[#allocation9 + $0x1e8] sm:$0xff]  }
 0x347   :  { %v2931_v1 = vmul.f32 %v5812_v24, %v5790_v29  ;;  %v2943_v15 = vsub.f32 2.0, %v5814_v42  ;;  %v5816_v55 = vadd.f32 -3.5, %v7996_v30  ;;  %v2934_v58 = vmul.f32 %v5791_v50, %v2932_v48  ;;  %v7044_v30 = vld [vmem:[#allocation9 + $0x1f0] sm:$0xff]  }
 0x348   :  { %v2935_v31 = vmul.f32 %v5792_v0, %v2933_v52  ;;  %v2940_v14 = vmul.f32 %v5813_v7, %v5791_v50  ;;  %v2944_v60 = vmul.f32 %v8157_v40, %v2942_v45  ;;  %v2926_v38 = vadd.f32 %v2924_v36, %v2920_v51 }
 0x349   :  { %v3242_v49 = vld [vmem:[#allocation2 + $0x2c] sm:$0xff]  ;;  %v8170_v5 = vadd.f32 -3.5, %v7953_v33  ;;  %v2945_v41 = vmul.f32 %v5794_v32, %v2943_v15  ;;  %v2953_v18 = vsub.f32 2.0, %v5816_v55  ;;  %v5827_v13 = vadd.f32 0.25, %v7984_v47 }
 0x34a   :  { %v5874_v19 = vcombine.high %v6294_v39, %v3242_v49  ;;  %v5873_v63 = vcombine.low %v6294_v39, %v3242_v49  ;;  %v5828_v4 = vadd.f32 0.25, %v8040_v44  ;;  %v2927_v59 = vadd.f32 %v2925_v22, %v2921_v17 }
 0x34b   :  { %v2941_v62 = vmul.f32 %v5814_v42, %v5792_v0  ;;  %v5829_v6 = vadd.f32 -0.25, %v7984_v47  ;;  %v5830_v10 = vadd.f32 -0.25, %v8040_v44  ;;  %v2936_v12 = vadd.f32 %v2934_v58, %v2930_v16 }
 0x34c   :  { %3941 = vmatprep.mubr.bf16.mxu1 %v5874_v19  ;;  %v2937_v39 = vadd.f32 %v2935_v31, %v2931_v1  ;;  %v8176_v26 = vadd.f32 %v2944_v60, %v2940_v14  ;;  %v2951_v27 = vmul.f32 %v5816_v55, %v5794_v32  ;;  %v2955_v24 = vmul.f32 %v5796_v53, %v2953_v18  ;;  %v7052_v31 = vld [vmem:[#allocation9 + $0x1e0] sm:$0xff]  }
 0x34d   :  { %3942 = vmatmul.mubr.bf16.vlgmr.msra.gmra.mxu1 %v5873_v63  ;;  %v3014_v7 = vsub.f32 1.5, %v5827_v13  ;;  %v3015_v23 = vsub.f32 1.5, %v5828_v4  ;;  %v5831_v29 = vadd.f32 -0.75, %v7984_v47  ;;  %v2947_v35 = vadd.f32 %v2945_v41, %v2941_v62 }
 0x34e   :  { %6650 = vmatpush3.bf16.msra.mxu1 %v7042_v37  ;;  %v3013_v50 = vmul.f32 %v5828_v4, %v8058_v3  ;;  %v3025_v0 = vsub.f32 1.5, %v5830_v10  ;;  %v5832_v57 = vadd.f32 -0.75, %v8040_v44  ;;  %v3012_v48 = vmul.f32 %v5827_v13, %v8164_v56  ;;  %v7050_v3 = vld [vmem:[#allocation9 + $0x1a8] sm:$0xff]  }
 0x34f   :  { %6651 = vmatprep.subr.bf16.mxu1 %v7044_v30  ;;  %v3016_v52 = vmul.f32 %v3014_v7, %v2926_v38  ;;  %v3017_v42 = vmul.f32 %v3015_v23, %v2927_v59  ;;  %v3024_v32 = vsub.f32 1.5, %v5829_v6  ;;  %v3022_v36 = vmul.f32 %v5829_v6, %v2926_v38 }
 0x350   :  { %v3023_v53 = vmul.f32 %v5830_v10, %v2927_v59  ;;  %v3027_v45 = vmul.f32 %v3025_v0, %v2937_v39  ;;  %v3035_v51 = vsub.f32 1.5, %v5832_v57  ;;  %v2957_v17 = vadd.f32 %v2955_v24, %v2951_v27  ;;  %v7054_v59 = vld [vmem:[#allocation9 + $0x1a0] sm:$0xff]  }
 0x351   :  { %v3026_v16 = vmul.f32 %v3024_v32, %v2936_v12  ;;  %v3033_v22 = vmul.f32 %v5832_v57, %v2937_v39  ;;  %v3034_v1 = vsub.f32 1.5, %v5831_v29  ;;  %v3019_v15 = vadd.f32 %v3017_v42, %v3013_v50  ;;  %v7056_v39 = vld [vmem:[#allocation9 + $0x1d8] sm:$0xff]  }
 0x352   :  { %6652 = vmatpush3.bf16.msra.mxu1 %v7046_v8  ;;  %v3037_v55 = vmul.f32 %v3035_v51, %v2947_v35  ;;  %v5834_v49 = vadd.f32 -1.25, %v8040_v44  ;;  %v5844_v58 = vadd.f32 0.5, %v8064_v9  ;;  %v8184_v14 = vadd.f32 %v3016_v52, %v3012_v48  ;;  %v7058_v48 = vld [vmem:[#allocation9 + $0x198] sm:$0xff]  }
 0x353   :  { %6653 = vmatprep.subr.bf16.mxu1 %v7048_v20  ;;  %v3032_v60 = vmul.f32 %v5831_v29, %v2936_v12  ;;  %v3036_v19 = vmul.f32 %v3034_v1, %v8176_v26  ;;  %v5846_v63 = vadd.f32 0.16666667, %v8064_v9  ;;  %v3029_v37 = vadd.f32 %v3027_v45, %v3023_v53  ;;  %v7060_v53 = vld [vmem:[#allocation9 + $0x1d0] sm:$0xff]  }
 0x354   :  { %v3043_v38 = vmul.f32 %v5834_v49, %v2947_v35  ;;  %v3045_v41 = vsub.f32 1.5, %v5834_v49  ;;  %v5845_v18 = vadd.f32 0.16666667, %v8056_v2  ;;  %v3028_v13 = vadd.f32 %v3026_v16, %v3022_v36  ;;  %v7062_v49 = vld [vmem:[#allocation9 + $0x190] sm:$0xff]  }
 0x355   :  { %v3039_v4 = vadd.f32 %v3037_v55, %v3033_v22  ;;  %v3095_v44 = vmul.f32 %v5844_v58, %v8078_v61  ;;  %v3097_v30 = vsub.f32 1.3333334, %v5844_v58  ;;  %v3105_v6 = vmul.f32 %v5846_v63, %v3019_v15 }
 0x356   :  { %6654 = vmatpush3.bf16.msra.mxu1 %v7050_v3  ;;  %v3047_v62 = vmul.f32 %v3045_v41, %v2957_v17  ;;  %v3107_v10 = vsub.f32 1.3333334, %v5846_v63  ;;  %v5848_v12 = vadd.f32 -0.16666667, %v8064_v9  ;;  %v2952_v27 = vsub.f32 2.0, %v8170_v5  ;;  %v7064_v63 = vld [vmem:[#allocation9 + $0x1c8] sm:$0xff]  }
 0x357   :  { %6655 = vmatprep.subr.bf16.mxu1 %v7052_v31  ;;  %v3099_v24 = vmul.f32 %v3097_v30, %v3019_v15  ;;  %v5847_v7 = vadd.f32 -0.16666667, %v8056_v2  ;;  %v5850_v23 = vadd.f32 -0.5, %v8064_v9  ;;  %v8194_v29 = vadd.f32 %v3036_v19, %v3032_v60 }
 0x358   :  { %v3049_v61 = vadd.f32 %v3047_v62, %v3043_v38  ;;  %v3106_v8 = vsub.f32 1.3333334, %v5845_v18  ;;  %v3109_v35 = vmul.f32 %v3107_v10, %v3029_v37  ;;  %v3104_v0 = vmul.f32 %v5845_v18, %v8184_v14 }
 0x359   :  { %v3101_v50 = vadd.f32 %v3099_v24, %v3095_v44  ;;  %v3115_v57 = vmul.f32 %v5848_v12, %v3029_v37  ;;  %v3117_v20 = vsub.f32 1.3333334, %v5848_v12  ;;  %v3125_v32 = vmul.f32 %v5850_v23, %v3039_v4 }
 0x35a   :  { %6656 = vmatpush3.bf16.msra.mxu1 %v7054_v59  ;;  %v3108_v52 = vmul.f32 %v3106_v8, %v3028_v13  ;;  %v3111_v42 = vadd.f32 %v3109_v35, %v3105_v6  ;;  %v3127_v36 = vsub.f32 1.3333334, %v5850_v23  ;;  %v3116_v45 = vsub.f32 1.3333334, %v5847_v7  ;;  %v7066_v6 = vld [vmem:[#allocation9 + $0x188] sm:$0xff]  }
 0x35b   :  { %6657 = vmatprep.subr.bf16.mxu1 %v7056_v39  ;;  %v3119_v9 = vmul.f32 %v3117_v20, %v3039_v4  ;;  %vm2746_vm5 = vcmp.ge.f32.partialorder %v7927_v54, -2.2  ;;  %vm2748_vm11 = vcmp.lt.f32.partialorder %v7927_v54, -1.8  ;;  %v5797_v16 = vadd.f32 5.5, %v7953_v33 }
 0x35c   :  { %v3129_v51 = vmul.f32 %v3127_v36, %v3049_v61  ;;  %v6309_v17 = vpack.c.bf16 %v3111_v42, %v3101_v50  ;;  %vm2750_vm8 = vmand %vm2746_vm5, %vm2748_vm11  ;;  %v5817_v22 = vadd.f32 2.75, %v7984_v47  ;;  %v3114_v1 = vmul.f32 %v5847_v7, %v3028_v13 }
 0x35d   :  { %v3121_v3 = vadd.f32 %v3119_v9, %v3115_v57  ;;  %v5775_v15 = vsel %vm2750_vm8, 1.0, %v7331_v34  ;;  %v5835_v55 = vadd.f32 1.8333334, %v8056_v2  ;;  %v3118_v58 = vmul.f32 %v3116_v45, %v8194_v29 }
 0x35e   :  { %6658 = vmatpush3.bf16.msra.mxu1 %v7058_v48  ;;  %v3131_v31 = vadd.f32 %v3129_v51, %v3125_v32  ;;  %6379 = vst [vmem:[#allocation2 + $0x38] sm:$0xff] %v6309_v17   ;;  %v2862_v60 = vsub.f32 2.0, %v5797_v16  ;;  %v2964_v19 = vsub.f32 1.5, %v5817_v22  ;;  %v2860_v37 = vmul.f32 %v5797_v16, %v5775_v15 }
 0x35f   :  { %6659 = vmatprep.subr.bf16.mxu1 %v7060_v53  ;;  %v3056_v33 = vsub.f32 1.3333334, %v5835_v55  ;;  %v5851_v38 = vmul.f32 -1.442695, %v7927_v54  ;;  %v5852_v41 = vmul.f32 -1.442695, %v7940_v21  ;;  %v3120_v24 = vadd.f32 %v3118_v58, %v3114_v1 }
 0x360   :  { %v6319_v18 = vpack.c.bf16 %v3131_v31, %v3121_v3  ;;  %v2864_v13 = vmul.f32 %v7969_v28, %v2862_v60  ;;  %v2966_v4 = vmul.f32 %v2964_v19, %v8035_v25  ;;  %v5825_v44 = vadd.f32 0.75, %v7984_v47  ;;  %v7068_v28 = vld [vmem:[#allocation9 + $0x1c0] sm:$0xff]  }
 0x361   :  { %v3058_v30 = vmul.f32 %v3056_v33, %v8060_v43  ;;  %7177 = vpow2.f32 %v5851_v38  ;;  %v5841_v59 = vadd.f32 0.8333333, %v8056_v2  ;;  %v5843_v62 = vadd.f32 0.5, %v8056_v2 }
 0x362   :  { %6660 = vmatpush3.bf16.msra.mxu1 %v7062_v49  ;;  %6381 = vst [vmem:[#allocation2 + $0x40] sm:$0xff] %v6319_v18   ;;  %v2866_v10 = vadd.f32 %v2864_v13, %v2860_v37  ;;  %7179 = vpow2.f32 %v5852_v41  ;;  %v3002_v12 = vmul.f32 %v5825_v44, %v8047_v46  ;;  %v3004_v39 = vsub.f32 1.5, %v5825_v44  ;;  %v7070_v46 = vld [vmem:[#allocation9 + $0x180] sm:$0xff]   ;;  %v7059_v44 = vld [vmem:[#allocation9 + $0x170] sm:$0xff]  }
 0x363   :  { %6661 = vmatprep.subr.bf16.mxu1 %v7064_v63  ;;  %v3110_v25 = vadd.f32 %v3108_v52, %v3104_v0  ;;  %v3084_v7 = vmul.f32 %v5841_v59, %v8071_v11  ;;  %vm2846_vm12 = vcmp.ge.f32.partialorder %v7927_v54, 1.8  ;;  %v3096_v61 = vsub.f32 1.3333334, %v5843_v62 }
 0x364   :  { %v2962_v43 = vmul.f32 %v5817_v22, %v2866_v10  ;;  %v3006_v23 = vmul.f32 %v3004_v39, %v8164_v56  ;;  %vm2848_vm0 = vcmp.lt.f32.partialorder %v7927_v54, 2.2  ;;  %v5833_v8 = vadd.f32 -1.25, %v7984_v47  ;;  %v7071_v10 = vld [vmem:[#allocation9 + $0x158] sm:$0xff]   ;;  %v7073_v39 = vld [vmem:[#allocation9 + $0x150] sm:$0xff]  }
 0x365   :  { %v3086_v35 = vsub.f32 1.3333334, %v5841_v59  ;;  %vm2850_vm2 = vmand %vm2846_vm12, %vm2848_vm0  ;;  %v3098_v0 = vmul.f32 %v3096_v61, %v8184_v14  ;;  %v2950_v20 = vmul.f32 %v8170_v5, %v8157_v40  ;;  %v6314_v48 = vpack.c.bf16 %v3120_v24, %v3110_v25  ;;  %v3243_v41 = vld [vmem:[#allocation2 + $0x34] sm:$0xff]  ;;  %v7061_v59 = vld [vmem:[#allocation9 + $0x130] sm:$0xff]  }
 0x366   :  { %6662 = vmatpush3.bf16.msra.mxu1 %v7066_v6  ;;  %v2968_v50 = vadd.f32 %v2966_v4, %v2962_v43  ;;  %v3008_v57 = vadd.f32 %v3006_v23, %v3002_v12  ;;  %v5795_v11 = vsel %vm2850_vm2, 1.0, %v7331_v34  ;;  %v3042_v32 = vmul.f32 %v5833_v8, %v8176_v26  ;;  %v7057_v4 = vld [vmem:[#allocation9 + $0x138] sm:$0xff]   ;;  %v7069_v6 = vld [vmem:[#allocation9 + $0x120] sm:$0xff]   ;;  %v7075_v25 = vld [vmem:[#allocation9 + $0x148] sm:$0xff]  }
 0x367   :  { %6663 = vmatprep.subr.bf16.mxu1 %v7068_v28  ;;  %v2954_v56 = vmul.f32 %v5795_v11, %v2952_v27  ;;  %v5849_v36 = vadd.f32 -0.5, %v8056_v2  ;;  %v3044_v45 = vsub.f32 1.5, %v5833_v8  ;;  %v7072_v12 = vld [vmem:[#allocation9 + $0x118] sm:$0xff]   ;;  %v7074_v28 = vld [vmem:[#allocation9 + $0x110] sm:$0xff]   ;;  %v7076_v24 = vld [vmem:[#allocation9 + $0x108] sm:$0xff]   ;;  %vm8518_vm4 = vmmov 0  }
 0x368   :  { %v3054_v52 = vmul.f32 %v5835_v55, %v2968_v50  ;;  %v3088_v47 = vmul.f32 %v3086_v35, %v3008_v57  ;;  %v3094_v42 = vmul.f32 %v5843_v62, %v3008_v57  ;;  %v7065_v62 = vld [vmem:[#allocation9 + $0x128] sm:$0xff]   ;;  %v7078_v43 = vld [vmem:[#allocation9 + $0x100] sm:$0xff]   ;;  %v7079_v23 = vld [vmem:[#allocation9 + $0x238] sm:$0xff]  }
 0x369   :  { %v3244_v53 = vld [vmem:[#allocation2 + $0x3c] sm:$0xff]  ;;  %v2956_v14 = vadd.f32 %v2954_v56, %v2950_v20  ;;  %v3124_v27 = vmul.f32 %v5849_v36, %v8194_v29  ;;  %v3126_v26 = vsub.f32 1.3333334, %v5849_v36  ;;  %v7080_v8 = vld [vmem:[#allocation9 + $0x230] sm:$0xff]   ;;  %v7083_v50 = vld [vmem:[#allocation9 + $0x218] sm:$0xff]  }
 0x36a   :  { %6664 = vmatpush3.bf16.msra.mxu1 %v7070_v46  ;;  %v5878_v9 = vcombine.high %v6314_v48, %v3244_v53  ;;  %v3060_v51 = vadd.f32 %v3058_v30, %v3054_v52  ;;  %v3090_v17 = vadd.f32 %v3088_v47, %v3084_v7  ;;  %v3100_v16 = vadd.f32 %v3098_v0, %v3094_v42  ;;  %v7077_v7 = vld [vmem:[#allocation9 + $0x140] sm:$0xff]   ;;  %v7081_v35 = vld [vmem:[#allocation9 + $0x228] sm:$0xff]   ;;  %v7084_v57 = vld [vmem:[#allocation9 + $0x210] sm:$0xff]  }
 0x36b   :  { %v5877_v40 = vcombine.low %v6314_v48, %v3244_v53  ;;  %v3046_v22 = vmul.f32 %v3044_v45, %v2956_v14  ;;  %v7082_v46 = vld [vmem:[#allocation9 + $0x220] sm:$0xff]   ;;  %v7085_v0 = vld [vmem:[#allocation9 + $0x208] sm:$0xff]   ;;  %v7088_v56 = vld [vmem:[#allocation11 + $0xf8] sm:$0xff]  }
 0x36c   :  { %4023 = vmatprep.mubr.bf16.mxu1 %v5878_v9  ;;  %v8226_v5 = vpack.c.bf16 %v3100_v16, %v3090_v17  ;;  %v7086_v11 = vld [vmem:[#allocation9 + $0x200] sm:$0xff]   ;;  %v7089_v48 = vld [vmem:[#allocation11 + $0xb8] sm:$0xff]   ;;  %v7090_v52 = vld [vmem:[#allocation11 + $0xf0] sm:$0xff]  }
 0x36d   :  { %4024 = vmatmul.mubr.bf16.vlgmr.msra.gmra.mxu1 %v5877_v40  ;;  %v3048_v1 = vadd.f32 %v3046_v22, %v3042_v32  ;;  %v7091_v47 = vld [vmem:[#allocation11 + $0xb0] sm:$0xff]   ;;  %v7096_v42 = vld [vmem:[#allocation11 + $0x78] sm:$0xff]   ;;  %v7092_v32 = vld [vmem:[#allocation11 + $0xe8] sm:$0xff]  }
 0x36e   :  { %v7178_v3 = vpop.eup %7177  ;;  %v5876_v30 = vcombine.high %v8226_v5, %v3243_v41  ;;  %v5875_v61 = vcombine.low %v8226_v5, %v3243_v41  ;;  %v7098_v36 = vld [vmem:[#allocation11 + $0x38] sm:$0xff]   ;;  %v7100_v53 = vld [vmem:[#allocation11 + $0x70] sm:$0xff]   ;;  %6680 = vmatprep.subr.bf16.mxu1 %v7096_v42  ;;  %v7093_v45 = vld [vmem:[#allocation11 + $0xa8] sm:$0xff]  }
 0x36f   :  { %v7180_v2 = vpop.eup %7179  ;;  %v3128_v15 = vmul.f32 %v3126_v26, %v3048_v1  ;;  %v3138_v58 = vadd.f32 1.0, %v7178_v3  ;;  %6681 = vmatpush3.bf16.msra.mxu1 %v7098_v36  ;;  %v7102_v14 = vld [vmem:[#allocation11 + $0x30] sm:$0xff]   ;;  %v7104_v9 = vld [vmem:[#allocation11 + $0x68] sm:$0xff]   ;;  %v7095_v16 = vld [vmem:[#allocation11 + $0xa0] sm:$0xff]  }
 0x370   :  { %v3139_v55 = vadd.f32 1.0, %v7180_v2  ;;  %6682 = vmatprep.subr.bf16.mxu1 %v7100_v53  ;;  %v7106_v17 = vld [vmem:[#allocation11 + $0x28] sm:$0xff]   ;;  %v7108_v40 = vld [vmem:[#allocation11 + $0x60] sm:$0xff]   ;;  %v7097_v22 = vld [vmem:[#allocation11 + $0xd8] sm:$0xff]  }
 0x371   :  { %v3130_v49 = vadd.f32 %v3128_v15, %v3124_v27  ;;  %v7110_v5 = vld [vmem:[#allocation11 + $0x20] sm:$0xff]   ;;  %v7099_v27 = vld [vmem:[#allocation11 + $0x98] sm:$0xff]   ;;  %v7101_v26 = vld [vmem:[#allocation11 + $0xd0] sm:$0xff]  }
 0x372   :  { %7181 = vrcp.f32 %v3139_v55  ;;  %v7112_v1 = vld [vmem:[#allocation11 + $0x58] sm:$0xff]   ;;  %v7103_v3 = vld [vmem:[#allocation11 + $0x90] sm:$0xff]   ;;  %v7105_v2 = vld [vmem:[#allocation11 + $0xc8] sm:$0xff]  }
 0x373   :  { %v6181_v31 = vpack.c.bf16 %v3130_v49, %v3130_v49  ;;  %7183 = vrcp.f32 %v3138_v58  ;;  %6683 = vmatpush3.bf16.msra.mxu1 %v7102_v14  ;;  %v7107_v15 = vld [vmem:[#allocation11 + $0x88] sm:$0xff]   ;;  %v7109_v55 = vld [vmem:[#allocation11 + $0xc0] sm:$0xff]   ;;  %v7113_v58 = vld [vmem:[#allocation11 + $0x1f8] sm:$0xff]  }
 0x374   :  { %6684 = vmatprep.subr.bf16.mxu1 %v7104_v9  ;;  %v7111_v49 = vld [vmem:[#allocation11 + $0x80] sm:$0xff]   ;;  %v7128_v36 = vld [vmem:[#allocation11 + $0x178] sm:$0xff]  }
 0x375   :  { %3234 = vst [vmem:[#allocation2 + $0x20] sm:$0xf] %v6181_v31  ;;  %v7114_v31 = vld [vmem:[#allocation11 + $0x18] sm:$0xff]  }
 0x377   :  { %6685 = vmatpush3.bf16.msra.mxu1 %v7106_v17 }
 0x378   :  { %6686 = vmatprep.subr.bf16.mxu1 %v7108_v40 }
 0x37b   :  { %6687 = vmatpush3.bf16.msra.mxu1 %v7110_v5 }
 0x37c   :  { %v7087_v20 = vld [vmem:[#allocation2 + $0x20] ss:$36 sps:$4 sm:$0xff]   ;;  %6688 = vmatprep.subr.bf16.mxu1 %v7112_v1 }
 0x37f   :  { %v7182_v60 = vpop.eup %7181  ;;  %6689 = vmatpush3.bf16.msra.mxu1 %v7114_v31 }
 0x380   :  { %v3145_v19 = vmul.f32 %v7182_v60, %v7940_v21  ;;  %v7184_v37 = vpop.eup %7183  ;;  %v7063_v21 = vld [vmem:[#allocation9 + $0x168] sm:$0xff]  }
 0x381   :  { %v3144_v29 = vmul.f32 %v7184_v37, %v7927_v54  ;;  %v7067_v54 = vld [vmem:[#allocation9 + $0x160] sm:$0xff]   ;;  %v7118_v37 = vld [vmem:[#allocation11 + $0x10] sm:$0xff]  }
 0x382   :  { %v6166_v63 = vpack.c.bf16 %v3145_v19, %v3145_v19 }
 0x383   :  { %v6284_v33 = vpack.c.bf16 %v3060_v51, %v3144_v29  ;;  %v7094_v51 = vld [vmem:[#allocation11 + $0xe0] sm:$0xff]   ;;  %v7120_v29 = vld [vmem:[#allocation11 + $0x48] sm:$0xff]  }
 0x384   :  { %3155 = vst [vmem:[#allocation2 + $0x24] sm:$0xf] %v6166_v63  ;;  %v7116_v63 = vld [vmem:[#allocation11 + $0x50] sm:$0xff]  }
 0x385   :  { %6690 = vmatprep.subr.bf16.mxu1 %v7116_v63 }
 0x386   :  { %6691 = vmatpush3.bf16.msra.mxu1 %v7118_v37 }
 0x387   :  { %6692 = vmatprep.subr.bf16.mxu1 %v7120_v29 }
 0x38b   :  { %v3241_v38 = vld [vmem:[#allocation2 + $0x24] sm:$0xff] }
 0x38c   :  { %v5872_v18 = vcombine.high %v6284_v33, %v3241_v38  ;;  %v5871_v13 = vcombine.low %v6284_v33, %v3241_v38  ;;  %v7122_v38 = vld [vmem:[#allocation11 + $0x8] sm:$0xff]  }
 0x38d   :  { %6693 = vmatpush3.bf16.msra.mxu1 %v7122_v38 }
 0x38e   :  { %3900 = vmatprep.mubr.bf16.mxu0 %v5872_v18  ;;  %v7124_v18 = vld [vmem:[#allocation11 + $0x40] sm:$0xff]  }
 0x38f   :  { %3901 = vmatmul.mubr.bf16.vlgmr.msra.gmra.mxu0 %v5871_v13  ;;  %6694 = vmatprep.subr.bf16.mxu1 %v7124_v18 }
 0x390   :  { %6628 = vmatpush3.bf16.msra.mxu0 %v7057_v4  ;;  %3982 = vmatprep.mubr.bf16.mxu0 %v5876_v30  ;;  %v7126_v4 = vld [vmem:[#allocation11] sm:$0xff]  }
 0x391   :  { %6629 = vmatprep.subr.bf16.mxu0 %v7059_v44  ;;  %6695 = vmatpush3.bf16.msra.mxu1 %v7126_v4 }
 0x392   :  { %6724 = vmatprep.subr.bf16.mxu1 %v7128_v36 }
 0x394   :  { %6630 = vmatpush3.bf16.msra.mxu0 %v7061_v59 }
 0x395   :  { %6631 = vmatprep.subr.bf16.mxu0 %v7063_v21 }
 0x398   :  { %6632 = vmatpush3.bf16.msra.mxu0 %v7065_v62 }
 0x399   :  { %6633 = vmatprep.subr.bf16.mxu0 %v7067_v54 }
 0x39c   :  { %6634 = vmatpush3.bf16.msra.mxu0 %v7069_v6 }
 0x39d   :  { %6635 = vmatprep.subr.bf16.mxu0 %v7071_v10 }
 0x3a0   :  { %6636 = vmatpush3.bf16.msra.mxu0 %v7072_v12 }
 0x3a1   :  { %6637 = vmatprep.subr.bf16.mxu0 %v7073_v39 }
 0x3a4   :  { %6638 = vmatpush3.bf16.msra.mxu0 %v7074_v28 }
 0x3a5   :  { %6639 = vmatprep.subr.bf16.mxu0 %v7075_v25 }
 0x3a8   :  { %6640 = vmatpush3.bf16.msra.mxu0 %v7076_v24 }
 0x3a9   :  { %6641 = vmatprep.subr.bf16.mxu0 %v7077_v7 }
 0x3ac   :  { %6642 = vmatpush3.bf16.msra.mxu0 %v7078_v43 }
 0x3ad   :  { %6817 = vmatprep.subr.bf16.mxu0 %v7331_v34 }
 0x3af   :  { %3983 = vmatmul.mubr.bf16.vlgmr.msra.gmra.mxu0 %v5875_v61 }
 0x3b0   :  { %6818 = vmatpush3.bf16.msra.mxu0 %v7079_v23  ;;  %6833 = vmatprep.mubr.msk.bf16.mxu0 %vm8518_vm4, %v7331_v34 }
 0x3b1   :  { %6819 = vmatprep.subr.bf16.mxu0 %v7331_v34 }
 0x3b4   :  { %6820 = vmatpush3.bf16.msra.mxu0 %v7080_v8 }
 0x3b5   :  { %6821 = vmatprep.subr.bf16.mxu0 %v7331_v34 }
 0x3b8   :  { %6822 = vmatpush3.bf16.msra.mxu0 %v7081_v35 }
 0x3b9   :  { %6823 = vmatprep.subr.bf16.mxu0 %v7331_v34 }
 0x3bc   :  { %6824 = vmatpush3.bf16.msra.mxu0 %v7082_v46 }
 0x3bd   :  { %6825 = vmatprep.subr.bf16.mxu0 %v7331_v34 }
 0x3c0   :  { %6826 = vmatpush3.bf16.msra.mxu0 %v7083_v50 }
 0x3c1   :  { %6827 = vmatprep.subr.bf16.mxu0 %v7331_v34 }
 0x3c4   :  { %6828 = vmatpush3.bf16.msra.mxu0 %v7084_v57 }
 0x3c5   :  { %6829 = vmatprep.subr.bf16.mxu0 %v7331_v34 }
 0x3c8   :  { %6830 = vmatpush3.bf16.msra.mxu0 %v7085_v0 }
 0x3c9   :  { %6831 = vmatprep.subr.bf16.mxu0 %v7331_v34 }
 0x3cc   :  { %6832 = vmatpush3.bf16.msra.mxu0 %v7086_v11 }
 0x3cd   :  { %6702 = vmatprep.subr.bf16.mxu0 %v7088_v56 }
 0x3cf   :  { %6834 = vmatmul.mubr.bf16.vlgmr.msra.gmra.mxu0 %v7087_v20 }
 0x3d0   :  { %6703 = vmatpush3.bf16.msra.mxu0 %v7089_v48 }
 0x3d1   :  { %6704 = vmatprep.subr.bf16.mxu0 %v7090_v52 }
 0x3d4   :  { %6705 = vmatpush3.bf16.msra.mxu0 %v7091_v47 }
 0x3d5   :  { %6706 = vmatprep.subr.bf16.mxu0 %v7092_v32 }
 0x3d8   :  { %6707 = vmatpush3.bf16.msra.mxu0 %v7093_v45 }
 0x3d9   :  { %6708 = vmatprep.subr.bf16.mxu0 %v7094_v51 }
 0x3dc   :  { %6709 = vmatpush3.bf16.msra.mxu0 %v7095_v16 }
 0x3dd   :  { %6710 = vmatprep.subr.bf16.mxu0 %v7097_v22 }
 0x3e0   :  { %6711 = vmatpush3.bf16.msra.mxu0 %v7099_v27 }
 0x3e1   :  { %6712 = vmatprep.subr.bf16.mxu0 %v7101_v26 }
 0x3e4   :  { %6713 = vmatpush3.bf16.msra.mxu0 %v7103_v3 }
 0x3e5   :  { %6714 = vmatprep.subr.bf16.mxu0 %v7105_v2 }
 0x3e8   :  { %6715 = vmatpush3.bf16.msra.mxu0 %v7107_v15 }
 0x3e9   :  { %6716 = vmatprep.subr.bf16.mxu0 %v7109_v55 }
 0x3ec   :  { %6717 = vmatpush3.bf16.msra.mxu0 %v7111_v49 }
 0x3ed   :  { %6746 = vmatprep.subr.bf16.mxu0 %v7113_v58 }
 0x40d   :  { %v6621_v33 = vpop.f32.mrf.mxu1 }
 0x40f   :  { %v6622_v13 = vpop.f32.mrf.mxu1 }
 0x410   :  { %v6623_v39 = vadd.f32 %v6622_v13, %v6621_v33 }
 0x411   :  { %v6624_v30 = vpop.f32.mrf.mxu1 }
 0x413   :  { %v6625_v21 = vpop.f32.mrf.mxu1 }
 0x414   :  { %v6626_v23 = vadd.f32 %v6625_v21, %v6624_v30 }
 0x42d   :  { %v6665_v54 = vpop.f32.mrf.mxu1 }
 0x42f   :  { %v6666_v12 = vpop.f32.mrf.mxu1 }
 0x430   :  { %v6667_v46 = vadd.f32 %v6666_v12, %v6665_v54 }
 0x431   :  { %v6668_v43 = vpop.f32.mrf.mxu1 }
 0x433   :  { %v6669_v50 = vpop.f32.mrf.mxu1 }
 0x434   :  { %v6670_v20 = vadd.f32 %v6669_v50, %v6668_v43 }
 0x44f   :  { %v6599_v60 = vpop.f32.mrf.mxu0 }
 0x451   :  { %v6600_v19 = vpop.f32.mrf.mxu0 }
 0x452   :  { %v6601_v10 = vadd.f32 %v6600_v19, %v6599_v60 }
 0x453   :  { %v6602_v41 = vpop.f32.mrf.mxu0 }
 0x454   :  { %v3944_v24 = vadd.f32 %v6623_v39, %v6601_v10 }
 0x455   :  { %v6603_v44 = vpop.f32.mrf.mxu0 }
 0x456   :  { %v6604_v7 = vadd.f32 %v6603_v44, %v6602_v41 }
 0x458   :  { %v3947_v35 = vadd.f32 %v6626_v23, %v6604_v7 }
 0x46f   :  { %v6643_v59 = vpop.f32.mrf.mxu0 }
 0x471   :  { %v6644_v62 = vpop.f32.mrf.mxu0 }
 0x472   :  { %v6645_v28 = vadd.f32 %v6644_v62, %v6643_v59 }
 0x473   :  { %v6646_v6 = vpop.f32.mrf.mxu0 }
 0x474   :  { %v3985_v61 = vadd.f32 %v6645_v28, %v3944_v24 }
 0x475   :  { %v6647_v25 = vpop.f32.mrf.mxu0 }
 0x476   :  { %v6648_v8 = vadd.f32 %v6647_v25, %v6646_v6  ;;  %v4026_v0 = vadd.f32 %v6667_v46, %v3985_v61 }
 0x478   :  { %v3988_v57 = vadd.f32 %v6648_v8, %v3947_v35 }
 0x47a   :  { %v4029_v52 = vadd.f32 %v6670_v20, %v3988_v57 }
 0x48f   :  { %v4066_v11 = vpop.f32.mrf.mxu0 }
 0x490   :  { %v8243_v56 = vadd.f32 %v4066_v11, %v4026_v0 }
 0x491   :  { %v6835_v48 = vpop.f32.mrf.mxu0 }
 0x492   :  { %vm4083_vm1 = vcmp.ge.f32.partialorder %v8243_v56, -1.8  ;;  %vm4085_vm15 = vcmp.lt.f32.partialorder %v8243_v56, -1.4  ;;  %vm4093_vm3 = vcmp.ge.f32.partialorder %v8243_v56, -1.4 }
 0x493   :  { %v4069_v47 = vpop.f32.mrf.mxu0  ;;  %vm4087_vm6 = vmand %vm4083_vm1, %vm4085_vm15  ;;  %vm4095_vm13 = vcmp.lt.f32.partialorder %v8243_v56, -1.0  ;;  %vm4103_vm14 = vcmp.ge.f32.partialorder %v8243_v56, -1.0  ;;  %vm4105_vm9 = vcmp.lt.f32.partialorder %v8243_v56, -0.6  ;;  %vm4113_vm7 = vcmp.ge.f32.partialorder %v8243_v56, -0.6 }
 0x494   :  { %v8252_v42 = vadd.f32 %v4069_v47, %v4029_v52  ;;  %v8255_v32 = vsel %vm4087_vm6, 1.0, %v7331_v34  ;;  %vm4097_vm10 = vmand %vm4093_vm3, %vm4095_vm13  ;;  %vm4115_vm5 = vcmp.lt.f32.partialorder %v8243_v56, -0.2  ;;  %vm4125_vm12 = vcmp.lt.f32.partialorder %v8243_v56, 0.2 }
 0x495   :  { %v6836_v53 = vpop.f32.mrf.mxu0  ;;  %v5956_v14 = vsel %vm4097_vm10, 1.0, %v7331_v34  ;;  %vm8260_vm8 = vmand %vm4103_vm14, %vm4105_vm9  ;;  %v8266_v9 = vmul.f32 2.5, %v8243_v56  ;;  %v8269_v51 = vmul.f32 1.25, %v8243_v56 }
 0x496   :  { %vm4074_vm0 = vcmp.ge.f32.partialorder %v8252_v42, -2.2  ;;  %vm4076_vm2 = vcmp.lt.f32.partialorder %v8252_v42, -1.8  ;;  %vm4084_vm1 = vcmp.ge.f32.partialorder %v8252_v42, -1.8  ;;  %vm4117_vm15 = vmand %vm4113_vm7, %vm4115_vm5 }
 0x497   :  { %vm4078_vm3 = vmand %vm4074_vm0, %vm4076_vm2  ;;  %vm4086_vm6 = vcmp.lt.f32.partialorder %v8252_v42, -1.4  ;;  %vm4094_vm13 = vcmp.ge.f32.partialorder %v8252_v42, -1.4  ;;  %vm4096_vm14 = vcmp.lt.f32.partialorder %v8252_v42, -1.0  ;;  %vm4104_vm9 = vcmp.ge.f32.partialorder %v8252_v42, -1.0 }
 0x498   :  { %v5953_v17 = vsel %vm4078_vm3, 1.0, %v7331_v34  ;;  %vm4088_vm10 = vmand %vm4084_vm1, %vm4086_vm6  ;;  %vm4106_vm11 = vcmp.lt.f32.partialorder %v8252_v42, -0.6  ;;  %v5958_v16 = vsel %vm8260_vm8, 1.0, %v7331_v34  ;;  %vm4114_vm7 = vcmp.ge.f32.partialorder %v8252_v42, -0.6 }
 0x499   :  { %v5955_v40 = vsel %vm4088_vm10, 1.0, %v7331_v34  ;;  %vm4098_vm5 = vmand %vm4094_vm13, %vm4096_vm14  ;;  %vm4116_vm0 = vcmp.lt.f32.partialorder %v8252_v42, -0.2  ;;  %v5960_v22 = vsel %vm4117_vm15, 1.0, %v7331_v34  ;;  %vm4124_vm2 = vcmp.ge.f32.partialorder %v8252_v42, -0.2 }
 0x49a   :  { %v5957_v5 = vsel %vm4098_vm5, 1.0, %v7331_v34  ;;  %vm4108_vm1 = vmand %vm4104_vm9, %vm4106_vm11  ;;  %vm4126_vm3 = vcmp.lt.f32.partialorder %v8252_v42, 0.2  ;;  %vm4134_vm6 = vcmp.ge.f32.partialorder %v8252_v42, 0.2  ;;  %v8294_v27 = vmul.f32 2.5, %v8252_v42 }
 0x49b   :  { %v5959_v1 = vsel %vm4108_vm1, 1.0, %v7331_v34  ;;  %vm4118_vm8 = vmand %vm4114_vm7, %vm4116_vm0  ;;  %vm4136_vm13 = vcmp.lt.f32.partialorder %v8252_v42, 0.6  ;;  %v5976_v26 = vadd.f32 4.5, %v8266_v9  ;;  %v5978_v3 = vadd.f32 3.5, %v8266_v9 }
 0x49c   :  { %v5961_v2 = vsel %vm4118_vm8, 1.0, %v7331_v34  ;;  %vm8521_vm11 = vcmp.ge.f32.partialorder %v8243_v56, -0.2  ;;  %v5975_v15 = vadd.f32 5.5, %v8294_v27  ;;  %v5977_v55 = vadd.f32 4.5, %v8294_v27  ;;  %vm4128_vm14 = vmand %vm4124_vm2, %vm4126_vm3 }
 0x49d   :  { %vm4127_vm15 = vmand %vm8521_vm11, %vm4125_vm12  ;;  %v5979_v49 = vadd.f32 3.5, %v8294_v27  ;;  %v4197_v31 = vmul.f32 %v5976_v26, %v8255_v32  ;;  %v4199_v60 = vsub.f32 2.0, %v5976_v26  ;;  %v4207_v19 = vmul.f32 %v5978_v3, %v5956_v14 }
 0x49e   :  { %v8311_v58 = vsel %vm4127_vm15, 1.0, %v7331_v34  ;;  %v5963_v63 = vsel %vm4128_vm14, 1.0, %v7331_v34  ;;  %vm4138_vm12 = vmand %vm4134_vm6, %vm4136_vm13  ;;  %v4188_v37 = vmul.f32 %v5975_v15, %v5953_v17  ;;  %v4190_v29 = vsub.f32 2.0, %v5975_v15 }
 0x49f   :  { %v4198_v33 = vmul.f32 %v5977_v55, %v5955_v40  ;;  %v8318_v38 = vsel %vm4138_vm12, 1.0, %v7331_v34  ;;  %v4200_v41 = vsub.f32 2.0, %v5977_v55  ;;  %v4201_v18 = vmul.f32 %v5956_v14, %v4199_v60 }
 0x4a0   :  { %v4208_v13 = vmul.f32 %v5979_v49, %v5957_v5  ;;  %v4192_v4 = vmul.f32 %v5955_v40, %v4190_v29  ;;  %v4209_v44 = vsub.f32 2.0, %v5978_v3  ;;  %v4210_v30 = vsub.f32 2.0, %v5979_v49 }
 0x4a1   :  { %v5980_v59 = vadd.f32 2.5, %v8266_v9  ;;  %v4202_v21 = vmul.f32 %v5957_v5, %v4200_v41  ;;  %v8321_v62 = vadd.f32 %v4201_v18, %v4197_v31  ;;  %v5981_v54 = vadd.f32 2.5, %v8294_v27 }
 0x4a2   :  { %v5982_v6 = vadd.f32 1.5, %v8266_v9  ;;  %v4194_v10 = vadd.f32 %v4192_v4, %v4188_v37  ;;  %v4211_v12 = vmul.f32 %v5958_v16, %v4209_v44  ;;  %v4212_v39 = vmul.f32 %v5959_v1, %v4210_v30 }
 0x4a3   :  { %v4217_v28 = vmul.f32 %v5980_v59, %v5958_v16  ;;  %v4204_v25 = vadd.f32 %v4202_v21, %v4198_v33  ;;  %v4218_v24 = vmul.f32 %v5981_v54, %v5959_v1  ;;  %v4219_v7 = vsub.f32 2.0, %v5980_v59 }
 0x4a4   :  { %v4220_v43 = vsub.f32 2.0, %v5981_v54  ;;  %v4213_v23 = vadd.f32 %v4211_v12, %v4207_v19  ;;  %v4214_v61 = vadd.f32 %v4212_v39, %v4208_v13  ;;  %v5983_v8 = vadd.f32 1.5, %v8294_v27 }
 0x4a5   :  { %v4227_v35 = vmul.f32 %v5982_v6, %v5960_v22  ;;  %v4221_v46 = vmul.f32 %v5960_v22, %v4219_v7  ;;  %v4229_v57 = vsub.f32 2.0, %v5982_v6  ;;  %v5985_v0 = vadd.f32 0.5, %v8294_v27 }
 0x4a6   :  { %v4222_v50 = vmul.f32 %v5961_v2, %v4220_v43  ;;  %v4228_v11 = vmul.f32 %v5983_v8, %v5961_v2  ;;  %v4230_v20 = vsub.f32 2.0, %v5983_v8  ;;  %v8328_v48 = vmul.f32 1.25, %v8252_v42 }
 0x4a7   :  { %v5996_v52 = vadd.f32 2.25, %v8269_v51  ;;  %v4223_v47 = vadd.f32 %v4221_v46, %v4217_v28  ;;  %v4231_v53 = vmul.f32 %v8311_v58, %v4229_v57  ;;  %v4238_v14 = vmul.f32 %v5985_v0, %v5963_v63 }
 0x4a8   :  { %v4224_v36 = vadd.f32 %v4222_v50, %v4218_v24  ;;  %v4232_v45 = vmul.f32 %v5963_v63, %v4230_v20  ;;  %v4240_v17 = vsub.f32 2.0, %v5985_v0  ;;  %v5995_v16 = vadd.f32 2.75, %v8328_v48 }
 0x4a9   :  { %v5997_v40 = vadd.f32 2.25, %v8328_v48  ;;  %v8334_v22 = vadd.f32 %v4231_v53, %v4227_v35  ;;  %v4299_v5 = vmul.f32 %v5996_v52, %v8321_v62  ;;  %v4301_v1 = vsub.f32 1.5, %v5996_v52 }
 0x4aa   :  { %v5998_v26 = vadd.f32 1.75, %v8269_v51  ;;  %v4234_v3 = vadd.f32 %v4232_v45, %v4228_v11  ;;  %v4242_v2 = vmul.f32 %v8318_v38, %v4240_v17  ;;  %v4290_v15 = vmul.f32 %v5995_v16, %v4194_v10 }
 0x4ab   :  { %v4292_v55 = vsub.f32 1.5, %v5995_v16  ;;  %v4300_v49 = vmul.f32 %v5997_v40, %v4204_v25  ;;  %v4302_v31 = vsub.f32 1.5, %v5997_v40  ;;  %v4303_v60 = vmul.f32 %v4301_v1, %v4213_v23 }
 0x4ac   :  { %v5999_v19 = vadd.f32 1.75, %v8328_v48  ;;  %v8340_v63 = vadd.f32 %v4242_v2, %v4238_v14  ;;  %v4309_v29 = vmul.f32 %v5998_v26, %v4213_v23  ;;  %v4311_v33 = vsub.f32 1.5, %v5998_v26 }
 0x4ad   :  { %v4294_v37 = vmul.f32 %v4292_v55, %v4204_v25  ;;  %v4304_v41 = vmul.f32 %v4302_v31, %v4214_v61  ;;  %v8342_v18 = vadd.f32 %v4303_v60, %v4299_v5  ;;  %v6000_v59 = vadd.f32 1.25, %v8269_v51 }
 0x4ae   :  { %v4310_v13 = vmul.f32 %v5999_v19, %v4214_v61  ;;  %v4312_v4 = vsub.f32 1.5, %v5999_v19  ;;  %v4313_v30 = vmul.f32 %v4311_v33, %v4223_v47  ;;  %v6001_v21 = vadd.f32 1.25, %v8328_v48 }
 0x4af   :  { %v4296_v44 = vadd.f32 %v4294_v37, %v4290_v15  ;;  %v4306_v54 = vadd.f32 %v4304_v41, %v4300_v49  ;;  %v6003_v10 = vadd.f32 0.75, %v8328_v48  ;;  %v8348_v12 = vmul.f32 0.8333333, %v8243_v56 }
 0x4b0   :  { %v4314_v6 = vmul.f32 %v4312_v4, %v4224_v36  ;;  %v4315_v39 = vadd.f32 %v4313_v30, %v4309_v29  ;;  %v4319_v28 = vmul.f32 %v6000_v59, %v4223_v47  ;;  %v4320_v25 = vmul.f32 %v6001_v21, %v4224_v36 }
 0x4b1   :  { %v4321_v24 = vsub.f32 1.5, %v6000_v59  ;;  %v4322_v43 = vsub.f32 1.5, %v6001_v21  ;;  %v4330_v23 = vmul.f32 %v6003_v10, %v4234_v3  ;;  %v4332_v61 = vsub.f32 1.5, %v6003_v10 }
 0x4b2   :  { %v4316_v7 = vadd.f32 %v4314_v6, %v4310_v13  ;;  %v8352_v35 = vmul.f32 0.8333333, %v8252_v42  ;;  %v6014_v46 = vadd.f32 1.5, %v8348_v12  ;;  %v6016_v50 = vadd.f32 1.1666666, %v8348_v12 }
 0x4b3   :  { %v4323_v8 = vmul.f32 %v4321_v24, %v8334_v22  ;;  %v4324_v57 = vmul.f32 %v4322_v43, %v4234_v3  ;;  %v4334_v0 = vmul.f32 %v4332_v61, %v8340_v63  ;;  %vm4133_vm9 = vcmp.ge.f32.partialorder %v8243_v56, 0.2 }
 0x4b4   :  { %vm4135_vm10 = vcmp.lt.f32.partialorder %v8243_v56, 0.6  ;;  %v6013_v20 = vadd.f32 1.8333334, %v8352_v35  ;;  %v6015_v52 = vadd.f32 1.5, %v8352_v35  ;;  %v4391_v47 = vmul.f32 %v6014_v46, %v8342_v18 }
 0x4b5   :  { %v8359_v11 = vadd.f32 %v4323_v8, %v4319_v28  ;;  %v4326_v36 = vadd.f32 %v4324_v57, %v4320_v25  ;;  %v8364_v53 = vadd.f32 %v4334_v0, %v4330_v23  ;;  %v4393_v14 = vsub.f32 1.3333334, %v6014_v46  ;;  %vm4137_vm7 = vmand %vm4133_vm9, %vm4135_vm10 }
 0x4b6   :  { %v6017_v45 = vadd.f32 1.1666666, %v8352_v35  ;;  %v4382_v17 = vmul.f32 %v6013_v20, %v4296_v44  ;;  %v4384_v16 = vsub.f32 1.3333334, %v6013_v20  ;;  %v4392_v40 = vmul.f32 %v6015_v52, %v4306_v54 }
 0x4b7   :  { %v4394_v5 = vsub.f32 1.3333334, %v6015_v52  ;;  %v4395_v1 = vmul.f32 %v4393_v14, %v4315_v39  ;;  %v4401_v26 = vmul.f32 %v6016_v50, %v4315_v39  ;;  %v4403_v2 = vsub.f32 1.3333334, %v6016_v50 }
 0x4b8   :  { %v4402_v3 = vmul.f32 %v6017_v45, %v4316_v7  ;;  %v4386_v15 = vmul.f32 %v4384_v16, %v4306_v54  ;;  %v4404_v49 = vsub.f32 1.3333334, %v6017_v45  ;;  %v6019_v31 = vadd.f32 0.8333333, %v8352_v35 }
 0x4b9   :  { %v4396_v55 = vmul.f32 %v4394_v5, %v4316_v7  ;;  %v4397_v60 = vadd.f32 %v4395_v1, %v4391_v47  ;;  %v4405_v19 = vmul.f32 %v4403_v2, %v8359_v11  ;;  %v5964_v37 = vsel %vm4137_vm7, 1.0, %v7331_v34 }
 0x4ba   :  { %vm4143_vm5 = vcmp.ge.f32.partialorder %v8243_v56, 0.6  ;;  %v4388_v29 = vadd.f32 %v4386_v15, %v4382_v17  ;;  %v4406_v41 = vmul.f32 %v4404_v49, %v4326_v36  ;;  %v4412_v13 = vmul.f32 %v6019_v31, %v4326_v36 }
 0x4bb   :  { %v4398_v33 = vadd.f32 %v4396_v55, %v4392_v40  ;;  %v4407_v4 = vadd.f32 %v4405_v19, %v4401_v26  ;;  %v4414_v44 = vsub.f32 1.3333334, %v6019_v31  ;;  %vm4144_vm0 = vcmp.ge.f32.partialorder %v8252_v42, 0.6 }
 0x4bc   :  { %vm4145_vm2 = vcmp.lt.f32.partialorder %v8243_v56, 1.0  ;;  %v4408_v30 = vadd.f32 %v4406_v41, %v4402_v3  ;;  %vm4146_vm1 = vcmp.lt.f32.partialorder %v8252_v42, 1.0  ;;  %vm4153_vm6 = vcmp.ge.f32.partialorder %v8243_v56, 1.0 }
 0x4bd   :  { %v6329_v59 = vpack.c.bf16 %v4398_v33, %v4388_v29  ;;  %vm4147_vm3 = vmand %vm4143_vm5, %vm4145_vm2  ;;  %v4416_v21 = vmul.f32 %v4414_v44, %v8364_v53  ;;  %v8376_v54 = vpack.c.bf16 %v4407_v4, %v4397_v60  ;;  %vm4154_vm13 = vcmp.ge.f32.partialorder %v8252_v42, 1.0 }
 0x4be   :  { %vm4148_vm8 = vmand %vm4144_vm0, %vm4146_vm1  ;;  %v5966_v6 = vsel %vm4147_vm3, 1.0, %v7331_v34  ;;  %vm4155_vm11 = vcmp.lt.f32.partialorder %v8243_v56, 1.4  ;;  %vm4156_vm15 = vcmp.lt.f32.partialorder %v8252_v42, 1.4  ;;  %v5984_v39 = vadd.f32 0.5, %v8266_v9 }
 0x4bf   :  { %6382 = vst [vmem:[#allocation2 + $0x28] sm:$0xff] %v6329_v59   ;;  %v5967_v10 = vsel %vm4148_vm8, 1.0, %v7331_v34  ;;  %v4418_v28 = vadd.f32 %v4416_v21, %v4412_v13  ;;  %vm4157_vm14 = vmand %vm4153_vm6, %vm4155_vm11  ;;  %vm4163_vm12 = vcmp.ge.f32.partialorder %v8243_v56, 1.4  ;;  %vm4164_vm9 = vcmp.ge.f32.partialorder %v8252_v42, 1.4 }
 0x4c0   :  { %vm4165_vm10 = vcmp.lt.f32.partialorder %v8243_v56, 1.8  ;;  %vm4158_vm7 = vmand %vm4154_vm13, %vm4156_vm15  ;;  %v5968_v25 = vsel %vm4157_vm14, 1.0, %v7331_v34  ;;  %vm4166_vm5 = vcmp.lt.f32.partialorder %v8252_v42, 1.8  ;;  %v4237_v24 = vmul.f32 %v5984_v39, %v8311_v58  ;;  %v7115_v21 = vld [vmem:[#allocation11 + $0x1b8] sm:$0xff]  }
 0x4c1   :  { %vm4173_vm0 = vcmp.ge.f32.partialorder %v8243_v56, 1.8  ;;  %v6339_v7 = vpack.c.bf16 %v4418_v28, %v4408_v30  ;;  %v5969_v43 = vsel %vm4158_vm7, 1.0, %v7331_v34  ;;  %vm4167_vm2 = vmand %vm4163_vm12, %vm4165_vm10  ;;  %vm4174_vm1 = vcmp.ge.f32.partialorder %v8252_v42, 1.8 }
 0x4c2   :  { %vm4175_vm3 = vcmp.lt.f32.partialorder %v8243_v56, 2.2  ;;  %vm4168_vm6 = vmand %vm4164_vm9, %vm4166_vm5  ;;  %v5970_v23 = vsel %vm4167_vm2, 1.0, %v7331_v34  ;;  %vm4176_vm8 = vcmp.lt.f32.partialorder %v8252_v42, 2.2  ;;  %v4239_v61 = vsub.f32 2.0, %v5984_v39 }
 0x4c3   :  { %v5986_v8 = vadd.f32 -0.5, %v8266_v9  ;;  %6384 = vst [vmem:[#allocation2 + $0x30] sm:$0xff] %v6339_v7   ;;  %v5971_v46 = vsel %vm4168_vm6, 1.0, %v7331_v34  ;;  %vm4177_vm13 = vmand %vm4173_vm0, %vm4175_vm3  ;;  %v5987_v58 = vadd.f32 -0.5, %v8294_v27  ;;  %v5988_v50 = vadd.f32 -1.5, %v8266_v9  ;;  %v7117_v7 = vld [vmem:[#allocation11 + $0x1f0] sm:$0xff]  }
 0x4c4   :  { %v5989_v57 = vadd.f32 -1.5, %v8294_v27  ;;  %vm4178_vm11 = vmand %vm4174_vm1, %vm4176_vm8  ;;  %v5972_v0 = vsel %vm4177_vm13, 1.0, %v7331_v34  ;;  %v4241_v20 = vmul.f32 %v5964_v37, %v4239_v61  ;;  %v5990_v2 = vadd.f32 -2.5, %v8266_v9 }
 0x4c5   :  { %v4247_v52 = vmul.f32 %v5986_v8, %v5964_v37  ;;  %v4249_v47 = vsub.f32 2.0, %v5986_v8  ;;  %v5973_v36 = vsel %vm4178_vm11, 1.0, %v7331_v34  ;;  %v4248_v14 = vmul.f32 %v5987_v58, %v8318_v38 }
 0x4c6   :  { %v4250_v45 = vsub.f32 2.0, %v5987_v58  ;;  %v4257_v17 = vmul.f32 %v5988_v50, %v5966_v6  ;;  %v8404_v16 = vadd.f32 %v4241_v20, %v4237_v24  ;;  %v4258_v5 = vmul.f32 %v5989_v57, %v5967_v10 }
 0x4c7   :  { %v4251_v40 = vmul.f32 %v5966_v6, %v4249_v47  ;;  %v4259_v1 = vsub.f32 2.0, %v5988_v50  ;;  %v4260_v3 = vsub.f32 2.0, %v5989_v57  ;;  %v5991_v15 = vadd.f32 -2.5, %v8294_v27  ;;  %v7119_v47 = vld [vmem:[#allocation11 + $0x1b0] sm:$0xff]  }
 0x4c8   :  { %v4252_v26 = vmul.f32 %v5967_v10, %v4250_v45  ;;  %v5992_v31 = vadd.f32 -3.5, %v8266_v9  ;;  %v5993_v60 = vadd.f32 -3.5, %v8294_v27  ;;  %v4267_v37 = vmul.f32 %v5990_v2, %v5968_v25 }
 0x4c9   :  { %v4253_v55 = vadd.f32 %v4251_v40, %v4247_v52  ;;  %v4261_v49 = vmul.f32 %v5968_v25, %v4259_v1  ;;  %v4262_v19 = vmul.f32 %v5969_v43, %v4260_v3  ;;  %v4268_v29 = vmul.f32 %v5991_v15, %v5969_v43 }
 0x4ca   :  { %v4254_v38 = vadd.f32 %v4252_v26, %v4248_v14  ;;  %v4569_v33 = vld [vmem:[#allocation2 + $0x2c] sm:$0xff]  ;;  %v4269_v13 = vsub.f32 2.0, %v5990_v2  ;;  %v4270_v4 = vsub.f32 2.0, %v5991_v15  ;;  %v4277_v44 = vmul.f32 %v5992_v31, %v5970_v23 }
 0x4cb   :  { %v4263_v41 = vadd.f32 %v4261_v49, %v4257_v17  ;;  %v6050_v30 = vcombine.low %v8376_v54, %v4569_v33  ;;  %v6051_v59 = vcombine.high %v8376_v54, %v4569_v33  ;;  %v4264_v6 = vadd.f32 %v4262_v19, %v4258_v5  ;;  %v7121_v5 = vld [vmem:[#allocation11 + $0x1e8] sm:$0xff]  }
 0x4cc   :  { %v4278_v10 = vmul.f32 %v5993_v60, %v5971_v46  ;;  %v4271_v39 = vmul.f32 %v5970_v23, %v4269_v13  ;;  %v4272_v28 = vmul.f32 %v5971_v46, %v4270_v4  ;;  %v4279_v24 = vsub.f32 2.0, %v5992_v31  ;;  %v7125_v13 = vld [vmem:[#allocation11 + $0x1e0] sm:$0xff]  }
 0x4cd   :  { %v4280_v27 = vsub.f32 2.0, %v5993_v60  ;;  %5268 = vmatprep.mubr.bf16.mxu0 %v6051_v59  ;;  %v6004_v25 = vadd.f32 0.25, %v8269_v51  ;;  %v6005_v43 = vadd.f32 0.25, %v8328_v48  ;;  %v6006_v61 = vadd.f32 -0.25, %v8269_v51 }
 0x4ce   :  { %v6007_v8 = vadd.f32 -0.25, %v8328_v48  ;;  %5269 = vmatmul.mubr.bf16.vlgmr.msra.gmra.mxu0 %v6050_v30  ;;  %v4273_v58 = vadd.f32 %v4271_v39, %v4267_v37  ;;  %v4274_v54 = vadd.f32 %v4272_v28, %v4268_v29  ;;  %v4281_v50 = vmul.f32 %v5972_v0, %v4279_v24  ;;  %v7123_v37 = vld [vmem:[#allocation11 + $0x1a8] sm:$0xff]   ;;  %v7127_v28 = vld [vmem:[#allocation11 + $0x1a0] sm:$0xff]  }
 0x4cf   :  { %v4282_v57 = vmul.f32 %v5973_v36, %v4280_v27  ;;  %6747 = vmatpush3.bf16.msra.mxu0 %v7115_v21  ;;  %v4339_v23 = vmul.f32 %v6004_v25, %v8404_v16  ;;  %v4340_v46 = vmul.f32 %v6005_v43, %v8340_v63  ;;  %v4341_v20 = vsub.f32 1.5, %v6004_v25 }
 0x4d0   :  { %v4342_v52 = vsub.f32 1.5, %v6005_v43  ;;  %v4283_v14 = vadd.f32 %v4281_v50, %v4277_v44  ;;  %v4349_v17 = vmul.f32 %v6006_v61, %v4253_v55  ;;  %v4350_v40 = vmul.f32 %v6007_v8, %v4254_v38  ;;  %6748 = vmatprep.subr.bf16.mxu0 %v7117_v7 }
 0x4d1   :  { %v4284_v45 = vadd.f32 %v4282_v57, %v4278_v10  ;;  %v4343_v1 = vmul.f32 %v4341_v20, %v4253_v55  ;;  %v4351_v3 = vsub.f32 1.5, %v6006_v61  ;;  %v4352_v2 = vsub.f32 1.5, %v6007_v8  ;;  %v7129_v8 = vld [vmem:[#allocation11 + $0x1d8] sm:$0xff]  }
 0x4d2   :  { %v4344_v26 = vmul.f32 %v4342_v52, %v4254_v38  ;;  %v6008_v0 = vadd.f32 -0.75, %v8269_v51  ;;  %v6009_v36 = vadd.f32 -0.75, %v8328_v48  ;;  %v6010_v15 = vadd.f32 -1.25, %v8269_v51 }
 0x4d3   :  { %v6011_v63 = vadd.f32 -1.25, %v8328_v48  ;;  %v8422_v49 = vadd.f32 %v4343_v1, %v4339_v23  ;;  %v4353_v60 = vmul.f32 %v4351_v3, %v4263_v41  ;;  %v4354_v19 = vmul.f32 %v4352_v2, %v4264_v6  ;;  %6749 = vmatpush3.bf16.msra.mxu0 %v7119_v47  ;;  %v7133_v3 = vld [vmem:[#allocation11 + $0x1d0] sm:$0xff]  }
 0x4d4   :  { %v4346_v31 = vadd.f32 %v4344_v26, %v4340_v46  ;;  %v4359_v29 = vmul.f32 %v6008_v0, %v4263_v41  ;;  %v4360_v55 = vmul.f32 %v6009_v36, %v4264_v6  ;;  %v4361_v38 = vsub.f32 1.5, %v6008_v0  ;;  %6750 = vmatprep.subr.bf16.mxu0 %v7121_v5 }
 0x4d5   :  { %v4362_v33 = vsub.f32 1.5, %v6009_v36  ;;  %v4355_v4 = vadd.f32 %v4353_v60, %v4349_v17  ;;  %v4356_v44 = vadd.f32 %v4354_v19, %v4350_v40  ;;  %v4369_v30 = vmul.f32 %v6010_v15, %v4273_v58 }
 0x4d6   :  { %v4370_v59 = vmul.f32 %v6011_v63, %v4274_v54  ;;  %v4363_v21 = vmul.f32 %v4361_v38, %v4273_v58  ;;  %v4371_v48 = vsub.f32 1.5, %v6010_v15  ;;  %v4372_v39 = vsub.f32 1.5, %v6011_v63 }
 0x4d7   :  { %v4364_v10 = vmul.f32 %v4362_v33, %v4274_v54  ;;  %v6021_v24 = vadd.f32 0.5, %v8352_v35  ;;  %v6022_v27 = vadd.f32 0.16666667, %v8348_v12  ;;  %v6023_v41 = vadd.f32 0.16666667, %v8352_v35  ;;  %6751 = vmatpush3.bf16.msra.mxu0 %v7123_v37 }
 0x4d8   :  { %v6026_v6 = vadd.f32 -0.5, %v8348_v12  ;;  %v4365_v7 = vadd.f32 %v4363_v21, %v4359_v29  ;;  %v4373_v43 = vmul.f32 %v4371_v48, %v4283_v14  ;;  %v4374_v61 = vmul.f32 %v4372_v39, %v4284_v45  ;;  %6752 = vmatprep.subr.bf16.mxu0 %v7125_v13  ;;  %v7131_v45 = vld [vmem:[#allocation11 + $0x198] sm:$0xff]  }
 0x4d9   :  { %v4366_v25 = vadd.f32 %v4364_v10, %v4360_v55  ;;  %v4422_v58 = vmul.f32 %v6021_v24, %v8364_v53  ;;  %v4424_v54 = vsub.f32 1.3333334, %v6021_v24  ;;  %v4431_v50 = vmul.f32 %v6022_v27, %v8422_v49 }
 0x4da   :  { %v4432_v57 = vmul.f32 %v6023_v41, %v4346_v31  ;;  %v4375_v23 = vadd.f32 %v4373_v43, %v4369_v30  ;;  %v4376_v46 = vadd.f32 %v4374_v61, %v4370_v59  ;;  %v4433_v20 = vsub.f32 1.3333334, %v6022_v27 }
 0x4db   :  { %v4434_v52 = vsub.f32 1.3333334, %v6023_v41  ;;  %v4426_v47 = vmul.f32 %v4424_v54, %v4346_v31  ;;  %v6024_v17 = vadd.f32 -0.16666667, %v8348_v12  ;;  %v6025_v40 = vadd.f32 -0.16666667, %v8352_v35  ;;  %6753 = vmatpush3.bf16.msra.mxu0 %v7127_v28 }
 0x4dc   :  { %v6027_v14 = vadd.f32 -0.5, %v8352_v35  ;;  %v4435_v5 = vmul.f32 %v4433_v20, %v4355_v4  ;;  %v4451_v53 = vmul.f32 %v6026_v6, %v4365_v7  ;;  %v4453_v26 = vsub.f32 1.3333334, %v6026_v6  ;;  %6754 = vmatprep.subr.bf16.mxu0 %v7129_v8  ;;  %v7135_v35 = vld [vmem:[#allocation11 + $0x190] sm:$0xff]   ;;  %v7141_v8 = vld [vmem:[#allocation11 + $0x1c0] sm:$0xff]  }
 0x4dd   :  { %v4436_v1 = vmul.f32 %v4434_v52, %v4356_v44  ;;  %v4428_v2 = vadd.f32 %v4426_v47, %v4422_v58  ;;  %v4441_v0 = vmul.f32 %v6024_v17, %v4355_v4  ;;  %v4442_v36 = vmul.f32 %v6025_v40, %v4356_v44  ;;  %v7137_v4 = vld [vmem:[#allocation11 + $0x1c8] sm:$0xff]   ;;  %v7143_v47 = vld [vmem:[#allocation11 + $0x180] sm:$0xff]  }
 0x4de   :  { %v4443_v15 = vsub.f32 1.3333334, %v6024_v17  ;;  %v4437_v63 = vadd.f32 %v4435_v5, %v4431_v50  ;;  %v4444_v60 = vsub.f32 1.3333334, %v6025_v40  ;;  %v4452_v19 = vmul.f32 %v6027_v14, %v4366_v25 }
 0x4df   :  { %v4438_v31 = vadd.f32 %v4436_v1, %v4432_v57  ;;  %v4454_v29 = vsub.f32 1.3333334, %v6027_v14  ;;  %v4455_v55 = vmul.f32 %v4453_v26, %v4375_v23  ;;  %vm4073_vm15 = vcmp.ge.f32.partialorder %v8243_v56, -2.2  ;;  %6755 = vmatpush3.bf16.msra.mxu0 %v7131_v45 }
 0x4e0   :  { %v4445_v37 = vmul.f32 %v4443_v15, %v4365_v7  ;;  %v4446_v38 = vmul.f32 %v4444_v60, %v4366_v25  ;;  %vm4075_vm14 = vcmp.lt.f32.partialorder %v8243_v56, -1.8  ;;  %v5974_v13 = vadd.f32 5.5, %v8266_v9  ;;  %6756 = vmatprep.subr.bf16.mxu0 %v7133_v3  ;;  %v7139_v9 = vld [vmem:[#allocation11 + $0x188] sm:$0xff]  }
 0x4e1   :  { %v6349_v33 = vpack.c.bf16 %v4438_v31, %v4428_v2  ;;  %v4456_v30 = vmul.f32 %v4454_v29, %v4376_v46  ;;  %v4457_v59 = vadd.f32 %v4455_v55, %v4451_v53  ;;  %vm4077_vm12 = vmand %vm4073_vm15, %vm4075_vm14  ;;  %v5994_v21 = vadd.f32 2.75, %v8269_v51 }
 0x4e2   :  { %v4447_v44 = vadd.f32 %v4445_v37, %v4441_v0  ;;  %v4448_v10 = vadd.f32 %v4446_v38, %v4442_v36  ;;  %v5952_v48 = vsel %vm4077_vm12, 1.0, %v7331_v34  ;;  %v4189_v39 = vsub.f32 2.0, %v5974_v13 }
 0x4e3   :  { %6386 = vst [vmem:[#allocation2 + $0x38] sm:$0xff] %v6349_v33   ;;  %v6012_v28 = vadd.f32 1.8333334, %v8348_v12  ;;  %v4458_v24 = vadd.f32 %v4456_v30, %v4452_v19  ;;  %v6199_v41 = vpack.c.bf16 %v4457_v59, %v4457_v59  ;;  %v4187_v6 = vmul.f32 %v5974_v13, %v5952_v48  ;;  %6757 = vmatpush3.bf16.msra.mxu0 %v7135_v35  ;;  %v7132_v30 = vld [vmem:[#allocation11 + $0x170] sm:$0xff]   ;;  %v7142_v48 = vld [vmem:[#allocation11 + $0x120] sm:$0xff]  }
 0x4e4   :  { %v6354_v27 = vpack.c.bf16 %v4447_v44, %v4437_v63  ;;  %v4191_v7 = vmul.f32 %v8255_v32, %v4189_v39  ;;  %v4291_v25 = vsub.f32 1.5, %v5994_v21  ;;  %v6028_v61 = vmul.f32 -1.442695, %v8243_v56  ;;  %6758 = vmatprep.subr.bf16.mxu0 %v7137_v4  ;;  %v7130_v44 = vld [vmem:[#allocation11 + $0x138] sm:$0xff]  }
 0x4e5   :  { %v4383_v43 = vsub.f32 1.3333334, %v6012_v28  ;;  %v6359_v58 = vpack.c.bf16 %v4458_v24, %v4448_v10  ;;  %4561 = vst [vmem:[#allocation2 + $0x20] sm:$0xf] %v6199_v41  ;;  %v6029_v54 = vmul.f32 -1.442695, %v8252_v42 }
 0x4e6   :  { %v6002_v50 = vadd.f32 0.75, %v8269_v51  ;;  %v4193_v57 = vadd.f32 %v4191_v7, %v4187_v6  ;;  %v4293_v23 = vmul.f32 %v4291_v25, %v8321_v62  ;;  %7185 = vpow2.f32 %v6028_v61  ;;  %v7136_v10 = vld [vmem:[#allocation11 + $0x168] sm:$0xff]   ;;  %v7144_v39 = vld [vmem:[#allocation11 + $0x158] sm:$0xff]   ;;  %v7146_v24 = vld [vmem:[#allocation11 + $0x150] sm:$0xff]  }
 0x4e7   :  { %v4385_v46 = vmul.f32 %v4383_v43, %v8342_v18  ;;  %6388 = vst [vmem:[#allocation2 + $0x40] sm:$0xff] %v6359_v58   ;;  %7187 = vpow2.f32 %v6029_v54  ;;  %v6018_v52 = vadd.f32 0.8333333, %v8348_v12  ;;  %6759 = vmatpush3.bf16.msra.mxu0 %v7139_v9  ;;  %v6020_v40 = vadd.f32 0.5, %v8348_v12  ;;  %v7148_v41 = vld [vmem:[#allocation11 + $0x148] sm:$0xff]   ;;  %v7150_v9 = vld [vmem:[#allocation11 + $0x140] sm:$0xff]  }
 0x4e8   :  { %v4329_v32 = vmul.f32 %v6002_v50, %v8334_v22  ;;  %v4331_v20 = vsub.f32 1.5, %v6002_v50  ;;  %v4289_v17 = vmul.f32 %v5994_v21, %v4193_v57  ;;  %6760 = vmatprep.subr.bf16.mxu0 %v7141_v8  ;;  %v7134_v21 = vld [vmem:[#allocation11 + $0x130] sm:$0xff]   ;;  %v7149_v6 = vld [vmem:[#allocation11 + $0x108] sm:$0xff]   ;;  %v7151_v7 = vld [vmem:[#allocation11 + $0x100] sm:$0xff]  }
 0x4e9   :  { %v4423_v62 = vsub.f32 1.3333334, %v6020_v40  ;;  %v4411_v18 = vmul.f32 %v6018_v52, %v8359_v11  ;;  %v4413_v5 = vsub.f32 1.3333334, %v6018_v52  ;;  %v7152_v25 = vld [vmem:[#allocation11 + $0x238] sm:$0xff]   ;;  %v7153_v61 = vld [vmem:[#allocation11 + $0x230] sm:$0xff]  }
 0x4ea   :  { %v4333_v51 = vmul.f32 %v4331_v20, %v8404_v16  ;;  %v4295_v14 = vadd.f32 %v4293_v23, %v4289_v17  ;;  %v4570_v33 = vld [vmem:[#allocation2 + $0x34] sm:$0xff]  ;;  %v7154_v8 = vld [vmem:[#allocation11 + $0x228] sm:$0xff]   ;;  %v7157_v50 = vld [vmem:[#allocation11 + $0x210] sm:$0xff]  }
 0x4eb   :  { %6761 = vmatpush3.bf16.msra.mxu0 %v7143_v47  ;;  %v4425_v22 = vmul.f32 %v4423_v62, %v8422_v49  ;;  %v7155_v58 = vld [vmem:[#allocation11 + $0x220] sm:$0xff]   ;;  %v7156_v54 = vld [vmem:[#allocation11 + $0x218] sm:$0xff]   ;;  %v7158_v57 = vld [vmem:[#allocation11 + $0x208] sm:$0xff]  }
 0x4ec   :  { %v4335_v45 = vadd.f32 %v4333_v51, %v4329_v32  ;;  %v4381_v1 = vmul.f32 %v6012_v28, %v4295_v14  ;;  %v7145_v28 = vld [vmem:[#allocation11 + $0x118] sm:$0xff]   ;;  %v7159_v23 = vld [vmem:[#allocation11 + $0x200] sm:$0xff]  }
 0x4ee   :  { %v4415_v53 = vmul.f32 %v4413_v5, %v4335_v45  ;;  %v4421_v26 = vmul.f32 %v6020_v40, %v4335_v45  ;;  %v4571_v3 = vld [vmem:[#allocation2 + $0x3c] sm:$0xff]  ;;  %v4387_v2 = vadd.f32 %v4385_v46, %v4381_v1 }
 0x4ef   :  { %v6055_v0 = vcombine.high %v6354_v27, %v4571_v3  ;;  %v6054_v15 = vcombine.low %v6354_v27, %v4571_v3  ;;  %v7147_v27 = vld [vmem:[#allocation11 + $0x110] sm:$0xff]   ;;  %v7160_v46 = vld [vmem:[#allocation2 + $0x20] ss:$36 sps:$4 sm:$0xff]  }
 0x4f0   :  { %v4417_v36 = vadd.f32 %v4415_v53, %v4411_v18  ;;  %v4427_v12 = vadd.f32 %v4425_v22, %v4421_v26 }
 0x4f1   :  { %5350 = vmatprep.mubr.bf16.mxu0 %v6055_v0 }
 0x4f2   :  { %v6344_v16 = vpack.c.bf16 %v4427_v12, %v4417_v36  ;;  %5351 = vmatmul.mubr.bf16.vlgmr.msra.gmra.mxu0 %v6054_v15 }
 0x4f3   :  { %v7186_v63 = vpop.eup %7185 }
 0x4f4   :  { %v7188_v31 = vpop.eup %7187  ;;  %v4465_v60 = vadd.f32 1.0, %v7186_v63  ;;  %v6053_v59 = vcombine.high %v6344_v16, %v4570_v33  ;;  %v6052_v43 = vcombine.low %v6344_v16, %v4570_v33 }
 0x4f5   :  { %v4466_v11 = vadd.f32 1.0, %v7188_v31 }
 0x4f6   :  { %7189 = vrcp.f32 %v4465_v60 }
 0x4f7   :  { %7191 = vrcp.f32 %v4466_v11 }
 0x503   :  { %v7190_v19 = vpop.eup %7189 }
 0x504   :  { %v7192_v37 = vpop.eup %7191  ;;  %v4471_v49 = vmul.f32 %v7190_v19, %v8243_v56  ;;  %v7138_v56 = vld [vmem:[#allocation11 + $0x128] sm:$0xff]  }
 0x505   :  { %v4472_v29 = vmul.f32 %v7192_v37, %v8252_v42  ;;  %v7140_v42 = vld [vmem:[#allocation11 + $0x160] sm:$0xff]  }
 0x506   :  { %v6324_v55 = vpack.c.bf16 %v4387_v2, %v4471_v49 }
 0x507   :  { %v6184_v35 = vpack.c.bf16 %v4472_v29, %v4472_v29 }
 0x509   :  { %4482 = vst [vmem:[#allocation2 + $0x24] sm:$0xf] %v6184_v35 }
 0x510   :  { %v4568_v38 = vld [vmem:[#allocation2 + $0x24] sm:$0xff] }
 0x511   :  { %v6048_v13 = vcombine.low %v6324_v55, %v4568_v38  ;;  %v6049_v4 = vcombine.high %v6324_v55, %v4568_v38 }
 0x513   :  { %5227 = vmatprep.mubr.bf16.mxu1 %v6049_v4 }
 0x514   :  { %5228 = vmatmul.mubr.bf16.vlgmr.msra.gmra.mxu1 %v6048_v13 }
 0x515   :  { %6725 = vmatpush3.bf16.msra.mxu1 %v7130_v44  ;;  %5309 = vmatprep.mubr.bf16.mxu1 %v6053_v59 }
 0x516   :  { %6726 = vmatprep.subr.bf16.mxu1 %v7132_v30 }
 0x519   :  { %6727 = vmatpush3.bf16.msra.mxu1 %v7134_v21 }
 0x51a   :  { %6728 = vmatprep.subr.bf16.mxu1 %v7136_v10 }
 0x51d   :  { %6729 = vmatpush3.bf16.msra.mxu1 %v7138_v56 }
 0x51e   :  { %6730 = vmatprep.subr.bf16.mxu1 %v7140_v42 }
 0x521   :  { %6731 = vmatpush3.bf16.msra.mxu1 %v7142_v48 }
 0x522   :  { %6732 = vmatprep.subr.bf16.mxu1 %v7144_v39 }
 0x525   :  { %6733 = vmatpush3.bf16.msra.mxu1 %v7145_v28 }
 0x526   :  { %6734 = vmatprep.subr.bf16.mxu1 %v7146_v24 }
 0x529   :  { %6735 = vmatpush3.bf16.msra.mxu1 %v7147_v27 }
 0x52a   :  { %6736 = vmatprep.subr.bf16.mxu1 %v7148_v41 }
 0x52d   :  { %6737 = vmatpush3.bf16.msra.mxu1 %v7149_v6 }
 0x52e   :  { %6738 = vmatprep.subr.bf16.mxu1 %v7150_v9 }
 0x531   :  { %6739 = vmatpush3.bf16.msra.mxu1 %v7151_v7 }
 0x532   :  { %6837 = vmatprep.subr.bf16.mxu1 %v7331_v34 }
 0x534   :  { %5310 = vmatmul.mubr.bf16.vlgmr.msra.gmra.mxu1 %v6052_v43 }
 0x535   :  { %6838 = vmatpush3.bf16.msra.mxu1 %v7152_v25  ;;  %6853 = vmatprep.mubr.msk.bf16.mxu1 %vm8518_vm4, %v7331_v34 }
 0x536   :  { %6839 = vmatprep.subr.bf16.mxu1 %v7331_v34 }
 0x539   :  { %6840 = vmatpush3.bf16.msra.mxu1 %v7153_v61 }
 0x53a   :  { %6841 = vmatprep.subr.bf16.mxu1 %v7331_v34 }
 0x53d   :  { %6842 = vmatpush3.bf16.msra.mxu1 %v7154_v8 }
 0x53e   :  { %6843 = vmatprep.subr.bf16.mxu1 %v7331_v34 }
 0x541   :  { %6844 = vmatpush3.bf16.msra.mxu1 %v7155_v58 }
 0x542   :  { %6845 = vmatprep.subr.bf16.mxu1 %v7331_v34 }
 0x545   :  { %6846 = vmatpush3.bf16.msra.mxu1 %v7156_v54 }
 0x546   :  { %6847 = vmatprep.subr.bf16.mxu1 %v7331_v34 }
 0x549   :  { %6848 = vmatpush3.bf16.msra.mxu1 %v7157_v50 }
 0x54a   :  { %6849 = vmatprep.subr.bf16.mxu1 %v7331_v34 }
 0x54d   :  { %6850 = vmatpush3.bf16.msra.mxu1 %v7158_v57 }
 0x54e   :  { %6851 = vmatprep.subr.bf16.mxu1 %v7331_v34 }
 0x551   :  { %6852 = vmatpush3.bf16.msra.mxu1 %v7159_v23 }
 0x554   :  { %6854 = vmatmul.mubr.bf16.vlgmr.msra.gmra.mxu1 %v7160_v46 }
 0x58e   :  { %v6718_v52 = vpop.f32.mrf.mxu0 }
 0x590   :  { %v6719_v17 = vpop.f32.mrf.mxu0 }
 0x591   :  { %v6720_v53 = vadd.f32 %v6719_v17, %v6718_v52 }
 0x592   :  { %v6721_v51 = vpop.f32.mrf.mxu0 }
 0x594   :  { %v6722_v62 = vpop.f32.mrf.mxu0 }
 0x595   :  { %v6723_v36 = vadd.f32 %v6722_v62, %v6721_v51 }
 0x5b2   :  { %v6762_v18 = vpop.f32.mrf.mxu0 }
 0x5b4   :  { %v6763_v22 = vpop.f32.mrf.mxu0 }
 0x5b5   :  { %v6764_v63 = vadd.f32 %v6763_v22, %v6762_v18 }
 0x5b6   :  { %v6765_v0 = vpop.f32.mrf.mxu0 }
 0x5b8   :  { %v6766_v31 = vpop.f32.mrf.mxu0 }
 0x5b9   :  { %v6767_v37 = vadd.f32 %v6766_v31, %v6765_v0 }
 0x5d4   :  { %v6696_v32 = vpop.f32.mrf.mxu1 }
 0x5d6   :  { %v6697_v20 = vpop.f32.mrf.mxu1 }
 0x5d7   :  { %v6698_v1 = vadd.f32 %v6697_v20, %v6696_v32 }
 0x5d8   :  { %v6699_v47 = vpop.f32.mrf.mxu1 }
 0x5d9   :  { %v5271_v3 = vadd.f32 %v6720_v53, %v6698_v1 }
 0x5da   :  { %v6700_v40 = vpop.f32.mrf.mxu1 }
 0x5db   :  { %v6701_v2 = vadd.f32 %v6700_v40, %v6699_v47 }
 0x5dd   :  { %v5274_v16 = vadd.f32 %v6723_v36, %v6701_v2 }
 0x5f4   :  { %v6740_v14 = vpop.f32.mrf.mxu1 }
 0x5f6   :  { %v6741_v45 = vpop.f32.mrf.mxu1 }
 0x5f7   :  { %v6742_v26 = vadd.f32 %v6741_v45, %v6740_v14 }
 0x5f8   :  { %v6743_v5 = vpop.f32.mrf.mxu1 }
 0x5f9   :  { %v5312_v12 = vadd.f32 %v6742_v26, %v5271_v3 }
 0x5fa   :  { %v6744_v34 = vpop.f32.mrf.mxu1 }
 0x5fb   :  { %v6745_v15 = vadd.f32 %v6744_v34, %v6743_v5  ;;  %v5353_v11 = vadd.f32 %v6764_v63, %v5312_v12 }
 0x5fd   :  { %v5315_v60 = vadd.f32 %v6745_v15, %v5274_v16 }
 0x5ff   :  { %v5356_v55 = vadd.f32 %v6767_v37, %v5315_v60 }
 0x614   :  { %v5393_v19 = vpop.f32.mrf.mxu1 }
 0x615   :  { %v5394_v49 = vadd.f32 %v5393_v19, %v5353_v11 }
 0x616   :  { %v6855_v29 = vpop.f32.mrf.mxu1 }
 0x617   :  { %5400 = vst [vmem:[#allocation12] sm:$0xff] %v5394_v49 }
 0x618   :  { %v5396_v35 = vpop.f32.mrf.mxu1 }
 0x619   :  { %v5397_v38 = vadd.f32 %v5396_v35, %v5356_v55 }
 0x61a   :  { %v6856_v33 = vpop.f32.mrf.mxu1 }
 0x61b   :  { %5401 = vst [vmem:[#allocation12 + $0x8] sm:$0xff] %v5397_v38 }
 0x61c   :  { %7305 = shalt.err (!%p7302_p1)
}
 0x61d   :  { %5413 = dma.vmem_to_hbm [thread:$0]  %s5408_s4, 256, %s8474_s5, [#allocation5], %s7327_s7, %s7327_s7, %s7328_s8  }
 0x61e   :  { %7320 = dma.done.wait [#allocation5], 256  }
 0x61f   :  { %7321 = vsyncadd [#allocation5], 4294967040 }
 0x620   :  { %5417 = vsyncpa [#allocation4], 1 }
 0x621   :  { %5418 = vsyncpa [#allocation7], 1 }
 0x622   :  { %5419 = vsyncpa [#allocation10], 1 }
 0x623   :  { %5420 = vsyncpa [#allocation5], 1 }

</bundles_post_ra>
